<compile_context>
chip_gen: v6e
topology: v6e:2x2x1
jax: 0.10.0
libtpu: 0.0.40
codegen_flags: <defaults>
</compile_context>

<pallas_src>
import functools
import math

import jax
import jax.numpy as jnp
from jax import lax
from jax.experimental import pallas as pl
from jax.experimental.pallas import tpu as pltpu


_ATOMS_PAD = 128          # one full lane tile per action's atom distribution


# ---------------------------------------------------------------------------
# VMEM budget (re-derived per TPU generation)
# ---------------------------------------------------------------------------

_VMEM_LIMIT = None


def _vmem_limit():
    """Scoped-VMEM budget: 3/4 of physical VMEM, capped at 96 MiB."""
    global _VMEM_LIMIT
    if _VMEM_LIMIT is None:
        try:
            cap = int(pltpu.get_tpu_info().vmem_capacity_bytes)
        except Exception:                       # fall back to v7x-sized VMEM
            cap = 64 * 1024 * 1024
        _VMEM_LIMIT = int(min(cap * 3 // 4, 96 * 1024 * 1024))
    return _VMEM_LIMIT


# ---------------------------------------------------------------------------
# Kernel 1: fused Conv3x3(valid) + MaxPool2d(4) + ReLU  (one NHWC image/step)
# ---------------------------------------------------------------------------

def _conv3x3_pool4_relu_kernel(x_ref, w_ref, b_ref, o_ref, *, OW, Hp, Wp):
    """x_ref: (H, W, Cin) bf16; w_ref: (9, Cin, O) bf16 (tap = kh*3+kw);
    b_ref: (1, O) f32; o_ref: (Hp, Wp, O) bf16.

    Each pooled output row g consumes input rows 4g..4g+5.  Conv rows are
    built from 9 shifted in-VMEM slices (no HBM im2col), accumulated in f32,
    maxed over the 4x4 pooling window and ReLU'd before the store.
    """
    w = w_ref[...]                                   # (9, Cin, O)
    bias = b_ref[...]                                # (1, O) f32

    def row_group(g, carry):
        # The 6 input rows feeding pooled output row g.
        rows = [x_ref[4 * g + t] for t in range(6)]  # each (W, Cin) bf16

        def conv_row(j):                             # conv output row 4g+j
            acc = None
            for kh in range(3):
                for kw in range(3):
                    t = jnp.dot(rows[j + kh][kw:kw + OW], w[kh * 3 + kw],
                                preferred_element_type=jnp.float32)
                    acc = t if acc is None else acc + t
            return acc + bias                        # (OW, O) f32

        m = conv_row(0)
        for j in range(1, 4):
            m = jnp.maximum(m, conv_row(j))          # max over the 4 H taps
        m = jnp.maximum(m, 0.0)                      # ReLU (commutes with max)
        # Max over the 4 W taps; Wp is small so an unrolled concat is cheap.
        pooled = jnp.concatenate(
            [jnp.max(m[4 * wp:4 * wp + 4], axis=0, keepdims=True)
             for wp in range(Wp)], axis=0)           # (Wp, O)
        o_ref[g] = pooled.astype(o_ref.dtype)
        return carry

    lax.fori_loop(0, Hp, row_group, 0)


def conv3x3_pool4_relu(x, w, b):
    """x: (B, H, W, Cin) NHWC bf16; w: (9, Cin, O) bf16; b: (1, O) f32
    -> (B, Hp, Wp, O) bf16 with Hp = (H-2)//4, Wp = (W-2)//4 (floor pooling)."""
    B, H, W, C = x.shape
    O = w.shape[-1]
    OH, OW = H - 2, W - 2
    Hp, Wp = OH // 4, OW // 4
    assert Hp >= 1 and Wp >= 1, "observation too small for conv/pool stack"
    # TODO(synk): for large observations replace the whole-image block with a
    # halo-row (6-row, stride-4) manual-DMA tiling; at RL-sized inputs one image
    # per grid step fits VMEM comfortably and keeps the launch count minimal.
    kernel = functools.partial(_conv3x3_pool4_relu_kernel, OW=OW, Hp=Hp, Wp=Wp)
    return pl.pallas_call(
        kernel,
        out_shape=jax.ShapeDtypeStruct((B, Hp, Wp, O), jnp.bfloat16),
        grid_spec=pltpu.PrefetchScalarGridSpec(
            num_scalar_prefetch=0,
            grid=(B,),
            in_specs=[
                pl.BlockSpec((None, H, W, C), lambda bi: (bi, 0, 0, 0)),
                pl.BlockSpec((9, C, O), lambda bi: (0, 0, 0)),
                pl.BlockSpec((1, O), lambda bi: (0, 0)),
            ],
            out_specs=pl.BlockSpec((None, Hp, Wp, O), lambda bi: (bi, 0, 0, 0)),
        ),
        compiler_params=pltpu.CompilerParams(
            dimension_semantics=("parallel",),
            vmem_limit_bytes=_vmem_limit()),
    )(x, w, b)


# ---------------------------------------------------------------------------
# Kernel 2: fused NoisyLinear head + ReLU + dueling combine + softmax
# ---------------------------------------------------------------------------

def _head_dueling_kernel(x_ref, wh_ref, bh_ref, w2_ref, b2_ref, o_ref, *,
                         n_actions):
    """w2/b2 pack [value | adv_mean | adv_0 .. adv_{A-1}] as 128-lane blocks,
    so one MXU dot feeds the whole dueling combine.  Pad atoms carry a -1e30
    bias in the value block, so no in-kernel masking is needed."""
    P = _ATOMS_PAD
    h = jnp.dot(x_ref[...], wh_ref[...], preferred_element_type=jnp.float32)
    h = jnp.maximum(h + bh_ref[...], 0.0).astype(jnp.bfloat16)      # [bm, hidden]

    z = jnp.dot(h, w2_ref[...], preferred_element_type=jnp.float32) + b2_ref[...]
    val = z[:, 0:P]                       # pad lanes already at -1e30
    adv_mean = z[:, P:2 * P]              # = mean_a(h @ W_a + b_a) by linearity

    for a in range(n_actions):            # stream one action at a time
        adv = z[:, (a + 2) * P:(a + 3) * P]
        q = val + adv - adv_mean
        q = q - jnp.max(q, axis=-1, keepdims=True)
        e = jnp.exp(q)                    # pad lanes underflow to exactly 0
        s = jnp.sum(e, axis=-1, keepdims=True)
        inv = pl.reciprocal(s, approx=True)
        inv = inv * (2.0 - s * inv)       # one Newton step -> ~f32 exact
        o_ref[:, a * P:(a + 1) * P] = e * inv   # 128-aligned lane-dense store


def head_dueling_softmax(feat, wh, bh, w2, b2, n_actions):
    """feat: [B, conv_out] bf16; wh: [conv_out, hidden] bf16; bh: [1, hidden] f32;
    w2: [hidden, (A+2)*128] bf16; b2: [1, (A+2)*128] f32 -> [B, A*128] f32."""
    B, K = feat.shape
    hidden = wh.shape[1]
    N2 = w2.shape[1]
    bm = min(B, 128)            # cap so B>128 still gives >=2 parallel steps (v7x)
    return pl.pallas_call(
        functools.partial(_head_dueling_kernel, n_actions=n_actions),
        out_shape=jax.ShapeDtypeStruct((B, n_actions * _ATOMS_PAD), jnp.float32),
        grid_spec=pltpu.PrefetchScalarGridSpec(
            num_scalar_prefetch=0,
            grid=(pl.cdiv(B, bm),),
            in_specs=[
                pl.BlockSpec((bm, K), lambda i: (i, 0)),
                pl.BlockSpec((K, hidden), lambda i: (0, 0)),
                pl.BlockSpec((1, hidden), lambda i: (0, 0)),
                pl.BlockSpec((hidden, N2), lambda i: (0, 0)),
                pl.BlockSpec((1, N2), lambda i: (0, 0)),
            ],
            out_specs=pl.BlockSpec((bm, n_actions * _ATOMS_PAD), lambda i: (i, 0)),
        ),
        compiler_params=pltpu.CompilerParams(
            dimension_semantics=("parallel",),
            vmem_limit_bytes=_vmem_limit()),
    )(feat, wh, bh, w2, b2)


# ---------------------------------------------------------------------------
# Parameters (kernel-ready layouts, prepared once at init)
# ---------------------------------------------------------------------------

def conv_out_size_fn(obs_shape):
    _, h, w = obs_shape
    h1, w1 = (h - 2) // 4, (w - 2) // 4
    h2, w2 = (h1 - 2) // 4, (w1 - 2) // 4
    return 64 * h2 * w2, (h2, w2)


def init_params(key, obs_shape, hidden_size, n_actions, atoms):
    """Synthetic init mirroring the PyTorch module, stored in kernel-ready layouts."""
    c = obs_shape[0]
    conv_out, (h2, w2) = conv_out_size_fn(obs_shape)
    keys = jax.random.split(key, 10)

    def ku(k, shape, fan_in):   # kaiming_uniform_(a=sqrt(5)) => U(-1/sqrt(fan_in), +)
        bound = 1.0 / math.sqrt(fan_in)
        return jax.random.uniform(k, shape, jnp.float32, -bound, bound)

    def conv_layout(w_oihw):    # (O, Cin, 3, 3) -> (9, Cin, O), tap index kh*3+kw
        o, cin = w_oihw.shape[0], w_oihw.shape[1]
        return jnp.transpose(w_oihw, (2, 3, 1, 0)).reshape(9, cin, o).astype(jnp.bfloat16)

    # NCHW-flat -> NHWC-flat row permutation so the forward can flatten NHWC directly
    perm = jnp.arange(conv_out).reshape(64, h2, w2).transpose(1, 2, 0).reshape(-1)

    def head_layout(w_out_in):  # (hidden, conv_out[NCHW]) -> (conv_out[NHWC], hidden)
        return jnp.transpose(w_out_in)[perm, :]

    def adv_layout(w_out_in):   # (A*atoms, hidden) -> (A, hidden, atoms_pad), pad zero
        w = jnp.transpose(w_out_in).reshape(hidden_size, n_actions, atoms)
        w = jnp.transpose(w, (1, 0, 2))
        return jnp.pad(w, ((0, 0), (0, 0), (0, _ATOMS_PAD - atoms)))

    def val_layout(w_out_in):   # (atoms, hidden) -> (hidden, atoms_pad), pad zero
        return jnp.pad(jnp.transpose(w_out_in), ((0, 0), (0, _ATOMS_PAD - atoms)))

    params = dict(
        conv1_w=conv_layout(ku(keys[0], (64, c, 3, 3), c * 9)),
        conv1_b=ku(keys[1], (64,), c * 9).reshape(1, 64),
        conv2_w=conv_layout(ku(keys[2], (64, 64, 3, 3), 64 * 9)),
        conv2_b=ku(keys[3], (64,), 64 * 9).reshape(1, 64),
        head_w_mu=head_layout(ku(keys[4], (hidden_size, conv_out), conv_out)),
        head_w_sigma=head_layout(ku(keys[5], (hidden_size, conv_out), conv_out)),
        head_b_mu=jnp.zeros((1, hidden_size), jnp.float32),
        head_b_sigma=jnp.zeros((1, hidden_size), jnp.float32),
        adv_w_mu=adv_layout(ku(keys[6], (n_actions * atoms, hidden_size), hidden_size)),
        adv_w_sigma=adv_layout(ku(keys[7], (n_actions * atoms, hidden_size), hidden_size)),
        adv_b_mu=jnp.zeros((n_actions, 1, _ATOMS_PAD), jnp.float32),
        adv_b_sigma=jnp.zeros((n_actions, 1, _ATOMS_PAD), jnp.float32),
        value_w_mu=val_layout(ku(keys[8], (atoms, hidden_size), hidden_size)),
        value_w_sigma=val_layout(ku(keys[9], (atoms, hidden_size), hidden_size)),
        value_b_mu=jnp.zeros((1, _ATOMS_PAD), jnp.float32),
        value_b_sigma=jnp.zeros((1, _ATOMS_PAD), jnp.float32),
    )
    return params, conv_out


def _noisy(mu, sig, training, key, sigma):
    """NoisyLinear effective param (noise folded as elementwise glue; eval = mu)."""
    if not training:
        return mu
    return mu + sig * (sigma * jax.random.normal(key, mu.shape, jnp.float32))


# ---------------------------------------------------------------------------
# Full forward
# ---------------------------------------------------------------------------

def dqn_forward(params, x_nchw, *, n_actions, atoms, training=False, key=None,
                sigma=0.5):
    """x_nchw: [B, C, H, W] -> q_probs [B, n_actions, atoms]."""
    x = jnp.transpose(x_nchw.astype(jnp.float32), (0, 2, 3, 1)).astype(jnp.bfloat16)

    # conv stack: fused (Conv3x3 -> MaxPool4 -> ReLU) x 2, one kernel each
    x = conv3x3_pool4_relu(x, params["conv1_w"], params["conv1_b"])
    x = conv3x3_pool4_relu(x, params["conv2_w"], params["conv2_b"])
    # TODO(synk): when the post-pool spatial is 1x1 (as in the demo), conv2+pool2
    # could be merged into the head kernel so the whole forward is 2 pallas_calls.

    B = x.shape[0]
    feat = x.reshape(B, -1)     # NHWC flatten; head rows were permuted to match at init

    if training:
        ks = list(jax.random.split(key, 6))
    else:
        ks = [None] * 6
    wh = _noisy(params["head_w_mu"], params["head_w_sigma"], training, ks[0], sigma)
    bh = _noisy(params["head_b_mu"], params["head_b_sigma"], training, ks[1], sigma)
    wa = _noisy(params["adv_w_mu"], params["adv_w_sigma"], training, ks[2], sigma)
    ba = _noisy(params["adv_b_mu"], params["adv_b_sigma"], training, ks[3], sigma)
    wv = _noisy(params["value_w_mu"], params["value_w_sigma"], training, ks[4], sigma)
    bv = _noisy(params["value_b_mu"], params["value_b_sigma"], training, ks[5], sigma)

    hidden = wh.shape[1]
    # Dueling combine via linearity: adv_mean = h @ mean_a(W_a) + mean_a(b_a).
    wa_mean = jnp.mean(wa, axis=0)                                   # (hidden, 128)
    ba_mean = jnp.mean(ba, axis=0)                                   # (1, 128)
    wa_flat = jnp.transpose(wa, (1, 0, 2)).reshape(hidden, n_actions * _ATOMS_PAD)
    ba_flat = jnp.transpose(ba, (1, 0, 2)).reshape(1, n_actions * _ATOMS_PAD)
    # Pad atoms get a -1e30 bias in the value block -> masked softmax for free.
    pad_bias = jnp.where(jnp.arange(_ATOMS_PAD) < atoms, 0.0, -1e30).reshape(1, -1)
    w2 = jnp.concatenate([wv, wa_mean, wa_flat], axis=1).astype(jnp.bfloat16)
    b2 = jnp.concatenate([bv + pad_bias, ba_mean, ba_flat], axis=1)

    out = head_dueling_softmax(feat, wh.astype(jnp.bfloat16), bh, w2, b2, n_actions)
    return out.reshape(B, n_actions, _ATOMS_PAD)[:, :, :atoms]


# ---------------------------------------------------------------------------
# Demo
# ---------------------------------------------------------------------------

if __name__ == "__main__":
    key = jax.random.PRNGKey(0)

    batch = 2
    obs_shape = (4, 32, 32)   # (C, H, W): 32 -> conv 30 -> pool 7 -> conv 5 -> pool 1
    hidden_size = 32
    n_actions = 4
    atoms = 51

    params, conv_out = init_params(key, obs_shape, hidden_size, n_actions, atoms)

    x = jax.random.normal(jax.random.fold_in(key, 123), (batch,) + obs_shape,
                          dtype=jnp.float32)

    fwd = jax.jit(functools.partial(dqn_forward, n_actions=n_actions, atoms=atoms,
                                    training=False))
    q_probs = jax.block_until_ready(fwd(params, x))

    assert q_probs.shape == (batch, n_actions, atoms), q_probs.shape
    assert bool(jnp.all(jnp.isfinite(q_probs)))
    # softmax over atoms: every (batch, action) row sums to 1
    assert bool(jnp.allclose(jnp.sum(q_probs, axis=-1), 1.0, atol=1e-3))

    print("KERNEL_OK")
</pallas_src>

<mosaic_0001>
module attributes {stable_mosaic.version = 11 : i64} {
  func.func @_conv3x3_pool4_relu_kernel(%arg0: i32, %arg1: memref<1x7x7x64xbf16, #tpu.memory_space<vmem>>, %arg2: memref<9x64x64xbf16, #tpu.memory_space<vmem>>, %arg3: memref<1x64xf32, #tpu.memory_space<vmem>>, %arg4: memref<1x1x1x64xbf16, #tpu.memory_space<vmem>>) attributes {dimension_semantics = [#tpu.dimension_semantics<parallel>], iteration_bounds = array<i64: 2>, scalar_prefetch = 0 : i64, scratch_operands = 0 : i64, tpu.core_type = #tpu.core_type<tc>, window_params = [{transform_indices = @transform_0, window_bounds = array<i64: 1, 7, 7, 64>}, {pipeline_mode = #tpu.pipeline_mode<synchronous>, transform_indices = @transform_1, window_bounds = array<i64: 9, 64, 64>}, {pipeline_mode = #tpu.pipeline_mode<synchronous>, transform_indices = @transform_2, window_bounds = array<i64: 1, 64>}, {transform_indices = @transform_3, window_bounds = array<i64: 1, 1, 1, 64>}]} {
    %c0 = arith.constant 0 : index
    %c0_0 = arith.constant 0 : index
    %c0_1 = arith.constant 0 : index
    %0 = vector.load %arg2[%c0, %c0_0, %c0_1] : memref<9x64x64xbf16, #tpu.memory_space<vmem>>, vector<9x64x64xbf16>
    %c0_2 = arith.constant 0 : index
    %c0_3 = arith.constant 0 : index
    %1 = vector.load %arg3[%c0_2, %c0_3] : memref<1x64xf32, #tpu.memory_space<vmem>>, vector<1x64xf32>
    %c0_i32 = arith.constant 0 : i32
    %c4_i32 = arith.constant 4 : i32
    %2 = arith.muli %c4_i32, %c0_i32 : i32
    %c0_i32_4 = arith.constant 0 : i32
    %3 = arith.addi %2, %c0_i32_4 : i32
    %c0_5 = arith.constant 0 : index
    %4 = arith.index_cast %3 : i32 to index
    %c0_6 = arith.constant 0 : index
    %c0_7 = arith.constant 0 : index
    %5 = vector.load %arg1[%c0_5, %4, %c0_6, %c0_7] : memref<1x7x7x64xbf16, #tpu.memory_space<vmem>>, vector<1x1x7x64xbf16>
    %6 = vector.shape_cast %5 : vector<1x1x7x64xbf16> to vector<7x64xbf16>
    %c4_i32_8 = arith.constant 4 : i32
    %7 = arith.muli %c4_i32_8, %c0_i32 : i32
    %c1_i32 = arith.constant 1 : i32
    %8 = arith.addi %7, %c1_i32 : i32
    %c0_9 = arith.constant 0 : index
    %9 = arith.index_cast %8 : i32 to index
    %c0_10 = arith.constant 0 : index
    %c0_11 = arith.constant 0 : index
    %10 = vector.load %arg1[%c0_9, %9, %c0_10, %c0_11] : memref<1x7x7x64xbf16, #tpu.memory_space<vmem>>, vector<1x1x7x64xbf16>
    %11 = vector.shape_cast %10 : vector<1x1x7x64xbf16> to vector<7x64xbf16>
    %c4_i32_12 = arith.constant 4 : i32
    %12 = arith.muli %c4_i32_12, %c0_i32 : i32
    %c2_i32 = arith.constant 2 : i32
    %13 = arith.addi %12, %c2_i32 : i32
    %c0_13 = arith.constant 0 : index
    %14 = arith.index_cast %13 : i32 to index
    %c0_14 = arith.constant 0 : index
    %c0_15 = arith.constant 0 : index
    %15 = vector.load %arg1[%c0_13, %14, %c0_14, %c0_15] : memref<1x7x7x64xbf16, #tpu.memory_space<vmem>>, vector<1x1x7x64xbf16>
    %16 = vector.shape_cast %15 : vector<1x1x7x64xbf16> to vector<7x64xbf16>
    %c4_i32_16 = arith.constant 4 : i32
    %17 = arith.muli %c4_i32_16, %c0_i32 : i32
    %c3_i32 = arith.constant 3 : i32
    %18 = arith.addi %17, %c3_i32 : i32
    %c0_17 = arith.constant 0 : index
    %19 = arith.index_cast %18 : i32 to index
    %c0_18 = arith.constant 0 : index
    %c0_19 = arith.constant 0 : index
    %20 = vector.load %arg1[%c0_17, %19, %c0_18, %c0_19] : memref<1x7x7x64xbf16, #tpu.memory_space<vmem>>, vector<1x1x7x64xbf16>
    %21 = vector.shape_cast %20 : vector<1x1x7x64xbf16> to vector<7x64xbf16>
    %c4_i32_20 = arith.constant 4 : i32
    %22 = arith.muli %c4_i32_20, %c0_i32 : i32
    %c4_i32_21 = arith.constant 4 : i32
    %23 = arith.addi %22, %c4_i32_21 : i32
    %c0_22 = arith.constant 0 : index
    %24 = arith.index_cast %23 : i32 to index
    %c0_23 = arith.constant 0 : index
    %c0_24 = arith.constant 0 : index
    %25 = vector.load %arg1[%c0_22, %24, %c0_23, %c0_24] : memref<1x7x7x64xbf16, #tpu.memory_space<vmem>>, vector<1x1x7x64xbf16>
    %26 = vector.shape_cast %25 : vector<1x1x7x64xbf16> to vector<7x64xbf16>
    %c4_i32_25 = arith.constant 4 : i32
    %27 = arith.muli %c4_i32_25, %c0_i32 : i32
    %c5_i32 = arith.constant 5 : i32
    %28 = arith.addi %27, %c5_i32 : i32
    %c0_26 = arith.constant 0 : index
    %29 = arith.index_cast %28 : i32 to index
    %c0_27 = arith.constant 0 : index
    %c0_28 = arith.constant 0 : index
    %30 = vector.load %arg1[%c0_26, %29, %c0_27, %c0_28] : memref<1x7x7x64xbf16, #tpu.memory_space<vmem>>, vector<1x1x7x64xbf16>
    %31 = vector.shape_cast %30 : vector<1x1x7x64xbf16> to vector<7x64xbf16>
    %32 = vector.extract_strided_slice %6 {offsets = [0, 0], sizes = [5, 64], strides = [1, 1]} : vector<7x64xbf16> to vector<5x64xbf16>
    %33 = vector.extract_strided_slice %0 {offsets = [0, 0, 0], sizes = [1, 64, 64], strides = [1, 1, 1]} : vector<9x64x64xbf16> to vector<1x64x64xbf16>
    %34 = vector.shape_cast %33 : vector<1x64x64xbf16> to vector<64x64xbf16>
    %cst = arith.constant dense<0.000000e+00> : vector<5x64xf32>
    %35 = tpu.matmul %32, %34, %cst {dimension_numbers = #tpu.dot_dimension_numbers<[1], [0], [0], [1], [0, 0, 1, 1], [], []>} : vector<5x64xbf16>, vector<64x64xbf16>, vector<5x64xf32> -> vector<5x64xf32>
    %36 = vector.extract_strided_slice %6 {offsets = [1, 0], sizes = [5, 64], strides = [1, 1]} : vector<7x64xbf16> to vector<5x64xbf16>
    %37 = vector.extract_strided_slice %0 {offsets = [1, 0, 0], sizes = [1, 64, 64], strides = [1, 1, 1]} : vector<9x64x64xbf16> to vector<1x64x64xbf16>
    %38 = vector.shape_cast %37 : vector<1x64x64xbf16> to vector<64x64xbf16>
    %cst_29 = arith.constant dense<0.000000e+00> : vector<5x64xf32>
    %39 = tpu.matmul %36, %38, %cst_29 {dimension_numbers = #tpu.dot_dimension_numbers<[1], [0], [0], [1], [0, 0, 1, 1], [], []>} : vector<5x64xbf16>, vector<64x64xbf16>, vector<5x64xf32> -> vector<5x64xf32>
    %40 = arith.addf %35, %39 : vector<5x64xf32>
    %41 = vector.extract_strided_slice %6 {offsets = [2, 0], sizes = [5, 64], strides = [1, 1]} : vector<7x64xbf16> to vector<5x64xbf16>
    %42 = vector.extract_strided_slice %0 {offsets = [2, 0, 0], sizes = [1, 64, 64], strides = [1, 1, 1]} : vector<9x64x64xbf16> to vector<1x64x64xbf16>
    %43 = vector.shape_cast %42 : vector<1x64x64xbf16> to vector<64x64xbf16>
    %cst_30 = arith.constant dense<0.000000e+00> : vector<5x64xf32>
    %44 = tpu.matmul %41, %43, %cst_30 {dimension_numbers = #tpu.dot_dimension_numbers<[1], [0], [0], [1], [0, 0, 1, 1], [], []>} : vector<5x64xbf16>, vector<64x64xbf16>, vector<5x64xf32> -> vector<5x64xf32>
    %45 = arith.addf %40, %44 : vector<5x64xf32>
    %46 = vector.extract_strided_slice %11 {offsets = [0, 0], sizes = [5, 64], strides = [1, 1]} : vector<7x64xbf16> to vector<5x64xbf16>
    %47 = vector.extract_strided_slice %0 {offsets = [3, 0, 0], sizes = [1, 64, 64], strides = [1, 1, 1]} : vector<9x64x64xbf16> to vector<1x64x64xbf16>
    %48 = vector.shape_cast %47 : vector<1x64x64xbf16> to vector<64x64xbf16>
    %cst_31 = arith.constant dense<0.000000e+00> : vector<5x64xf32>
    %49 = tpu.matmul %46, %48, %cst_31 {dimension_numbers = #tpu.dot_dimension_numbers<[1], [0], [0], [1], [0, 0, 1, 1], [], []>} : vector<5x64xbf16>, vector<64x64xbf16>, vector<5x64xf32> -> vector<5x64xf32>
    %50 = arith.addf %45, %49 : vector<5x64xf32>
    %51 = vector.extract_strided_slice %11 {offsets = [1, 0], sizes = [5, 64], strides = [1, 1]} : vector<7x64xbf16> to vector<5x64xbf16>
    %52 = vector.extract_strided_slice %0 {offsets = [4, 0, 0], sizes = [1, 64, 64], strides = [1, 1, 1]} : vector<9x64x64xbf16> to vector<1x64x64xbf16>
    %53 = vector.shape_cast %52 : vector<1x64x64xbf16> to vector<64x64xbf16>
    %cst_32 = arith.constant dense<0.000000e+00> : vector<5x64xf32>
    %54 = tpu.matmul %51, %53, %cst_32 {dimension_numbers = #tpu.dot_dimension_numbers<[1], [0], [0], [1], [0, 0, 1, 1], [], []>} : vector<5x64xbf16>, vector<64x64xbf16>, vector<5x64xf32> -> vector<5x64xf32>
    %55 = arith.addf %50, %54 : vector<5x64xf32>
    %56 = vector.extract_strided_slice %11 {offsets = [2, 0], sizes = [5, 64], strides = [1, 1]} : vector<7x64xbf16> to vector<5x64xbf16>
    %57 = vector.extract_strided_slice %0 {offsets = [5, 0, 0], sizes = [1, 64, 64], strides = [1, 1, 1]} : vector<9x64x64xbf16> to vector<1x64x64xbf16>
    %58 = vector.shape_cast %57 : vector<1x64x64xbf16> to vector<64x64xbf16>
    %cst_33 = arith.constant dense<0.000000e+00> : vector<5x64xf32>
    %59 = tpu.matmul %56, %58, %cst_33 {dimension_numbers = #tpu.dot_dimension_numbers<[1], [0], [0], [1], [0, 0, 1, 1], [], []>} : vector<5x64xbf16>, vector<64x64xbf16>, vector<5x64xf32> -> vector<5x64xf32>
    %60 = arith.addf %55, %59 : vector<5x64xf32>
    %61 = vector.extract_strided_slice %16 {offsets = [0, 0], sizes = [5, 64], strides = [1, 1]} : vector<7x64xbf16> to vector<5x64xbf16>
    %62 = vector.extract_strided_slice %0 {offsets = [6, 0, 0], sizes = [1, 64, 64], strides = [1, 1, 1]} : vector<9x64x64xbf16> to vector<1x64x64xbf16>
    %63 = vector.shape_cast %62 : vector<1x64x64xbf16> to vector<64x64xbf16>
    %cst_34 = arith.constant dense<0.000000e+00> : vector<5x64xf32>
    %64 = tpu.matmul %61, %63, %cst_34 {dimension_numbers = #tpu.dot_dimension_numbers<[1], [0], [0], [1], [0, 0, 1, 1], [], []>} : vector<5x64xbf16>, vector<64x64xbf16>, vector<5x64xf32> -> vector<5x64xf32>
    %65 = arith.addf %60, %64 : vector<5x64xf32>
    %66 = vector.extract_strided_slice %16 {offsets = [1, 0], sizes = [5, 64], strides = [1, 1]} : vector<7x64xbf16> to vector<5x64xbf16>
    %67 = vector.extract_strided_slice %0 {offsets = [7, 0, 0], sizes = [1, 64, 64], strides = [1, 1, 1]} : vector<9x64x64xbf16> to vector<1x64x64xbf16>
    %68 = vector.shape_cast %67 : vector<1x64x64xbf16> to vector<64x64xbf16>
    %cst_35 = arith.constant dense<0.000000e+00> : vector<5x64xf32>
    %69 = tpu.matmul %66, %68, %cst_35 {dimension_numbers = #tpu.dot_dimension_numbers<[1], [0], [0], [1], [0, 0, 1, 1], [], []>} : vector<5x64xbf16>, vector<64x64xbf16>, vector<5x64xf32> -> vector<5x64xf32>
    %70 = arith.addf %65, %69 : vector<5x64xf32>
    %71 = vector.extract_strided_slice %16 {offsets = [2, 0], sizes = [5, 64], strides = [1, 1]} : vector<7x64xbf16> to vector<5x64xbf16>
    %72 = vector.extract_strided_slice %0 {offsets = [8, 0, 0], sizes = [1, 64, 64], strides = [1, 1, 1]} : vector<9x64x64xbf16> to vector<1x64x64xbf16>
    %73 = vector.shape_cast %72 : vector<1x64x64xbf16> to vector<64x64xbf16>
    %cst_36 = arith.constant dense<0.000000e+00> : vector<5x64xf32>
    %74 = tpu.matmul %71, %73, %cst_36 {dimension_numbers = #tpu.dot_dimension_numbers<[1], [0], [0], [1], [0, 0, 1, 1], [], []>} : vector<5x64xbf16>, vector<64x64xbf16>, vector<5x64xf32> -> vector<5x64xf32>
    %75 = arith.addf %70, %74 : vector<5x64xf32>
    %76 = vector.broadcast %1 : vector<1x64xf32> to vector<5x64xf32>
    %77 = arith.addf %75, %76 : vector<5x64xf32>
    %78 = vector.extract_strided_slice %11 {offsets = [0, 0], sizes = [5, 64], strides = [1, 1]} : vector<7x64xbf16> to vector<5x64xbf16>
    %79 = vector.extract_strided_slice %0 {offsets = [0, 0, 0], sizes = [1, 64, 64], strides = [1, 1, 1]} : vector<9x64x64xbf16> to vector<1x64x64xbf16>
    %80 = vector.shape_cast %79 : vector<1x64x64xbf16> to vector<64x64xbf16>
    %cst_37 = arith.constant dense<0.000000e+00> : vector<5x64xf32>
    %81 = tpu.matmul %78, %80, %cst_37 {dimension_numbers = #tpu.dot_dimension_numbers<[1], [0], [0], [1], [0, 0, 1, 1], [], []>} : vector<5x64xbf16>, vector<64x64xbf16>, vector<5x64xf32> -> vector<5x64xf32>
    %82 = vector.extract_strided_slice %11 {offsets = [1, 0], sizes = [5, 64], strides = [1, 1]} : vector<7x64xbf16> to vector<5x64xbf16>
    %83 = vector.extract_strided_slice %0 {offsets = [1, 0, 0], sizes = [1, 64, 64], strides = [1, 1, 1]} : vector<9x64x64xbf16> to vector<1x64x64xbf16>
    %84 = vector.shape_cast %83 : vector<1x64x64xbf16> to vector<64x64xbf16>
    %cst_38 = arith.constant dense<0.000000e+00> : vector<5x64xf32>
    %85 = tpu.matmul %82, %84, %cst_38 {dimension_numbers = #tpu.dot_dimension_numbers<[1], [0], [0], [1], [0, 0, 1, 1], [], []>} : vector<5x64xbf16>, vector<64x64xbf16>, vector<5x64xf32> -> vector<5x64xf32>
    %86 = arith.addf %81, %85 : vector<5x64xf32>
    %87 = vector.extract_strided_slice %11 {offsets = [2, 0], sizes = [5, 64], strides = [1, 1]} : vector<7x64xbf16> to vector<5x64xbf16>
    %88 = vector.extract_strided_slice %0 {offsets = [2, 0, 0], sizes = [1, 64, 64], strides = [1, 1, 1]} : vector<9x64x64xbf16> to vector<1x64x64xbf16>
    %89 = vector.shape_cast %88 : vector<1x64x64xbf16> to vector<64x64xbf16>
    %cst_39 = arith.constant dense<0.000000e+00> : vector<5x64xf32>
    %90 = tpu.matmul %87, %89, %cst_39 {dimension_numbers = #tpu.dot_dimension_numbers<[1], [0], [0], [1], [0, 0, 1, 1], [], []>} : vector<5x64xbf16>, vector<64x64xbf16>, vector<5x64xf32> -> vector<5x64xf32>
    %91 = arith.addf %86, %90 : vector<5x64xf32>
    %92 = vector.extract_strided_slice %16 {offsets = [0, 0], sizes = [5, 64], strides = [1, 1]} : vector<7x64xbf16> to vector<5x64xbf16>
    %93 = vector.extract_strided_slice %0 {offsets = [3, 0, 0], sizes = [1, 64, 64], strides = [1, 1, 1]} : vector<9x64x64xbf16> to vector<1x64x64xbf16>
    %94 = vector.shape_cast %93 : vector<1x64x64xbf16> to vector<64x64xbf16>
    %cst_40 = arith.constant dense<0.000000e+00> : vector<5x64xf32>
    %95 = tpu.matmul %92, %94, %cst_40 {dimension_numbers = #tpu.dot_dimension_numbers<[1], [0], [0], [1], [0, 0, 1, 1], [], []>} : vector<5x64xbf16>, vector<64x64xbf16>, vector<5x64xf32> -> vector<5x64xf32>
    %96 = arith.addf %91, %95 : vector<5x64xf32>
    %97 = vector.extract_strided_slice %16 {offsets = [1, 0], sizes = [5, 64], strides = [1, 1]} : vector<7x64xbf16> to vector<5x64xbf16>
    %98 = vector.extract_strided_slice %0 {offsets = [4, 0, 0], sizes = [1, 64, 64], strides = [1, 1, 1]} : vector<9x64x64xbf16> to vector<1x64x64xbf16>
    %99 = vector.shape_cast %98 : vector<1x64x64xbf16> to vector<64x64xbf16>
    %cst_41 = arith.constant dense<0.000000e+00> : vector<5x64xf32>
    %100 = tpu.matmul %97, %99, %cst_41 {dimension_numbers = #tpu.dot_dimension_numbers<[1], [0], [0], [1], [0, 0, 1, 1], [], []>} : vector<5x64xbf16>, vector<64x64xbf16>, vector<5x64xf32> -> vector<5x64xf32>
    %101 = arith.addf %96, %100 : vector<5x64xf32>
    %102 = vector.extract_strided_slice %16 {offsets = [2, 0], sizes = [5, 64], strides = [1, 1]} : vector<7x64xbf16> to vector<5x64xbf16>
    %103 = vector.extract_strided_slice %0 {offsets = [5, 0, 0], sizes = [1, 64, 64], strides = [1, 1, 1]} : vector<9x64x64xbf16> to vector<1x64x64xbf16>
    %104 = vector.shape_cast %103 : vector<1x64x64xbf16> to vector<64x64xbf16>
    %cst_42 = arith.constant dense<0.000000e+00> : vector<5x64xf32>
    %105 = tpu.matmul %102, %104, %cst_42 {dimension_numbers = #tpu.dot_dimension_numbers<[1], [0], [0], [1], [0, 0, 1, 1], [], []>} : vector<5x64xbf16>, vector<64x64xbf16>, vector<5x64xf32> -> vector<5x64xf32>
    %106 = arith.addf %101, %105 : vector<5x64xf32>
    %107 = vector.extract_strided_slice %21 {offsets = [0, 0], sizes = [5, 64], strides = [1, 1]} : vector<7x64xbf16> to vector<5x64xbf16>
    %108 = vector.extract_strided_slice %0 {offsets = [6, 0, 0], sizes = [1, 64, 64], strides = [1, 1, 1]} : vector<9x64x64xbf16> to vector<1x64x64xbf16>
    %109 = vector.shape_cast %108 : vector<1x64x64xbf16> to vector<64x64xbf16>
    %cst_43 = arith.constant dense<0.000000e+00> : vector<5x64xf32>
    %110 = tpu.matmul %107, %109, %cst_43 {dimension_numbers = #tpu.dot_dimension_numbers<[1], [0], [0], [1], [0, 0, 1, 1], [], []>} : vector<5x64xbf16>, vector<64x64xbf16>, vector<5x64xf32> -> vector<5x64xf32>
    %111 = arith.addf %106, %110 : vector<5x64xf32>
    %112 = vector.extract_strided_slice %21 {offsets = [1, 0], sizes = [5, 64], strides = [1, 1]} : vector<7x64xbf16> to vector<5x64xbf16>
    %113 = vector.extract_strided_slice %0 {offsets = [7, 0, 0], sizes = [1, 64, 64], strides = [1, 1, 1]} : vector<9x64x64xbf16> to vector<1x64x64xbf16>
    %114 = vector.shape_cast %113 : vector<1x64x64xbf16> to vector<64x64xbf16>
    %cst_44 = arith.constant dense<0.000000e+00> : vector<5x64xf32>
    %115 = tpu.matmul %112, %114, %cst_44 {dimension_numbers = #tpu.dot_dimension_numbers<[1], [0], [0], [1], [0, 0, 1, 1], [], []>} : vector<5x64xbf16>, vector<64x64xbf16>, vector<5x64xf32> -> vector<5x64xf32>
    %116 = arith.addf %111, %115 : vector<5x64xf32>
    %117 = vector.extract_strided_slice %21 {offsets = [2, 0], sizes = [5, 64], strides = [1, 1]} : vector<7x64xbf16> to vector<5x64xbf16>
    %118 = vector.extract_strided_slice %0 {offsets = [8, 0, 0], sizes = [1, 64, 64], strides = [1, 1, 1]} : vector<9x64x64xbf16> to vector<1x64x64xbf16>
    %119 = vector.shape_cast %118 : vector<1x64x64xbf16> to vector<64x64xbf16>
    %cst_45 = arith.constant dense<0.000000e+00> : vector<5x64xf32>
    %120 = tpu.matmul %117, %119, %cst_45 {dimension_numbers = #tpu.dot_dimension_numbers<[1], [0], [0], [1], [0, 0, 1, 1], [], []>} : vector<5x64xbf16>, vector<64x64xbf16>, vector<5x64xf32> -> vector<5x64xf32>
    %121 = arith.addf %116, %120 : vector<5x64xf32>
    %122 = vector.broadcast %1 : vector<1x64xf32> to vector<5x64xf32>
    %123 = arith.addf %121, %122 : vector<5x64xf32>
    %124 = arith.maximumf %77, %123 : vector<5x64xf32>
    %125 = vector.extract_strided_slice %16 {offsets = [0, 0], sizes = [5, 64], strides = [1, 1]} : vector<7x64xbf16> to vector<5x64xbf16>
    %126 = vector.extract_strided_slice %0 {offsets = [0, 0, 0], sizes = [1, 64, 64], strides = [1, 1, 1]} : vector<9x64x64xbf16> to vector<1x64x64xbf16>
    %127 = vector.shape_cast %126 : vector<1x64x64xbf16> to vector<64x64xbf16>
    %cst_46 = arith.constant dense<0.000000e+00> : vector<5x64xf32>
    %128 = tpu.matmul %125, %127, %cst_46 {dimension_numbers = #tpu.dot_dimension_numbers<[1], [0], [0], [1], [0, 0, 1, 1], [], []>} : vector<5x64xbf16>, vector<64x64xbf16>, vector<5x64xf32> -> vector<5x64xf32>
    %129 = vector.extract_strided_slice %16 {offsets = [1, 0], sizes = [5, 64], strides = [1, 1]} : vector<7x64xbf16> to vector<5x64xbf16>
    %130 = vector.extract_strided_slice %0 {offsets = [1, 0, 0], sizes = [1, 64, 64], strides = [1, 1, 1]} : vector<9x64x64xbf16> to vector<1x64x64xbf16>
    %131 = vector.shape_cast %130 : vector<1x64x64xbf16> to vector<64x64xbf16>
    %cst_47 = arith.constant dense<0.000000e+00> : vector<5x64xf32>
    %132 = tpu.matmul %129, %131, %cst_47 {dimension_numbers = #tpu.dot_dimension_numbers<[1], [0], [0], [1], [0, 0, 1, 1], [], []>} : vector<5x64xbf16>, vector<64x64xbf16>, vector<5x64xf32> -> vector<5x64xf32>
    %133 = arith.addf %128, %132 : vector<5x64xf32>
    %134 = vector.extract_strided_slice %16 {offsets = [2, 0], sizes = [5, 64], strides = [1, 1]} : vector<7x64xbf16> to vector<5x64xbf16>
    %135 = vector.extract_strided_slice %0 {offsets = [2, 0, 0], sizes = [1, 64, 64], strides = [1, 1, 1]} : vector<9x64x64xbf16> to vector<1x64x64xbf16>
    %136 = vector.shape_cast %135 : vector<1x64x64xbf16> to vector<64x64xbf16>
    %cst_48 = arith.constant dense<0.000000e+00> : vector<5x64xf32>
    %137 = tpu.matmul %134, %136, %cst_48 {dimension_numbers = #tpu.dot_dimension_numbers<[1], [0], [0], [1], [0, 0, 1, 1], [], []>} : vector<5x64xbf16>, vector<64x64xbf16>, vector<5x64xf32> -> vector<5x64xf32>
    %138 = arith.addf %133, %137 : vector<5x64xf32>
    %139 = vector.extract_strided_slice %21 {offsets = [0, 0], sizes = [5, 64], strides = [1, 1]} : vector<7x64xbf16> to vector<5x64xbf16>
    %140 = vector.extract_strided_slice %0 {offsets = [3, 0, 0], sizes = [1, 64, 64], strides = [1, 1, 1]} : vector<9x64x64xbf16> to vector<1x64x64xbf16>
    %141 = vector.shape_cast %140 : vector<1x64x64xbf16> to vector<64x64xbf16>
    %cst_49 = arith.constant dense<0.000000e+00> : vector<5x64xf32>
    %142 = tpu.matmul %139, %141, %cst_49 {dimension_numbers = #tpu.dot_dimension_numbers<[1], [0], [0], [1], [0, 0, 1, 1], [], []>} : vector<5x64xbf16>, vector<64x64xbf16>, vector<5x64xf32> -> vector<5x64xf32>
    %143 = arith.addf %138, %142 : vector<5x64xf32>
    %144 = vector.extract_strided_slice %21 {offsets = [1, 0], sizes = [5, 64], strides = [1, 1]} : vector<7x64xbf16> to vector<5x64xbf16>
    %145 = vector.extract_strided_slice %0 {offsets = [4, 0, 0], sizes = [1, 64, 64], strides = [1, 1, 1]} : vector<9x64x64xbf16> to vector<1x64x64xbf16>
    %146 = vector.shape_cast %145 : vector<1x64x64xbf16> to vector<64x64xbf16>
    %cst_50 = arith.constant dense<0.000000e+00> : vector<5x64xf32>
    %147 = tpu.matmul %144, %146, %cst_50 {dimension_numbers = #tpu.dot_dimension_numbers<[1], [0], [0], [1], [0, 0, 1, 1], [], []>} : vector<5x64xbf16>, vector<64x64xbf16>, vector<5x64xf32> -> vector<5x64xf32>
    %148 = arith.addf %143, %147 : vector<5x64xf32>
    %149 = vector.extract_strided_slice %21 {offsets = [2, 0], sizes = [5, 64], strides = [1, 1]} : vector<7x64xbf16> to vector<5x64xbf16>
    %150 = vector.extract_strided_slice %0 {offsets = [5, 0, 0], sizes = [1, 64, 64], strides = [1, 1, 1]} : vector<9x64x64xbf16> to vector<1x64x64xbf16>
    %151 = vector.shape_cast %150 : vector<1x64x64xbf16> to vector<64x64xbf16>
    %cst_51 = arith.constant dense<0.000000e+00> : vector<5x64xf32>
    %152 = tpu.matmul %149, %151, %cst_51 {dimension_numbers = #tpu.dot_dimension_numbers<[1], [0], [0], [1], [0, 0, 1, 1], [], []>} : vector<5x64xbf16>, vector<64x64xbf16>, vector<5x64xf32> -> vector<5x64xf32>
    %153 = arith.addf %148, %152 : vector<5x64xf32>
    %154 = vector.extract_strided_slice %26 {offsets = [0, 0], sizes = [5, 64], strides = [1, 1]} : vector<7x64xbf16> to vector<5x64xbf16>
    %155 = vector.extract_strided_slice %0 {offsets = [6, 0, 0], sizes = [1, 64, 64], strides = [1, 1, 1]} : vector<9x64x64xbf16> to vector<1x64x64xbf16>
    %156 = vector.shape_cast %155 : vector<1x64x64xbf16> to vector<64x64xbf16>
    %cst_52 = arith.constant dense<0.000000e+00> : vector<5x64xf32>
    %157 = tpu.matmul %154, %156, %cst_52 {dimension_numbers = #tpu.dot_dimension_numbers<[1], [0], [0], [1], [0, 0, 1, 1], [], []>} : vector<5x64xbf16>, vector<64x64xbf16>, vector<5x64xf32> -> vector<5x64xf32>
    %158 = arith.addf %153, %157 : vector<5x64xf32>
    %159 = vector.extract_strided_slice %26 {offsets = [1, 0], sizes = [5, 64], strides = [1, 1]} : vector<7x64xbf16> to vector<5x64xbf16>
    %160 = vector.extract_strided_slice %0 {offsets = [7, 0, 0], sizes = [1, 64, 64], strides = [1, 1, 1]} : vector<9x64x64xbf16> to vector<1x64x64xbf16>
    %161 = vector.shape_cast %160 : vector<1x64x64xbf16> to vector<64x64xbf16>
    %cst_53 = arith.constant dense<0.000000e+00> : vector<5x64xf32>
    %162 = tpu.matmul %159, %161, %cst_53 {dimension_numbers = #tpu.dot_dimension_numbers<[1], [0], [0], [1], [0, 0, 1, 1], [], []>} : vector<5x64xbf16>, vector<64x64xbf16>, vector<5x64xf32> -> vector<5x64xf32>
    %163 = arith.addf %158, %162 : vector<5x64xf32>
    %164 = vector.extract_strided_slice %26 {offsets = [2, 0], sizes = [5, 64], strides = [1, 1]} : vector<7x64xbf16> to vector<5x64xbf16>
    %165 = vector.extract_strided_slice %0 {offsets = [8, 0, 0], sizes = [1, 64, 64], strides = [1, 1, 1]} : vector<9x64x64xbf16> to vector<1x64x64xbf16>
    %166 = vector.shape_cast %165 : vector<1x64x64xbf16> to vector<64x64xbf16>
    %cst_54 = arith.constant dense<0.000000e+00> : vector<5x64xf32>
    %167 = tpu.matmul %164, %166, %cst_54 {dimension_numbers = #tpu.dot_dimension_numbers<[1], [0], [0], [1], [0, 0, 1, 1], [], []>} : vector<5x64xbf16>, vector<64x64xbf16>, vector<5x64xf32> -> vector<5x64xf32>
    %168 = arith.addf %163, %167 : vector<5x64xf32>
    %169 = vector.broadcast %1 : vector<1x64xf32> to vector<5x64xf32>
    %170 = arith.addf %168, %169 : vector<5x64xf32>
    %171 = arith.maximumf %124, %170 : vector<5x64xf32>
    %172 = vector.extract_strided_slice %21 {offsets = [0, 0], sizes = [5, 64], strides = [1, 1]} : vector<7x64xbf16> to vector<5x64xbf16>
    %173 = vector.extract_strided_slice %0 {offsets = [0, 0, 0], sizes = [1, 64, 64], strides = [1, 1, 1]} : vector<9x64x64xbf16> to vector<1x64x64xbf16>
    %174 = vector.shape_cast %173 : vector<1x64x64xbf16> to vector<64x64xbf16>
    %cst_55 = arith.constant dense<0.000000e+00> : vector<5x64xf32>
    %175 = tpu.matmul %172, %174, %cst_55 {dimension_numbers = #tpu.dot_dimension_numbers<[1], [0], [0], [1], [0, 0, 1, 1], [], []>} : vector<5x64xbf16>, vector<64x64xbf16>, vector<5x64xf32> -> vector<5x64xf32>
    %176 = vector.extract_strided_slice %21 {offsets = [1, 0], sizes = [5, 64], strides = [1, 1]} : vector<7x64xbf16> to vector<5x64xbf16>
    %177 = vector.extract_strided_slice %0 {offsets = [1, 0, 0], sizes = [1, 64, 64], strides = [1, 1, 1]} : vector<9x64x64xbf16> to vector<1x64x64xbf16>
    %178 = vector.shape_cast %177 : vector<1x64x64xbf16> to vector<64x64xbf16>
    %cst_56 = arith.constant dense<0.000000e+00> : vector<5x64xf32>
    %179 = tpu.matmul %176, %178, %cst_56 {dimension_numbers = #tpu.dot_dimension_numbers<[1], [0], [0], [1], [0, 0, 1, 1], [], []>} : vector<5x64xbf16>, vector<64x64xbf16>, vector<5x64xf32> -> vector<5x64xf32>
    %180 = arith.addf %175, %179 : vector<5x64xf32>
    %181 = vector.extract_strided_slice %21 {offsets = [2, 0], sizes = [5, 64], strides = [1, 1]} : vector<7x64xbf16> to vector<5x64xbf16>
    %182 = vector.extract_strided_slice %0 {offsets = [2, 0, 0], sizes = [1, 64, 64], strides = [1, 1, 1]} : vector<9x64x64xbf16> to vector<1x64x64xbf16>
    %183 = vector.shape_cast %182 : vector<1x64x64xbf16> to vector<64x64xbf16>
    %cst_57 = arith.constant dense<0.000000e+00> : vector<5x64xf32>
    %184 = tpu.matmul %181, %183, %cst_57 {dimension_numbers = #tpu.dot_dimension_numbers<[1], [0], [0], [1], [0, 0, 1, 1], [], []>} : vector<5x64xbf16>, vector<64x64xbf16>, vector<5x64xf32> -> vector<5x64xf32>
    %185 = arith.addf %180, %184 : vector<5x64xf32>
    %186 = vector.extract_strided_slice %26 {offsets = [0, 0], sizes = [5, 64], strides = [1, 1]} : vector<7x64xbf16> to vector<5x64xbf16>
    %187 = vector.extract_strided_slice %0 {offsets = [3, 0, 0], sizes = [1, 64, 64], strides = [1, 1, 1]} : vector<9x64x64xbf16> to vector<1x64x64xbf16>
    %188 = vector.shape_cast %187 : vector<1x64x64xbf16> to vector<64x64xbf16>
    %cst_58 = arith.constant dense<0.000000e+00> : vector<5x64xf32>
    %189 = tpu.matmul %186, %188, %cst_58 {dimension_numbers = #tpu.dot_dimension_numbers<[1], [0], [0], [1], [0, 0, 1, 1], [], []>} : vector<5x64xbf16>, vector<64x64xbf16>, vector<5x64xf32> -> vector<5x64xf32>
    %190 = arith.addf %185, %189 : vector<5x64xf32>
    %191 = vector.extract_strided_slice %26 {offsets = [1, 0], sizes = [5, 64], strides = [1, 1]} : vector<7x64xbf16> to vector<5x64xbf16>
    %192 = vector.extract_strided_slice %0 {offsets = [4, 0, 0], sizes = [1, 64, 64], strides = [1, 1, 1]} : vector<9x64x64xbf16> to vector<1x64x64xbf16>
    %193 = vector.shape_cast %192 : vector<1x64x64xbf16> to vector<64x64xbf16>
    %cst_59 = arith.constant dense<0.000000e+00> : vector<5x64xf32>
    %194 = tpu.matmul %191, %193, %cst_59 {dimension_numbers = #tpu.dot_dimension_numbers<[1], [0], [0], [1], [0, 0, 1, 1], [], []>} : vector<5x64xbf16>, vector<64x64xbf16>, vector<5x64xf32> -> vector<5x64xf32>
    %195 = arith.addf %190, %194 : vector<5x64xf32>
    %196 = vector.extract_strided_slice %26 {offsets = [2, 0], sizes = [5, 64], strides = [1, 1]} : vector<7x64xbf16> to vector<5x64xbf16>
    %197 = vector.extract_strided_slice %0 {offsets = [5, 0, 0], sizes = [1, 64, 64], strides = [1, 1, 1]} : vector<9x64x64xbf16> to vector<1x64x64xbf16>
    %198 = vector.shape_cast %197 : vector<1x64x64xbf16> to vector<64x64xbf16>
    %cst_60 = arith.constant dense<0.000000e+00> : vector<5x64xf32>
    %199 = tpu.matmul %196, %198, %cst_60 {dimension_numbers = #tpu.dot_dimension_numbers<[1], [0], [0], [1], [0, 0, 1, 1], [], []>} : vector<5x64xbf16>, vector<64x64xbf16>, vector<5x64xf32> -> vector<5x64xf32>
    %200 = arith.addf %195, %199 : vector<5x64xf32>
    %201 = vector.extract_strided_slice %31 {offsets = [0, 0], sizes = [5, 64], strides = [1, 1]} : vector<7x64xbf16> to vector<5x64xbf16>
    %202 = vector.extract_strided_slice %0 {offsets = [6, 0, 0], sizes = [1, 64, 64], strides = [1, 1, 1]} : vector<9x64x64xbf16> to vector<1x64x64xbf16>
    %203 = vector.shape_cast %202 : vector<1x64x64xbf16> to vector<64x64xbf16>
    %cst_61 = arith.constant dense<0.000000e+00> : vector<5x64xf32>
    %204 = tpu.matmul %201, %203, %cst_61 {dimension_numbers = #tpu.dot_dimension_numbers<[1], [0], [0], [1], [0, 0, 1, 1], [], []>} : vector<5x64xbf16>, vector<64x64xbf16>, vector<5x64xf32> -> vector<5x64xf32>
    %205 = arith.addf %200, %204 : vector<5x64xf32>
    %206 = vector.extract_strided_slice %31 {offsets = [1, 0], sizes = [5, 64], strides = [1, 1]} : vector<7x64xbf16> to vector<5x64xbf16>
    %207 = vector.extract_strided_slice %0 {offsets = [7, 0, 0], sizes = [1, 64, 64], strides = [1, 1, 1]} : vector<9x64x64xbf16> to vector<1x64x64xbf16>
    %208 = vector.shape_cast %207 : vector<1x64x64xbf16> to vector<64x64xbf16>
    %cst_62 = arith.constant dense<0.000000e+00> : vector<5x64xf32>
    %209 = tpu.matmul %206, %208, %cst_62 {dimension_numbers = #tpu.dot_dimension_numbers<[1], [0], [0], [1], [0, 0, 1, 1], [], []>} : vector<5x64xbf16>, vector<64x64xbf16>, vector<5x64xf32> -> vector<5x64xf32>
    %210 = arith.addf %205, %209 : vector<5x64xf32>
    %211 = vector.extract_strided_slice %31 {offsets = [2, 0], sizes = [5, 64], strides = [1, 1]} : vector<7x64xbf16> to vector<5x64xbf16>
    %212 = vector.extract_strided_slice %0 {offsets = [8, 0, 0], sizes = [1, 64, 64], strides = [1, 1, 1]} : vector<9x64x64xbf16> to vector<1x64x64xbf16>
    %213 = vector.shape_cast %212 : vector<1x64x64xbf16> to vector<64x64xbf16>
    %cst_63 = arith.constant dense<0.000000e+00> : vector<5x64xf32>
    %214 = tpu.matmul %211, %213, %cst_63 {dimension_numbers = #tpu.dot_dimension_numbers<[1], [0], [0], [1], [0, 0, 1, 1], [], []>} : vector<5x64xbf16>, vector<64x64xbf16>, vector<5x64xf32> -> vector<5x64xf32>
    %215 = arith.addf %210, %214 : vector<5x64xf32>
    %216 = vector.broadcast %1 : vector<1x64xf32> to vector<5x64xf32>
    %217 = arith.addf %215, %216 : vector<5x64xf32>
    %218 = arith.maximumf %171, %217 : vector<5x64xf32>
    %cst_64 = arith.constant 0.000000e+00 : f32
    %219 = vector.broadcast %cst_64 : f32 to vector<5x64xf32>
    %220 = arith.maximumf %218, %219 : vector<5x64xf32>
    %221 = vector.extract_strided_slice %220 {offsets = [0, 0], sizes = [4, 64], strides = [1, 1]} : vector<5x64xf32> to vector<4x64xf32>
    %cst_65 = arith.constant dense<0xFF800000> : vector<64xf32>
    %222 = vector.multi_reduction <maximumf>, %221, %cst_65 [0] : vector<4x64xf32> to vector<64xf32>
    %223 = vector.shape_cast %222 : vector<64xf32> to vector<1x64xf32>
    %224 = arith.truncf %223 : vector<1x64xf32> to vector<1x64xbf16>
    %c0_66 = arith.constant 0 : index
    %225 = arith.index_cast %c0_i32 : i32 to index
    %c0_67 = arith.constant 0 : index
    %c0_68 = arith.constant 0 : index
    %226 = vector.load %arg4[%c0_66, %225, %c0_67, %c0_68] : memref<1x1x1x64xbf16, #tpu.memory_space<vmem>>, vector<1x1x1x64xbf16>
    %227 = vector.shape_cast %226 : vector<1x1x1x64xbf16> to vector<1x64xbf16>
    %228 = vector.shape_cast %224 : vector<1x64xbf16> to vector<1x1x1x64xbf16>
    tpu.vector_store %arg4[%c0_66, %225, %c0_67, %c0_68], %228 {strides = array<i32>} : memref<1x1x1x64xbf16, #tpu.memory_space<vmem>>, vector<1x1x1x64xbf16>,
    %c1_i32_69 = arith.constant 1 : i32
    return
  }
  func.func @transform_0(%arg0: i32) -> (i32, i32, i32, i32) {
    %c0_i32 = arith.constant 0 : i32
    %c0_i32_0 = arith.constant 0 : i32
    %c0_i32_1 = arith.constant 0 : i32
    %c0_i32_2 = arith.constant 0 : i32
    return %arg0, %c0_i32, %c0_i32_0, %c0_i32_1 : i32, i32, i32, i32
  }
  func.func @transform_1(%arg0: i32) -> (i32, i32, i32) {
    %c0_i32 = arith.constant 0 : i32
    %c0_i32_0 = arith.constant 0 : i32
    %c0_i32_1 = arith.constant 0 : i32
    %c0_i32_2 = arith.constant 0 : i32
    return %c0_i32, %c0_i32_0, %c0_i32_1 : i32, i32, i32
  }
  func.func @transform_2(%arg0: i32) -> (i32, i32) {
    %c0_i32 = arith.constant 0 : i32
    %c0_i32_0 = arith.constant 0 : i32
    %c0_i32_1 = arith.constant 0 : i32
    return %c0_i32, %c0_i32_0 : i32, i32
  }
  func.func @transform_3(%arg0: i32) -> (i32, i32, i32, i32) {
    %c0_i32 = arith.constant 0 : i32
    %c0_i32_0 = arith.constant 0 : i32
    %c0_i32_1 = arith.constant 0 : i32
    %c0_i32_2 = arith.constant 0 : i32
    return %arg0, %c0_i32, %c0_i32_0, %c0_i32_1 : i32, i32, i32, i32
  }
}

module attributes {stable_mosaic.version = 11 : i64} {
  func.func @_conv3x3_pool4_relu_kernel(%arg0: i32, %arg1: memref<1x32x32x4xbf16, #tpu.memory_space<vmem>>, %arg2: memref<9x4x64xbf16, #tpu.memory_space<vmem>>, %arg3: memref<1x64xf32, #tpu.memory_space<vmem>>, %arg4: memref<1x7x7x64xbf16, #tpu.memory_space<vmem>>) attributes {dimension_semantics = [#tpu.dimension_semantics<parallel>], iteration_bounds = array<i64: 2>, scalar_prefetch = 0 : i64, scratch_operands = 0 : i64, tpu.core_type = #tpu.core_type<tc>, window_params = [{transform_indices = @transform_0, window_bounds = array<i64: 1, 32, 32, 4>}, {pipeline_mode = #tpu.pipeline_mode<synchronous>, transform_indices = @transform_1, window_bounds = array<i64: 9, 4, 64>}, {pipeline_mode = #tpu.pipeline_mode<synchronous>, transform_indices = @transform_2, window_bounds = array<i64: 1, 64>}, {transform_indices = @transform_3, window_bounds = array<i64: 1, 7, 7, 64>}]} {
    %c0 = arith.constant 0 : index
    %c0_0 = arith.constant 0 : index
    %c0_1 = arith.constant 0 : index
    %0 = vector.load %arg2[%c0, %c0_0, %c0_1] : memref<9x4x64xbf16, #tpu.memory_space<vmem>>, vector<9x4x64xbf16>
    %c0_2 = arith.constant 0 : index
    %c0_3 = arith.constant 0 : index
    %1 = vector.load %arg3[%c0_2, %c0_3] : memref<1x64xf32, #tpu.memory_space<vmem>>, vector<1x64xf32>
    %c0_i32 = arith.constant 0 : i32
    %c7_i32 = arith.constant 7 : i32
    %2 = arith.addi %c0_i32, %c7_i32 : i32
    %c1_i32 = arith.constant 1 : i32
    scf.for %arg5 = %c0_i32 to %2 step %c1_i32  : i32 {
      %c4_i32 = arith.constant 4 : i32
      %3 = arith.muli %c4_i32, %arg5 : i32
      %c0_i32_5 = arith.constant 0 : i32
      %4 = arith.addi %3, %c0_i32_5 : i32
      %c0_6 = arith.constant 0 : index
      %5 = arith.index_cast %4 : i32 to index
      %c0_7 = arith.constant 0 : index
      %c0_8 = arith.constant 0 : index
      %6 = vector.load %arg1[%c0_6, %5, %c0_7, %c0_8] : memref<1x32x32x4xbf16, #tpu.memory_space<vmem>>, vector<1x1x32x4xbf16>
      %7 = vector.shape_cast %6 : vector<1x1x32x4xbf16> to vector<32x4xbf16>
      %c4_i32_9 = arith.constant 4 : i32
      %8 = arith.muli %c4_i32_9, %arg5 : i32
      %c1_i32_10 = arith.constant 1 : i32
      %9 = arith.addi %8, %c1_i32_10 : i32
      %c0_11 = arith.constant 0 : index
      %10 = arith.index_cast %9 : i32 to index
      %c0_12 = arith.constant 0 : index
      %c0_13 = arith.constant 0 : index
      %11 = vector.load %arg1[%c0_11, %10, %c0_12, %c0_13] : memref<1x32x32x4xbf16, #tpu.memory_space<vmem>>, vector<1x1x32x4xbf16>
      %12 = vector.shape_cast %11 : vector<1x1x32x4xbf16> to vector<32x4xbf16>
      %c4_i32_14 = arith.constant 4 : i32
      %13 = arith.muli %c4_i32_14, %arg5 : i32
      %c2_i32 = arith.constant 2 : i32
      %14 = arith.addi %13, %c2_i32 : i32
      %c0_15 = arith.constant 0 : index
      %15 = arith.index_cast %14 : i32 to index
      %c0_16 = arith.constant 0 : index
      %c0_17 = arith.constant 0 : index
      %16 = vector.load %arg1[%c0_15, %15, %c0_16, %c0_17] : memref<1x32x32x4xbf16, #tpu.memory_space<vmem>>, vector<1x1x32x4xbf16>
      %17 = vector.shape_cast %16 : vector<1x1x32x4xbf16> to vector<32x4xbf16>
      %c4_i32_18 = arith.constant 4 : i32
      %18 = arith.muli %c4_i32_18, %arg5 : i32
      %c3_i32 = arith.constant 3 : i32
      %19 = arith.addi %18, %c3_i32 : i32
      %c0_19 = arith.constant 0 : index
      %20 = arith.index_cast %19 : i32 to index
      %c0_20 = arith.constant 0 : index
      %c0_21 = arith.constant 0 : index
      %21 = vector.load %arg1[%c0_19, %20, %c0_20, %c0_21] : memref<1x32x32x4xbf16, #tpu.memory_space<vmem>>, vector<1x1x32x4xbf16>
      %22 = vector.shape_cast %21 : vector<1x1x32x4xbf16> to vector<32x4xbf16>
      %c4_i32_22 = arith.constant 4 : i32
      %23 = arith.muli %c4_i32_22, %arg5 : i32
      %c4_i32_23 = arith.constant 4 : i32
      %24 = arith.addi %23, %c4_i32_23 : i32
      %c0_24 = arith.constant 0 : index
      %25 = arith.index_cast %24 : i32 to index
      %c0_25 = arith.constant 0 : index
      %c0_26 = arith.constant 0 : index
      %26 = vector.load %arg1[%c0_24, %25, %c0_25, %c0_26] : memref<1x32x32x4xbf16, #tpu.memory_space<vmem>>, vector<1x1x32x4xbf16>
      %27 = vector.shape_cast %26 : vector<1x1x32x4xbf16> to vector<32x4xbf16>
      %c4_i32_27 = arith.constant 4 : i32
      %28 = arith.muli %c4_i32_27, %arg5 : i32
      %c5_i32 = arith.constant 5 : i32
      %29 = arith.addi %28, %c5_i32 : i32
      %c0_28 = arith.constant 0 : index
      %30 = arith.index_cast %29 : i32 to index
      %c0_29 = arith.constant 0 : index
      %c0_30 = arith.constant 0 : index
      %31 = vector.load %arg1[%c0_28, %30, %c0_29, %c0_30] : memref<1x32x32x4xbf16, #tpu.memory_space<vmem>>, vector<1x1x32x4xbf16>
      %32 = vector.shape_cast %31 : vector<1x1x32x4xbf16> to vector<32x4xbf16>
      %33 = vector.extract_strided_slice %7 {offsets = [0, 0], sizes = [30, 4], strides = [1, 1]} : vector<32x4xbf16> to vector<30x4xbf16>
      %34 = vector.extract_strided_slice %0 {offsets = [0, 0, 0], sizes = [1, 4, 64], strides = [1, 1, 1]} : vector<9x4x64xbf16> to vector<1x4x64xbf16>
      %35 = vector.shape_cast %34 : vector<1x4x64xbf16> to vector<4x64xbf16>
      %cst = arith.constant dense<0.000000e+00> : vector<30x64xf32>
      %36 = tpu.matmul %33, %35, %cst {dimension_numbers = #tpu.dot_dimension_numbers<[1], [0], [0], [1], [0, 0, 1, 1], [], []>} : vector<30x4xbf16>, vector<4x64xbf16>, vector<30x64xf32> -> vector<30x64xf32>
      %37 = vector.extract_strided_slice %7 {offsets = [1, 0], sizes = [30, 4], strides = [1, 1]} : vector<32x4xbf16> to vector<30x4xbf16>
      %38 = vector.extract_strided_slice %0 {offsets = [1, 0, 0], sizes = [1, 4, 64], strides = [1, 1, 1]} : vector<9x4x64xbf16> to vector<1x4x64xbf16>
      %39 = vector.shape_cast %38 : vector<1x4x64xbf16> to vector<4x64xbf16>
      %cst_31 = arith.constant dense<0.000000e+00> : vector<30x64xf32>
      %40 = tpu.matmul %37, %39, %cst_31 {dimension_numbers = #tpu.dot_dimension_numbers<[1], [0], [0], [1], [0, 0, 1, 1], [], []>} : vector<30x4xbf16>, vector<4x64xbf16>, vector<30x64xf32> -> vector<30x64xf32>
      %41 = arith.addf %36, %40 : vector<30x64xf32>
      %42 = vector.extract_strided_slice %7 {offsets = [2, 0], sizes = [30, 4], strides = [1, 1]} : vector<32x4xbf16> to vector<30x4xbf16>
      %43 = vector.extract_strided_slice %0 {offsets = [2, 0, 0], sizes = [1, 4, 64], strides = [1, 1, 1]} : vector<9x4x64xbf16> to vector<1x4x64xbf16>
      %44 = vector.shape_cast %43 : vector<1x4x64xbf16> to vector<4x64xbf16>
      %cst_32 = arith.constant dense<0.000000e+00> : vector<30x64xf32>
      %45 = tpu.matmul %42, %44, %cst_32 {dimension_numbers = #tpu.dot_dimension_numbers<[1], [0], [0], [1], [0, 0, 1, 1], [], []>} : vector<30x4xbf16>, vector<4x64xbf16>, vector<30x64xf32> -> vector<30x64xf32>
      %46 = arith.addf %41, %45 : vector<30x64xf32>
      %47 = vector.extract_strided_slice %12 {offsets = [0, 0], sizes = [30, 4], strides = [1, 1]} : vector<32x4xbf16> to vector<30x4xbf16>
      %48 = vector.extract_strided_slice %0 {offsets = [3, 0, 0], sizes = [1, 4, 64], strides = [1, 1, 1]} : vector<9x4x64xbf16> to vector<1x4x64xbf16>
      %49 = vector.shape_cast %48 : vector<1x4x64xbf16> to vector<4x64xbf16>
      %cst_33 = arith.constant dense<0.000000e+00> : vector<30x64xf32>
      %50 = tpu.matmul %47, %49, %cst_33 {dimension_numbers = #tpu.dot_dimension_numbers<[1], [0], [0], [1], [0, 0, 1, 1], [], []>} : vector<30x4xbf16>, vector<4x64xbf16>, vector<30x64xf32> -> vector<30x64xf32>
      %51 = arith.addf %46, %50 : vector<30x64xf32>
      %52 = vector.extract_strided_slice %12 {offsets = [1, 0], sizes = [30, 4], strides = [1, 1]} : vector<32x4xbf16> to vector<30x4xbf16>
      %53 = vector.extract_strided_slice %0 {offsets = [4, 0, 0], sizes = [1, 4, 64], strides = [1, 1, 1]} : vector<9x4x64xbf16> to vector<1x4x64xbf16>
      %54 = vector.shape_cast %53 : vector<1x4x64xbf16> to vector<4x64xbf16>
      %cst_34 = arith.constant dense<0.000000e+00> : vector<30x64xf32>
      %55 = tpu.matmul %52, %54, %cst_34 {dimension_numbers = #tpu.dot_dimension_numbers<[1], [0], [0], [1], [0, 0, 1, 1], [], []>} : vector<30x4xbf16>, vector<4x64xbf16>, vector<30x64xf32> -> vector<30x64xf32>
      %56 = arith.addf %51, %55 : vector<30x64xf32>
      %57 = vector.extract_strided_slice %12 {offsets = [2, 0], sizes = [30, 4], strides = [1, 1]} : vector<32x4xbf16> to vector<30x4xbf16>
      %58 = vector.extract_strided_slice %0 {offsets = [5, 0, 0], sizes = [1, 4, 64], strides = [1, 1, 1]} : vector<9x4x64xbf16> to vector<1x4x64xbf16>
      %59 = vector.shape_cast %58 : vector<1x4x64xbf16> to vector<4x64xbf16>
      %cst_35 = arith.constant dense<0.000000e+00> : vector<30x64xf32>
      %60 = tpu.matmul %57, %59, %cst_35 {dimension_numbers = #tpu.dot_dimension_numbers<[1], [0], [0], [1], [0, 0, 1, 1], [], []>} : vector<30x4xbf16>, vector<4x64xbf16>, vector<30x64xf32> -> vector<30x64xf32>
      %61 = arith.addf %56, %60 : vector<30x64xf32>
      %62 = vector.extract_strided_slice %17 {offsets = [0, 0], sizes = [30, 4], strides = [1, 1]} : vector<32x4xbf16> to vector<30x4xbf16>
      %63 = vector.extract_strided_slice %0 {offsets = [6, 0, 0], sizes = [1, 4, 64], strides = [1, 1, 1]} : vector<9x4x64xbf16> to vector<1x4x64xbf16>
      %64 = vector.shape_cast %63 : vector<1x4x64xbf16> to vector<4x64xbf16>
      %cst_36 = arith.constant dense<0.000000e+00> : vector<30x64xf32>
      %65 = tpu.matmul %62, %64, %cst_36 {dimension_numbers = #tpu.dot_dimension_numbers<[1], [0], [0], [1], [0, 0, 1, 1], [], []>} : vector<30x4xbf16>, vector<4x64xbf16>, vector<30x64xf32> -> vector<30x64xf32>
      %66 = arith.addf %61, %65 : vector<30x64xf32>
      %67 = vector.extract_strided_slice %17 {offsets = [1, 0], sizes = [30, 4], strides = [1, 1]} : vector<32x4xbf16> to vector<30x4xbf16>
      %68 = vector.extract_strided_slice %0 {offsets = [7, 0, 0], sizes = [1, 4, 64], strides = [1, 1, 1]} : vector<9x4x64xbf16> to vector<1x4x64xbf16>
      %69 = vector.shape_cast %68 : vector<1x4x64xbf16> to vector<4x64xbf16>
      %cst_37 = arith.constant dense<0.000000e+00> : vector<30x64xf32>
      %70 = tpu.matmul %67, %69, %cst_37 {dimension_numbers = #tpu.dot_dimension_numbers<[1], [0], [0], [1], [0, 0, 1, 1], [], []>} : vector<30x4xbf16>, vector<4x64xbf16>, vector<30x64xf32> -> vector<30x64xf32>
      %71 = arith.addf %66, %70 : vector<30x64xf32>
      %72 = vector.extract_strided_slice %17 {offsets = [2, 0], sizes = [30, 4], strides = [1, 1]} : vector<32x4xbf16> to vector<30x4xbf16>
      %73 = vector.extract_strided_slice %0 {offsets = [8, 0, 0], sizes = [1, 4, 64], strides = [1, 1, 1]} : vector<9x4x64xbf16> to vector<1x4x64xbf16>
      %74 = vector.shape_cast %73 : vector<1x4x64xbf16> to vector<4x64xbf16>
      %cst_38 = arith.constant dense<0.000000e+00> : vector<30x64xf32>
      %75 = tpu.matmul %72, %74, %cst_38 {dimension_numbers = #tpu.dot_dimension_numbers<[1], [0], [0], [1], [0, 0, 1, 1], [], []>} : vector<30x4xbf16>, vector<4x64xbf16>, vector<30x64xf32> -> vector<30x64xf32>
      %76 = arith.addf %71, %75 : vector<30x64xf32>
      %77 = vector.broadcast %1 : vector<1x64xf32> to vector<30x64xf32>
      %78 = arith.addf %76, %77 : vector<30x64xf32>
      %79 = vector.extract_strided_slice %12 {offsets = [0, 0], sizes = [30, 4], strides = [1, 1]} : vector<32x4xbf16> to vector<30x4xbf16>
      %80 = vector.extract_strided_slice %0 {offsets = [0, 0, 0], sizes = [1, 4, 64], strides = [1, 1, 1]} : vector<9x4x64xbf16> to vector<1x4x64xbf16>
      %81 = vector.shape_cast %80 : vector<1x4x64xbf16> to vector<4x64xbf16>
      %cst_39 = arith.constant dense<0.000000e+00> : vector<30x64xf32>
      %82 = tpu.matmul %79, %81, %cst_39 {dimension_numbers = #tpu.dot_dimension_numbers<[1], [0], [0], [1], [0, 0, 1, 1], [], []>} : vector<30x4xbf16>, vector<4x64xbf16>, vector<30x64xf32> -> vector<30x64xf32>
      %83 = vector.extract_strided_slice %12 {offsets = [1, 0], sizes = [30, 4], strides = [1, 1]} : vector<32x4xbf16> to vector<30x4xbf16>
      %84 = vector.extract_strided_slice %0 {offsets = [1, 0, 0], sizes = [1, 4, 64], strides = [1, 1, 1]} : vector<9x4x64xbf16> to vector<1x4x64xbf16>
      %85 = vector.shape_cast %84 : vector<1x4x64xbf16> to vector<4x64xbf16>
      %cst_40 = arith.constant dense<0.000000e+00> : vector<30x64xf32>
      %86 = tpu.matmul %83, %85, %cst_40 {dimension_numbers = #tpu.dot_dimension_numbers<[1], [0], [0], [1], [0, 0, 1, 1], [], []>} : vector<30x4xbf16>, vector<4x64xbf16>, vector<30x64xf32> -> vector<30x64xf32>
      %87 = arith.addf %82, %86 : vector<30x64xf32>
      %88 = vector.extract_strided_slice %12 {offsets = [2, 0], sizes = [30, 4], strides = [1, 1]} : vector<32x4xbf16> to vector<30x4xbf16>
      %89 = vector.extract_strided_slice %0 {offsets = [2, 0, 0], sizes = [1, 4, 64], strides = [1, 1, 1]} : vector<9x4x64xbf16> to vector<1x4x64xbf16>
      %90 = vector.shape_cast %89 : vector<1x4x64xbf16> to vector<4x64xbf16>
      %cst_41 = arith.constant dense<0.000000e+00> : vector<30x64xf32>
      %91 = tpu.matmul %88, %90, %cst_41 {dimension_numbers = #tpu.dot_dimension_numbers<[1], [0], [0], [1], [0, 0, 1, 1], [], []>} : vector<30x4xbf16>, vector<4x64xbf16>, vector<30x64xf32> -> vector<30x64xf32>
      %92 = arith.addf %87, %91 : vector<30x64xf32>
      %93 = vector.extract_strided_slice %17 {offsets = [0, 0], sizes = [30, 4], strides = [1, 1]} : vector<32x4xbf16> to vector<30x4xbf16>
      %94 = vector.extract_strided_slice %0 {offsets = [3, 0, 0], sizes = [1, 4, 64], strides = [1, 1, 1]} : vector<9x4x64xbf16> to vector<1x4x64xbf16>
      %95 = vector.shape_cast %94 : vector<1x4x64xbf16> to vector<4x64xbf16>
      %cst_42 = arith.constant dense<0.000000e+00> : vector<30x64xf32>
      %96 = tpu.matmul %93, %95, %cst_42 {dimension_numbers = #tpu.dot_dimension_numbers<[1], [0], [0], [1], [0, 0, 1, 1], [], []>} : vector<30x4xbf16>, vector<4x64xbf16>, vector<30x64xf32> -> vector<30x64xf32>
      %97 = arith.addf %92, %96 : vector<30x64xf32>
      %98 = vector.extract_strided_slice %17 {offsets = [1, 0], sizes = [30, 4], strides = [1, 1]} : vector<32x4xbf16> to vector<30x4xbf16>
      %99 = vector.extract_strided_slice %0 {offsets = [4, 0, 0], sizes = [1, 4, 64], strides = [1, 1, 1]} : vector<9x4x64xbf16> to vector<1x4x64xbf16>
      %100 = vector.shape_cast %99 : vector<1x4x64xbf16> to vector<4x64xbf16>
      %cst_43 = arith.constant dense<0.000000e+00> : vector<30x64xf32>
      %101 = tpu.matmul %98, %100, %cst_43 {dimension_numbers = #tpu.dot_dimension_numbers<[1], [0], [0], [1], [0, 0, 1, 1], [], []>} : vector<30x4xbf16>, vector<4x64xbf16>, vector<30x64xf32> -> vector<30x64xf32>
      %102 = arith.addf %97, %101 : vector<30x64xf32>
      %103 = vector.extract_strided_slice %17 {offsets = [2, 0], sizes = [30, 4], strides = [1, 1]} : vector<32x4xbf16> to vector<30x4xbf16>
      %104 = vector.extract_strided_slice %0 {offsets = [5, 0, 0], sizes = [1, 4, 64], strides = [1, 1, 1]} : vector<9x4x64xbf16> to vector<1x4x64xbf16>
      %105 = vector.shape_cast %104 : vector<1x4x64xbf16> to vector<4x64xbf16>
      %cst_44 = arith.constant dense<0.000000e+00> : vector<30x64xf32>
      %106 = tpu.matmul %103, %105, %cst_44 {dimension_numbers = #tpu.dot_dimension_numbers<[1], [0], [0], [1], [0, 0, 1, 1], [], []>} : vector<30x4xbf16>, vector<4x64xbf16>, vector<30x64xf32> -> vector<30x64xf32>
      %107 = arith.addf %102, %106 : vector<30x64xf32>
      %108 = vector.extract_strided_slice %22 {offsets = [0, 0], sizes = [30, 4], strides = [1, 1]} : vector<32x4xbf16> to vector<30x4xbf16>
      %109 = vector.extract_strided_slice %0 {offsets = [6, 0, 0], sizes = [1, 4, 64], strides = [1, 1, 1]} : vector<9x4x64xbf16> to vector<1x4x64xbf16>
      %110 = vector.shape_cast %109 : vector<1x4x64xbf16> to vector<4x64xbf16>
      %cst_45 = arith.constant dense<0.000000e+00> : vector<30x64xf32>
      %111 = tpu.matmul %108, %110, %cst_45 {dimension_numbers = #tpu.dot_dimension_numbers<[1], [0], [0], [1], [0, 0, 1, 1], [], []>} : vector<30x4xbf16>, vector<4x64xbf16>, vector<30x64xf32> -> vector<30x64xf32>
      %112 = arith.addf %107, %111 : vector<30x64xf32>
      %113 = vector.extract_strided_slice %22 {offsets = [1, 0], sizes = [30, 4], strides = [1, 1]} : vector<32x4xbf16> to vector<30x4xbf16>
      %114 = vector.extract_strided_slice %0 {offsets = [7, 0, 0], sizes = [1, 4, 64], strides = [1, 1, 1]} : vector<9x4x64xbf16> to vector<1x4x64xbf16>
      %115 = vector.shape_cast %114 : vector<1x4x64xbf16> to vector<4x64xbf16>
      %cst_46 = arith.constant dense<0.000000e+00> : vector<30x64xf32>
      %116 = tpu.matmul %113, %115, %cst_46 {dimension_numbers = #tpu.dot_dimension_numbers<[1], [0], [0], [1], [0, 0, 1, 1], [], []>} : vector<30x4xbf16>, vector<4x64xbf16>, vector<30x64xf32> -> vector<30x64xf32>
      %117 = arith.addf %112, %116 : vector<30x64xf32>
      %118 = vector.extract_strided_slice %22 {offsets = [2, 0], sizes = [30, 4], strides = [1, 1]} : vector<32x4xbf16> to vector<30x4xbf16>
      %119 = vector.extract_strided_slice %0 {offsets = [8, 0, 0], sizes = [1, 4, 64], strides = [1, 1, 1]} : vector<9x4x64xbf16> to vector<1x4x64xbf16>
      %120 = vector.shape_cast %119 : vector<1x4x64xbf16> to vector<4x64xbf16>
      %cst_47 = arith.constant dense<0.000000e+00> : vector<30x64xf32>
      %121 = tpu.matmul %118, %120, %cst_47 {dimension_numbers = #tpu.dot_dimension_numbers<[1], [0], [0], [1], [0, 0, 1, 1], [], []>} : vector<30x4xbf16>, vector<4x64xbf16>, vector<30x64xf32> -> vector<30x64xf32>
      %122 = arith.addf %117, %121 : vector<30x64xf32>
      %123 = vector.broadcast %1 : vector<1x64xf32> to vector<30x64xf32>
      %124 = arith.addf %122, %123 : vector<30x64xf32>
      %125 = arith.maximumf %78, %124 : vector<30x64xf32>
      %126 = vector.extract_strided_slice %17 {offsets = [0, 0], sizes = [30, 4], strides = [1, 1]} : vector<32x4xbf16> to vector<30x4xbf16>
      %127 = vector.extract_strided_slice %0 {offsets = [0, 0, 0], sizes = [1, 4, 64], strides = [1, 1, 1]} : vector<9x4x64xbf16> to vector<1x4x64xbf16>
      %128 = vector.shape_cast %127 : vector<1x4x64xbf16> to vector<4x64xbf16>
      %cst_48 = arith.constant dense<0.000000e+00> : vector<30x64xf32>
      %129 = tpu.matmul %126, %128, %cst_48 {dimension_numbers = #tpu.dot_dimension_numbers<[1], [0], [0], [1], [0, 0, 1, 1], [], []>} : vector<30x4xbf16>, vector<4x64xbf16>, vector<30x64xf32> -> vector<30x64xf32>
      %130 = vector.extract_strided_slice %17 {offsets = [1, 0], sizes = [30, 4], strides = [1, 1]} : vector<32x4xbf16> to vector<30x4xbf16>
      %131 = vector.extract_strided_slice %0 {offsets = [1, 0, 0], sizes = [1, 4, 64], strides = [1, 1, 1]} : vector<9x4x64xbf16> to vector<1x4x64xbf16>
      %132 = vector.shape_cast %131 : vector<1x4x64xbf16> to vector<4x64xbf16>
      %cst_49 = arith.constant dense<0.000000e+00> : vector<30x64xf32>
      %133 = tpu.matmul %130, %132, %cst_49 {dimension_numbers = #tpu.dot_dimension_numbers<[1], [0], [0], [1], [0, 0, 1, 1], [], []>} : vector<30x4xbf16>, vector<4x64xbf16>, vector<30x64xf32> -> vector<30x64xf32>
      %134 = arith.addf %129, %133 : vector<30x64xf32>
      %135 = vector.extract_strided_slice %17 {offsets = [2, 0], sizes = [30, 4], strides = [1, 1]} : vector<32x4xbf16> to vector<30x4xbf16>
      %136 = vector.extract_strided_slice %0 {offsets = [2, 0, 0], sizes = [1, 4, 64], strides = [1, 1, 1]} : vector<9x4x64xbf16> to vector<1x4x64xbf16>
      %137 = vector.shape_cast %136 : vector<1x4x64xbf16> to vector<4x64xbf16>
      %cst_50 = arith.constant dense<0.000000e+00> : vector<30x64xf32>
      %138 = tpu.matmul %135, %137, %cst_50 {dimension_numbers = #tpu.dot_dimension_numbers<[1], [0], [0], [1], [0, 0, 1, 1], [], []>} : vector<30x4xbf16>, vector<4x64xbf16>, vector<30x64xf32> -> vector<30x64xf32>
      %139 = arith.addf %134, %138 : vector<30x64xf32>
      %140 = vector.extract_strided_slice %22 {offsets = [0, 0], sizes = [30, 4], strides = [1, 1]} : vector<32x4xbf16> to vector<30x4xbf16>
      %141 = vector.extract_strided_slice %0 {offsets = [3, 0, 0], sizes = [1, 4, 64], strides = [1, 1, 1]} : vector<9x4x64xbf16> to vector<1x4x64xbf16>
      %142 = vector.shape_cast %141 : vector<1x4x64xbf16> to vector<4x64xbf16>
      %cst_51 = arith.constant dense<0.000000e+00> : vector<30x64xf32>
      %143 = tpu.matmul %140, %142, %cst_51 {dimension_numbers = #tpu.dot_dimension_numbers<[1], [0], [0], [1], [0, 0, 1, 1], [], []>} : vector<30x4xbf16>, vector<4x64xbf16>, vector<30x64xf32> -> vector<30x64xf32>
      %144 = arith.addf %139, %143 : vector<30x64xf32>
      %145 = vector.extract_strided_slice %22 {offsets = [1, 0], sizes = [30, 4], strides = [1, 1]} : vector<32x4xbf16> to vector<30x4xbf16>
      %146 = vector.extract_strided_slice %0 {offsets = [4, 0, 0], sizes = [1, 4, 64], strides = [1, 1, 1]} : vector<9x4x64xbf16> to vector<1x4x64xbf16>
      %147 = vector.shape_cast %146 : vector<1x4x64xbf16> to vector<4x64xbf16>
      %cst_52 = arith.constant dense<0.000000e+00> : vector<30x64xf32>
      %148 = tpu.matmul %145, %147, %cst_52 {dimension_numbers = #tpu.dot_dimension_numbers<[1], [0], [0], [1], [0, 0, 1, 1], [], []>} : vector<30x4xbf16>, vector<4x64xbf16>, vector<30x64xf32> -> vector<30x64xf32>
      %149 = arith.addf %144, %148 : vector<30x64xf32>
      %150 = vector.extract_strided_slice %22 {offsets = [2, 0], sizes = [30, 4], strides = [1, 1]} : vector<32x4xbf16> to vector<30x4xbf16>
      %151 = vector.extract_strided_slice %0 {offsets = [5, 0, 0], sizes = [1, 4, 64], strides = [1, 1, 1]} : vector<9x4x64xbf16> to vector<1x4x64xbf16>
      %152 = vector.shape_cast %151 : vector<1x4x64xbf16> to vector<4x64xbf16>
      %cst_53 = arith.constant dense<0.000000e+00> : vector<30x64xf32>
      %153 = tpu.matmul %150, %152, %cst_53 {dimension_numbers = #tpu.dot_dimension_numbers<[1], [0], [0], [1], [0, 0, 1, 1], [], []>} : vector<30x4xbf16>, vector<4x64xbf16>, vector<30x64xf32> -> vector<30x64xf32>
      %154 = arith.addf %149, %153 : vector<30x64xf32>
      %155 = vector.extract_strided_slice %27 {offsets = [0, 0], sizes = [30, 4], strides = [1, 1]} : vector<32x4xbf16> to vector<30x4xbf16>
      %156 = vector.extract_strided_slice %0 {offsets = [6, 0, 0], sizes = [1, 4, 64], strides = [1, 1, 1]} : vector<9x4x64xbf16> to vector<1x4x64xbf16>
      %157 = vector.shape_cast %156 : vector<1x4x64xbf16> to vector<4x64xbf16>
      %cst_54 = arith.constant dense<0.000000e+00> : vector<30x64xf32>
      %158 = tpu.matmul %155, %157, %cst_54 {dimension_numbers = #tpu.dot_dimension_numbers<[1], [0], [0], [1], [0, 0, 1, 1], [], []>} : vector<30x4xbf16>, vector<4x64xbf16>, vector<30x64xf32> -> vector<30x64xf32>
      %159 = arith.addf %154, %158 : vector<30x64xf32>
      %160 = vector.extract_strided_slice %27 {offsets = [1, 0], sizes = [30, 4], strides = [1, 1]} : vector<32x4xbf16> to vector<30x4xbf16>
      %161 = vector.extract_strided_slice %0 {offsets = [7, 0, 0], sizes = [1, 4, 64], strides = [1, 1, 1]} : vector<9x4x64xbf16> to vector<1x4x64xbf16>
      %162 = vector.shape_cast %161 : vector<1x4x64xbf16> to vector<4x64xbf16>
      %cst_55 = arith.constant dense<0.000000e+00> : vector<30x64xf32>
      %163 = tpu.matmul %160, %162, %cst_55 {dimension_numbers = #tpu.dot_dimension_numbers<[1], [0], [0], [1], [0, 0, 1, 1], [], []>} : vector<30x4xbf16>, vector<4x64xbf16>, vector<30x64xf32> -> vector<30x64xf32>
      %164 = arith.addf %159, %163 : vector<30x64xf32>
      %165 = vector.extract_strided_slice %27 {offsets = [2, 0], sizes = [30, 4], strides = [1, 1]} : vector<32x4xbf16> to vector<30x4xbf16>
      %166 = vector.extract_strided_slice %0 {offsets = [8, 0, 0], sizes = [1, 4, 64], strides = [1, 1, 1]} : vector<9x4x64xbf16> to vector<1x4x64xbf16>
      %167 = vector.shape_cast %166 : vector<1x4x64xbf16> to vector<4x64xbf16>
      %cst_56 = arith.constant dense<0.000000e+00> : vector<30x64xf32>
      %168 = tpu.matmul %165, %167, %cst_56 {dimension_numbers = #tpu.dot_dimension_numbers<[1], [0], [0], [1], [0, 0, 1, 1], [], []>} : vector<30x4xbf16>, vector<4x64xbf16>, vector<30x64xf32> -> vector<30x64xf32>
      %169 = arith.addf %164, %168 : vector<30x64xf32>
      %170 = vector.broadcast %1 : vector<1x64xf32> to vector<30x64xf32>
      %171 = arith.addf %169, %170 : vector<30x64xf32>
      %172 = arith.maximumf %125, %171 : vector<30x64xf32>
      %173 = vector.extract_strided_slice %22 {offsets = [0, 0], sizes = [30, 4], strides = [1, 1]} : vector<32x4xbf16> to vector<30x4xbf16>
      %174 = vector.extract_strided_slice %0 {offsets = [0, 0, 0], sizes = [1, 4, 64], strides = [1, 1, 1]} : vector<9x4x64xbf16> to vector<1x4x64xbf16>
      %175 = vector.shape_cast %174 : vector<1x4x64xbf16> to vector<4x64xbf16>
      %cst_57 = arith.constant dense<0.000000e+00> : vector<30x64xf32>
      %176 = tpu.matmul %173, %175, %cst_57 {dimension_numbers = #tpu.dot_dimension_numbers<[1], [0], [0], [1], [0, 0, 1, 1], [], []>} : vector<30x4xbf16>, vector<4x64xbf16>, vector<30x64xf32> -> vector<30x64xf32>
      %177 = vector.extract_strided_slice %22 {offsets = [1, 0], sizes = [30, 4], strides = [1, 1]} : vector<32x4xbf16> to vector<30x4xbf16>
      %178 = vector.extract_strided_slice %0 {offsets = [1, 0, 0], sizes = [1, 4, 64], strides = [1, 1, 1]} : vector<9x4x64xbf16> to vector<1x4x64xbf16>
      %179 = vector.shape_cast %178 : vector<1x4x64xbf16> to vector<4x64xbf16>
      %cst_58 = arith.constant dense<0.000000e+00> : vector<30x64xf32>
      %180 = tpu.matmul %177, %179, %cst_58 {dimension_numbers = #tpu.dot_dimension_numbers<[1], [0], [0], [1], [0, 0, 1, 1], [], []>} : vector<30x4xbf16>, vector<4x64xbf16>, vector<30x64xf32> -> vector<30x64xf32>
      %181 = arith.addf %176, %180 : vector<30x64xf32>
      %182 = vector.extract_strided_slice %22 {offsets = [2, 0], sizes = [30, 4], strides = [1, 1]} : vector<32x4xbf16> to vector<30x4xbf16>
      %183 = vector.extract_strided_slice %0 {offsets = [2, 0, 0], sizes = [1, 4, 64], strides = [1, 1, 1]} : vector<9x4x64xbf16> to vector<1x4x64xbf16>
      %184 = vector.shape_cast %183 : vector<1x4x64xbf16> to vector<4x64xbf16>
      %cst_59 = arith.constant dense<0.000000e+00> : vector<30x64xf32>
      %185 = tpu.matmul %182, %184, %cst_59 {dimension_numbers = #tpu.dot_dimension_numbers<[1], [0], [0], [1], [0, 0, 1, 1], [], []>} : vector<30x4xbf16>, vector<4x64xbf16>, vector<30x64xf32> -> vector<30x64xf32>
      %186 = arith.addf %181, %185 : vector<30x64xf32>
      %187 = vector.extract_strided_slice %27 {offsets = [0, 0], sizes = [30, 4], strides = [1, 1]} : vector<32x4xbf16> to vector<30x4xbf16>
      %188 = vector.extract_strided_slice %0 {offsets = [3, 0, 0], sizes = [1, 4, 64], strides = [1, 1, 1]} : vector<9x4x64xbf16> to vector<1x4x64xbf16>
      %189 = vector.shape_cast %188 : vector<1x4x64xbf16> to vector<4x64xbf16>
      %cst_60 = arith.constant dense<0.000000e+00> : vector<30x64xf32>
      %190 = tpu.matmul %187, %189, %cst_60 {dimension_numbers = #tpu.dot_dimension_numbers<[1], [0], [0], [1], [0, 0, 1, 1], [], []>} : vector<30x4xbf16>, vector<4x64xbf16>, vector<30x64xf32> -> vector<30x64xf32>
      %191 = arith.addf %186, %190 : vector<30x64xf32>
      %192 = vector.extract_strided_slice %27 {offsets = [1, 0], sizes = [30, 4], strides = [1, 1]} : vector<32x4xbf16> to vector<30x4xbf16>
      %193 = vector.extract_strided_slice %0 {offsets = [4, 0, 0], sizes = [1, 4, 64], strides = [1, 1, 1]} : vector<9x4x64xbf16> to vector<1x4x64xbf16>
      %194 = vector.shape_cast %193 : vector<1x4x64xbf16> to vector<4x64xbf16>
      %cst_61 = arith.constant dense<0.000000e+00> : vector<30x64xf32>
      %195 = tpu.matmul %192, %194, %cst_61 {dimension_numbers = #tpu.dot_dimension_numbers<[1], [0], [0], [1], [0, 0, 1, 1], [], []>} : vector<30x4xbf16>, vector<4x64xbf16>, vector<30x64xf32> -> vector<30x64xf32>
      %196 = arith.addf %191, %195 : vector<30x64xf32>
      %197 = vector.extract_strided_slice %27 {offsets = [2, 0], sizes = [30, 4], strides = [1, 1]} : vector<32x4xbf16> to vector<30x4xbf16>
      %198 = vector.extract_strided_slice %0 {offsets = [5, 0, 0], sizes = [1, 4, 64], strides = [1, 1, 1]} : vector<9x4x64xbf16> to vector<1x4x64xbf16>
      %199 = vector.shape_cast %198 : vector<1x4x64xbf16> to vector<4x64xbf16>
      %cst_62 = arith.constant dense<0.000000e+00> : vector<30x64xf32>
      %200 = tpu.matmul %197, %199, %cst_62 {dimension_numbers = #tpu.dot_dimension_numbers<[1], [0], [0], [1], [0, 0, 1, 1], [], []>} : vector<30x4xbf16>, vector<4x64xbf16>, vector<30x64xf32> -> vector<30x64xf32>
      %201 = arith.addf %196, %200 : vector<30x64xf32>
      %202 = vector.extract_strided_slice %32 {offsets = [0, 0], sizes = [30, 4], strides = [1, 1]} : vector<32x4xbf16> to vector<30x4xbf16>
      %203 = vector.extract_strided_slice %0 {offsets = [6, 0, 0], sizes = [1, 4, 64], strides = [1, 1, 1]} : vector<9x4x64xbf16> to vector<1x4x64xbf16>
      %204 = vector.shape_cast %203 : vector<1x4x64xbf16> to vector<4x64xbf16>
      %cst_63 = arith.constant dense<0.000000e+00> : vector<30x64xf32>
      %205 = tpu.matmul %202, %204, %cst_63 {dimension_numbers = #tpu.dot_dimension_numbers<[1], [0], [0], [1], [0, 0, 1, 1], [], []>} : vector<30x4xbf16>, vector<4x64xbf16>, vector<30x64xf32> -> vector<30x64xf32>
      %206 = arith.addf %201, %205 : vector<30x64xf32>
      %207 = vector.extract_strided_slice %32 {offsets = [1, 0], sizes = [30, 4], strides = [1, 1]} : vector<32x4xbf16> to vector<30x4xbf16>
      %208 = vector.extract_strided_slice %0 {offsets = [7, 0, 0], sizes = [1, 4, 64], strides = [1, 1, 1]} : vector<9x4x64xbf16> to vector<1x4x64xbf16>
      %209 = vector.shape_cast %208 : vector<1x4x64xbf16> to vector<4x64xbf16>
      %cst_64 = arith.constant dense<0.000000e+00> : vector<30x64xf32>
      %210 = tpu.matmul %207, %209, %cst_64 {dimension_numbers = #tpu.dot_dimension_numbers<[1], [0], [0], [1], [0, 0, 1, 1], [], []>} : vector<30x4xbf16>, vector<4x64xbf16>, vector<30x64xf32> -> vector<30x64xf32>
      %211 = arith.addf %206, %210 : vector<30x64xf32>
      %212 = vector.extract_strided_slice %32 {offsets = [2, 0], sizes = [30, 4], strides = [1, 1]} : vector<32x4xbf16> to vector<30x4xbf16>
      %213 = vector.extract_strided_slice %0 {offsets = [8, 0, 0], sizes = [1, 4, 64], strides = [1, 1, 1]} : vector<9x4x64xbf16> to vector<1x4x64xbf16>
      %214 = vector.shape_cast %213 : vector<1x4x64xbf16> to vector<4x64xbf16>
      %cst_65 = arith.constant dense<0.000000e+00> : vector<30x64xf32>
      %215 = tpu.matmul %212, %214, %cst_65 {dimension_numbers = #tpu.dot_dimension_numbers<[1], [0], [0], [1], [0, 0, 1, 1], [], []>} : vector<30x4xbf16>, vector<4x64xbf16>, vector<30x64xf32> -> vector<30x64xf32>
      %216 = arith.addf %211, %215 : vector<30x64xf32>
      %217 = vector.broadcast %1 : vector<1x64xf32> to vector<30x64xf32>
      %218 = arith.addf %216, %217 : vector<30x64xf32>
      %219 = arith.maximumf %172, %218 : vector<30x64xf32>
      %cst_66 = arith.constant 0.000000e+00 : f32
      %220 = vector.broadcast %cst_66 : f32 to vector<30x64xf32>
      %221 = arith.maximumf %219, %220 : vector<30x64xf32>
      %222 = vector.extract_strided_slice %221 {offsets = [0, 0], sizes = [4, 64], strides = [1, 1]} : vector<30x64xf32> to vector<4x64xf32>
      %cst_67 = arith.constant dense<0xFF800000> : vector<64xf32>
      %223 = vector.multi_reduction <maximumf>, %222, %cst_67 [0] : vector<4x64xf32> to vector<64xf32>
      %224 = vector.shape_cast %223 : vector<64xf32> to vector<1x64xf32>
      %225 = vector.extract_strided_slice %221 {offsets = [4, 0], sizes = [4, 64], strides = [1, 1]} : vector<30x64xf32> to vector<4x64xf32>
      %cst_68 = arith.constant dense<0xFF800000> : vector<64xf32>
      %226 = vector.multi_reduction <maximumf>, %225, %cst_68 [0] : vector<4x64xf32> to vector<64xf32>
      %227 = vector.shape_cast %226 : vector<64xf32> to vector<1x64xf32>
      %228 = vector.extract_strided_slice %221 {offsets = [8, 0], sizes = [4, 64], strides = [1, 1]} : vector<30x64xf32> to vector<4x64xf32>
      %cst_69 = arith.constant dense<0xFF800000> : vector<64xf32>
      %229 = vector.multi_reduction <maximumf>, %228, %cst_69 [0] : vector<4x64xf32> to vector<64xf32>
      %230 = vector.shape_cast %229 : vector<64xf32> to vector<1x64xf32>
      %231 = vector.extract_strided_slice %221 {offsets = [12, 0], sizes = [4, 64], strides = [1, 1]} : vector<30x64xf32> to vector<4x64xf32>
      %cst_70 = arith.constant dense<0xFF800000> : vector<64xf32>
      %232 = vector.multi_reduction <maximumf>, %231, %cst_70 [0] : vector<4x64xf32> to vector<64xf32>
      %233 = vector.shape_cast %232 : vector<64xf32> to vector<1x64xf32>
      %234 = vector.extract_strided_slice %221 {offsets = [16, 0], sizes = [4, 64], strides = [1, 1]} : vector<30x64xf32> to vector<4x64xf32>
      %cst_71 = arith.constant dense<0xFF800000> : vector<64xf32>
      %235 = vector.multi_reduction <maximumf>, %234, %cst_71 [0] : vector<4x64xf32> to vector<64xf32>
      %236 = vector.shape_cast %235 : vector<64xf32> to vector<1x64xf32>
      %237 = vector.extract_strided_slice %221 {offsets = [20, 0], sizes = [4, 64], strides = [1, 1]} : vector<30x64xf32> to vector<4x64xf32>
      %cst_72 = arith.constant dense<0xFF800000> : vector<64xf32>
      %238 = vector.multi_reduction <maximumf>, %237, %cst_72 [0] : vector<4x64xf32> to vector<64xf32>
      %239 = vector.shape_cast %238 : vector<64xf32> to vector<1x64xf32>
      %240 = vector.extract_strided_slice %221 {offsets = [24, 0], sizes = [4, 64], strides = [1, 1]} : vector<30x64xf32> to vector<4x64xf32>
      %cst_73 = arith.constant dense<0xFF800000> : vector<64xf32>
      %241 = vector.multi_reduction <maximumf>, %240, %cst_73 [0] : vector<4x64xf32> to vector<64xf32>
      %242 = vector.shape_cast %241 : vector<64xf32> to vector<1x64xf32>
      %243 = tpu.concatenate %224, %227, %230, %233, %236, %239, %242 in 0 : vector<1x64xf32>, vector<1x64xf32>, vector<1x64xf32>, vector<1x64xf32>, vector<1x64xf32>, vector<1x64xf32>, vector<1x64xf32> -> vector<7x64xf32>
      %244 = arith.truncf %243 : vector<7x64xf32> to vector<7x64xbf16>
      %c0_74 = arith.constant 0 : index
      %245 = arith.index_cast %arg5 : i32 to index
      %c0_75 = arith.constant 0 : index
      %c0_76 = arith.constant 0 : index
      %246 = vector.load %arg4[%c0_74, %245, %c0_75, %c0_76] : memref<1x7x7x64xbf16, #tpu.memory_space<vmem>>, vector<1x1x7x64xbf16>
      %247 = vector.shape_cast %246 : vector<1x1x7x64xbf16> to vector<7x64xbf16>
      %248 = vector.shape_cast %244 : vector<7x64xbf16> to vector<1x1x7x64xbf16>
      tpu.vector_store %arg4[%c0_74, %245, %c0_75, %c0_76], %248 {strides = array<i32>} : memref<1x7x7x64xbf16, #tpu.memory_space<vmem>>, vector<1x1x7x64xbf16>,
    }
    %c7_i32_4 = arith.constant 7 : i32
    return
  }
  func.func @transform_0(%arg0: i32) -> (i32, i32, i32, i32) {
    %c0_i32 = arith.constant 0 : i32
    %c0_i32_0 = arith.constant 0 : i32
    %c0_i32_1 = arith.constant 0 : i32
    %c0_i32_2 = arith.constant 0 : i32
    return %arg0, %c0_i32, %c0_i32_0, %c0_i32_1 : i32, i32, i32, i32
  }
  func.func @transform_1(%arg0: i32) -> (i32, i32, i32) {
    %c0_i32 = arith.constant 0 : i32
    %c0_i32_0 = arith.constant 0 : i32
    %c0_i32_1 = arith.constant 0 : i32
    %c0_i32_2 = arith.constant 0 : i32
    return %c0_i32, %c0_i32_0, %c0_i32_1 : i32, i32, i32
  }
  func.func @transform_2(%arg0: i32) -> (i32, i32) {
    %c0_i32 = arith.constant 0 : i32
    %c0_i32_0 = arith.constant 0 : i32
    %c0_i32_1 = arith.constant 0 : i32
    return %c0_i32, %c0_i32_0 : i32, i32
  }
  func.func @transform_3(%arg0: i32) -> (i32, i32, i32, i32) {
    %c0_i32 = arith.constant 0 : i32
    %c0_i32_0 = arith.constant 0 : i32
    %c0_i32_1 = arith.constant 0 : i32
    %c0_i32_2 = arith.constant 0 : i32
    return %arg0, %c0_i32, %c0_i32_0, %c0_i32_1 : i32, i32, i32, i32
  }
}

module attributes {stable_mosaic.version = 11 : i64} {
  func.func @_head_dueling_kernel(%arg0: i32, %arg1: memref<2x64xbf16, #tpu.memory_space<vmem>>, %arg2: memref<64x32xbf16, #tpu.memory_space<vmem>>, %arg3: memref<1x32xf32, #tpu.memory_space<vmem>>, %arg4: memref<32x768xbf16, #tpu.memory_space<vmem>>, %arg5: memref<1x768xf32, #tpu.memory_space<vmem>>, %arg6: memref<2x512xf32, #tpu.memory_space<vmem>>) attributes {dimension_semantics = [#tpu.dimension_semantics<parallel>], iteration_bounds = array<i64: 1>, scalar_prefetch = 0 : i64, scratch_operands = 0 : i64, tpu.core_type = #tpu.core_type<tc>, window_params = [{transform_indices = @transform_0, window_bounds = array<i64: 2, 64>}, {pipeline_mode = #tpu.pipeline_mode<synchronous>, transform_indices = @transform_1, window_bounds = array<i64: 64, 32>}, {pipeline_mode = #tpu.pipeline_mode<synchronous>, transform_indices = @transform_2, window_bounds = array<i64: 1, 32>}, {pipeline_mode = #tpu.pipeline_mode<synchronous>, transform_indices = @transform_3, window_bounds = array<i64: 32, 768>}, {pipeline_mode = #tpu.pipeline_mode<synchronous>, transform_indices = @transform_4, window_bounds = array<i64: 1, 768>}, {transform_indices = @transform_5, window_bounds = array<i64: 2, 512>}]} {
    %c0 = arith.constant 0 : index
    %c0_0 = arith.constant 0 : index
    %0 = vector.load %arg1[%c0, %c0_0] : memref<2x64xbf16, #tpu.memory_space<vmem>>, vector<2x64xbf16>
    %c0_1 = arith.constant 0 : index
    %c0_2 = arith.constant 0 : index
    %1 = vector.load %arg2[%c0_1, %c0_2] : memref<64x32xbf16, #tpu.memory_space<vmem>>, vector<64x32xbf16>
    %cst = arith.constant dense<0.000000e+00> : vector<2x32xf32>
    %2 = tpu.matmul %0, %1, %cst {dimension_numbers = #tpu.dot_dimension_numbers<[1], [0], [0], [1], [0, 0, 1, 1], [], []>} : vector<2x64xbf16>, vector<64x32xbf16>, vector<2x32xf32> -> vector<2x32xf32>
    %c0_3 = arith.constant 0 : index
    %c0_4 = arith.constant 0 : index
    %3 = vector.load %arg3[%c0_3, %c0_4] : memref<1x32xf32, #tpu.memory_space<vmem>>, vector<1x32xf32>
    %4 = vector.broadcast %3 : vector<1x32xf32> to vector<2x32xf32>
    %5 = arith.addf %2, %4 : vector<2x32xf32>
    %cst_5 = arith.constant 0.000000e+00 : f32
    %6 = vector.broadcast %cst_5 : f32 to vector<2x32xf32>
    %7 = arith.maximumf %5, %6 : vector<2x32xf32>
    %8 = arith.truncf %7 : vector<2x32xf32> to vector<2x32xbf16>
    %c0_6 = arith.constant 0 : index
    %c0_7 = arith.constant 0 : index
    %9 = vector.load %arg4[%c0_6, %c0_7] : memref<32x768xbf16, #tpu.memory_space<vmem>>, vector<32x768xbf16>
    %cst_8 = arith.constant dense<0.000000e+00> : vector<2x768xf32>
    %10 = tpu.matmul %8, %9, %cst_8 {dimension_numbers = #tpu.dot_dimension_numbers<[1], [0], [0], [1], [0, 0, 1, 1], [], []>} : vector<2x32xbf16>, vector<32x768xbf16>, vector<2x768xf32> -> vector<2x768xf32>
    %c0_9 = arith.constant 0 : index
    %c0_10 = arith.constant 0 : index
    %11 = vector.load %arg5[%c0_9, %c0_10] : memref<1x768xf32, #tpu.memory_space<vmem>>, vector<1x768xf32>
    %12 = vector.broadcast %11 : vector<1x768xf32> to vector<2x768xf32>
    %13 = arith.addf %10, %12 : vector<2x768xf32>
    %14 = vector.extract_strided_slice %13 {offsets = [0, 0], sizes = [2, 128], strides = [1, 1]} : vector<2x768xf32> to vector<2x128xf32>
    %15 = vector.extract_strided_slice %13 {offsets = [0, 128], sizes = [2, 128], strides = [1, 1]} : vector<2x768xf32> to vector<2x128xf32>
    %16 = vector.extract_strided_slice %13 {offsets = [0, 256], sizes = [2, 128], strides = [1, 1]} : vector<2x768xf32> to vector<2x128xf32>
    %17 = arith.addf %14, %16 : vector<2x128xf32>
    %18 = arith.subf %17, %15 : vector<2x128xf32>
    %cst_11 = arith.constant dense<0xFF800000> : vector<2xf32>
    %19 = vector.multi_reduction <maximumf>, %18, %cst_11 [1] : vector<2x128xf32> to vector<2xf32>
    %20 = vector.shape_cast %19 : vector<2xf32> to vector<2x1xf32>
    %21 = vector.broadcast %20 : vector<2x1xf32> to vector<2x128xf32>
    %22 = arith.subf %18, %21 : vector<2x128xf32>
    %23 = math.exp %22 : vector<2x128xf32>
    %cst_12 = arith.constant dense<0.000000e+00> : vector<2xf32>
    %24 = vector.multi_reduction <add>, %23, %cst_12 [1] : vector<2x128xf32> to vector<2xf32>
    %25 = vector.shape_cast %24 : vector<2xf32> to vector<2x1xf32>
    %26 = tpu.reciprocal %25 {approx = true} : vector<2x1xf32> -> vector<2x1xf32>
    %27 = arith.mulf %25, %26 : vector<2x1xf32>
    %cst_13 = arith.constant 2.000000e+00 : f32
    %28 = vector.broadcast %cst_13 : f32 to vector<2x1xf32>
    %29 = arith.subf %28, %27 : vector<2x1xf32>
    %30 = arith.mulf %26, %29 : vector<2x1xf32>
    %31 = vector.broadcast %30 : vector<2x1xf32> to vector<2x128xf32>
    %32 = arith.mulf %23, %31 : vector<2x128xf32>
    %c0_14 = arith.constant 0 : index
    %c0_15 = arith.constant 0 : index
    %33 = vector.load %arg6[%c0_14, %c0_15] : memref<2x512xf32, #tpu.memory_space<vmem>>, vector<2x128xf32>
    tpu.vector_store %arg6[%c0_14, %c0_15], %32 {strides = array<i32>} : memref<2x512xf32, #tpu.memory_space<vmem>>, vector<2x128xf32>,
    %34 = vector.extract_strided_slice %13 {offsets = [0, 384], sizes = [2, 128], strides = [1, 1]} : vector<2x768xf32> to vector<2x128xf32>
    %35 = arith.addf %14, %34 : vector<2x128xf32>
    %36 = arith.subf %35, %15 : vector<2x128xf32>
    %cst_16 = arith.constant dense<0xFF800000> : vector<2xf32>
    %37 = vector.multi_reduction <maximumf>, %36, %cst_16 [1] : vector<2x128xf32> to vector<2xf32>
    %38 = vector.shape_cast %37 : vector<2xf32> to vector<2x1xf32>
    %39 = vector.broadcast %38 : vector<2x1xf32> to vector<2x128xf32>
    %40 = arith.subf %36, %39 : vector<2x128xf32>
    %41 = math.exp %40 : vector<2x128xf32>
    %cst_17 = arith.constant dense<0.000000e+00> : vector<2xf32>
    %42 = vector.multi_reduction <add>, %41, %cst_17 [1] : vector<2x128xf32> to vector<2xf32>
    %43 = vector.shape_cast %42 : vector<2xf32> to vector<2x1xf32>
    %44 = tpu.reciprocal %43 {approx = true} : vector<2x1xf32> -> vector<2x1xf32>
    %45 = arith.mulf %43, %44 : vector<2x1xf32>
    %cst_18 = arith.constant 2.000000e+00 : f32
    %46 = vector.broadcast %cst_18 : f32 to vector<2x1xf32>
    %47 = arith.subf %46, %45 : vector<2x1xf32>
    %48 = arith.mulf %44, %47 : vector<2x1xf32>
    %49 = vector.broadcast %48 : vector<2x1xf32> to vector<2x128xf32>
    %50 = arith.mulf %41, %49 : vector<2x128xf32>
    %c0_19 = arith.constant 0 : index
    %c128 = arith.constant 128 : index
    %51 = vector.load %arg6[%c0_19, %c128] : memref<2x512xf32, #tpu.memory_space<vmem>>, vector<2x128xf32>
    tpu.vector_store %arg6[%c0_19, %c128], %50 {strides = array<i32>} : memref<2x512xf32, #tpu.memory_space<vmem>>, vector<2x128xf32>,
    %52 = vector.extract_strided_slice %13 {offsets = [0, 512], sizes = [2, 128], strides = [1, 1]} : vector<2x768xf32> to vector<2x128xf32>
    %53 = arith.addf %14, %52 : vector<2x128xf32>
    %54 = arith.subf %53, %15 : vector<2x128xf32>
    %cst_20 = arith.constant dense<0xFF800000> : vector<2xf32>
    %55 = vector.multi_reduction <maximumf>, %54, %cst_20 [1] : vector<2x128xf32> to vector<2xf32>
    %56 = vector.shape_cast %55 : vector<2xf32> to vector<2x1xf32>
    %57 = vector.broadcast %56 : vector<2x1xf32> to vector<2x128xf32>
    %58 = arith.subf %54, %57 : vector<2x128xf32>
    %59 = math.exp %58 : vector<2x128xf32>
    %cst_21 = arith.constant dense<0.000000e+00> : vector<2xf32>
    %60 = vector.multi_reduction <add>, %59, %cst_21 [1] : vector<2x128xf32> to vector<2xf32>
    %61 = vector.shape_cast %60 : vector<2xf32> to vector<2x1xf32>
    %62 = tpu.reciprocal %61 {approx = true} : vector<2x1xf32> -> vector<2x1xf32>
    %63 = arith.mulf %61, %62 : vector<2x1xf32>
    %cst_22 = arith.constant 2.000000e+00 : f32
    %64 = vector.broadcast %cst_22 : f32 to vector<2x1xf32>
    %65 = arith.subf %64, %63 : vector<2x1xf32>
    %66 = arith.mulf %62, %65 : vector<2x1xf32>
    %67 = vector.broadcast %66 : vector<2x1xf32> to vector<2x128xf32>
    %68 = arith.mulf %59, %67 : vector<2x128xf32>
    %c0_23 = arith.constant 0 : index
    %c256 = arith.constant 256 : index
    %69 = vector.load %arg6[%c0_23, %c256] : memref<2x512xf32, #tpu.memory_space<vmem>>, vector<2x128xf32>
    tpu.vector_store %arg6[%c0_23, %c256], %68 {strides = array<i32>} : memref<2x512xf32, #tpu.memory_space<vmem>>, vector<2x128xf32>,
    %70 = vector.extract_strided_slice %13 {offsets = [0, 640], sizes = [2, 128], strides = [1, 1]} : vector<2x768xf32> to vector<2x128xf32>
    %71 = arith.addf %14, %70 : vector<2x128xf32>
    %72 = arith.subf %71, %15 : vector<2x128xf32>
    %cst_24 = arith.constant dense<0xFF800000> : vector<2xf32>
    %73 = vector.multi_reduction <maximumf>, %72, %cst_24 [1] : vector<2x128xf32> to vector<2xf32>
    %74 = vector.shape_cast %73 : vector<2xf32> to vector<2x1xf32>
    %75 = vector.broadcast %74 : vector<2x1xf32> to vector<2x128xf32>
    %76 = arith.subf %72, %75 : vector<2x128xf32>
    %77 = math.exp %76 : vector<2x128xf32>
    %cst_25 = arith.constant dense<0.000000e+00> : vector<2xf32>
    %78 = vector.multi_reduction <add>, %77, %cst_25 [1] : vector<2x128xf32> to vector<2xf32>
    %79 = vector.shape_cast %78 : vector<2xf32> to vector<2x1xf32>
    %80 = tpu.reciprocal %79 {approx = true} : vector<2x1xf32> -> vector<2x1xf32>
    %81 = arith.mulf %79, %80 : vector<2x1xf32>
    %cst_26 = arith.constant 2.000000e+00 : f32
    %82 = vector.broadcast %cst_26 : f32 to vector<2x1xf32>
    %83 = arith.subf %82, %81 : vector<2x1xf32>
    %84 = arith.mulf %80, %83 : vector<2x1xf32>
    %85 = vector.broadcast %84 : vector<2x1xf32> to vector<2x128xf32>
    %86 = arith.mulf %77, %85 : vector<2x128xf32>
    %c0_27 = arith.constant 0 : index
    %c384 = arith.constant 384 : index
    %87 = vector.load %arg6[%c0_27, %c384] : memref<2x512xf32, #tpu.memory_space<vmem>>, vector<2x128xf32>
    tpu.vector_store %arg6[%c0_27, %c384], %86 {strides = array<i32>} : memref<2x512xf32, #tpu.memory_space<vmem>>, vector<2x128xf32>,
    return
  }
  func.func @transform_0(%arg0: i32) -> (i32, i32) {
    %c0_i32 = arith.constant 0 : i32
    %c0_i32_0 = arith.constant 0 : i32
    return %arg0, %c0_i32 : i32, i32
  }
  func.func @transform_1(%arg0: i32) -> (i32, i32) {
    %c0_i32 = arith.constant 0 : i32
    %c0_i32_0 = arith.constant 0 : i32
    %c0_i32_1 = arith.constant 0 : i32
    return %c0_i32, %c0_i32_0 : i32, i32
  }
  func.func @transform_2(%arg0: i32) -> (i32, i32) {
    %c0_i32 = arith.constant 0 : i32
    %c0_i32_0 = arith.constant 0 : i32
    %c0_i32_1 = arith.constant 0 : i32
    return %c0_i32, %c0_i32_0 : i32, i32
  }
  func.func @transform_3(%arg0: i32) -> (i32, i32) {
    %c0_i32 = arith.constant 0 : i32
    %c0_i32_0 = arith.constant 0 : i32
    %c0_i32_1 = arith.constant 0 : i32
    return %c0_i32, %c0_i32_0 : i32, i32
  }
  func.func @transform_4(%arg0: i32) -> (i32, i32) {
    %c0_i32 = arith.constant 0 : i32
    %c0_i32_0 = arith.constant 0 : i32
    %c0_i32_1 = arith.constant 0 : i32
    return %c0_i32, %c0_i32_0 : i32, i32
  }
  func.func @transform_5(%arg0: i32) -> (i32, i32) {
    %c0_i32 = arith.constant 0 : i32
    %c0_i32_0 = arith.constant 0 : i32
    return %arg0, %c0_i32 : i32, i32
  }
}

</mosaic_0001>

<bundles_post_ra>
// kernel: dqn_forward.4
= control target key start
LH: loop header
LB: loop body
LE: loop exit
PB: predicated region body
PF: predicated region fallthrough
CT: control target
= control target key end

     0   :  { %s2920_s12 = smov 0   ;;  %s3609_s0 = inlined_call_operand.vmem [shape: bf16[2,7,7,64], index: 0, kind: input, shape index: {}]   ;;  %s3610_s1 = inlined_call_operand.vmem [shape: bf16[9,64,64], index: 1, kind: input, shape index: {}]   ;;  %s3611_s2 = inlined_call_operand.vmem [shape: f32[1,64], index: 2, kind: input, shape index: {}]   ;;  %s3612_s3 = inlined_call_operand.vmem [shape: bf16[2,1,1,64], index: 3, kind: output, shape index: {}]  }
   0x1 LB: > { %s2133_s13 = sadd.s32 4294967295, %s2896_s12   ;;  %p2137_p0 = scmp.ge.s32.totalorder %s2896_s12, 1  ;;  %s2896_s12 = sphi %s2920_s12, %s13_s12  }
   0x2   : > { %p137_p1 = scmp.lt.s32.totalorder %s2896_s12, 3 }
   0x4   : > { %p138_p2 = pnand %p2137_p0, %p137_p1 }
   0x5   : > { %p159_p3 = scmp.lt.s32.totalorder (!%p138_p2), %s2133_s13, 1 }
   0x6   : > { %141 = sbr.rel (%p138_p2) target bundleno = 520 (0x208), region = 32 }
   0xb   : > { %v2931_v0 = vld [vmem:[%s3610_s1 + $0x38] sm:$0xff]   ;;  %v2898_v1 = vmov 0.0   ;;  %v2944_v3 = vld [vmem:[%s3610_s1 + $0x30] sm:$0xff]   ;;  %vm2899_vm0 = vmmov 0   ;;  %s3614_s13 = smov (!%p159_p3, %s2133_s13), 1  ;;  %v2964_v5 = vld [vmem:[%s3610_s1 + $0x28] sm:$0xff]  }
   0xc   : > { %2405 = vmatprep.subr.bf16.mxu0 %v2898_v1  ;;  %2417 = vmatprep.subr.bf16.mxu1 %v2898_v1  ;;  %v2938_v2 = vld [vmem:[%s3610_s1 + $0x18] sm:$0xff]   ;;  %v2953_v4 = vld [vmem:[%s3610_s1 + $0x10] sm:$0xff]   ;;  %s2837_s24 = smul.u32 28, %s3614_s13  ;;  %v2972_v6 = vld [vmem:[%s3610_s1 + $0x8] sm:$0xff]   ;;  %vm286_vm1 = vcmask 523264   ;;  %vm2071_vm2 = vcmask 519168   ;;  %s166_s20 = scalar_lea.vmem %s3612_s3, %s3614_s13 }
   0xd   : > { %2406 = vmatpush3.bf16.msra.mxu0 %v2931_v0  ;;  %2413 = vmatprep.mubr.msk.bf16.mxu0 %vm2899_vm0, %v2898_v1  ;;  %v2985_v8 = vld [vmem:[%s3610_s1 + $0x20] sm:$0xff]   ;;  %v2999_v14 = vld [vmem:[%s3610_s1 + $0x58] sm:$0xff]   ;;  %v3016_v17 = vld [vmem:[%s3610_s1 + $0x50] sm:$0xff]   ;;  %vm2080_vm3 = vcmask 516096   ;;  %vm2081_vm4 = vsmask.f32 256 }
   0xe   : > { %2418 = vmatpush3.bf16.msra.mxu1 %v2938_v2  ;;  %2407 = vmatprep.subr.bf16.mxu0 %v2898_v1  ;;  %s2978_s29 = scalar_lea.vmem %s3609_s0, %s2837_s24  ;;  %v2992_v10 = vld [vmem:[%s3610_s1] sm:$0xff]   ;;  %v3006_v15 = vld [vmem:[%s3610_s1 + $0x78] sm:$0xff]   ;;  %v3021_v18 = vld [vmem:[%s3610_s1 + $0x70] sm:$0xff]  }
   0xf   : > { %2419 = vmatprep.subr.bf16.mxu1 %v2898_v1  ;;  %2425 = vmatprep.mubr.msk.bf16.mxu1 %vm2899_vm0, %v2898_v1  ;;  %v241_v7 = vld [vmem:[%s2978_s29] sm:$0xf]  ;;  %v3032_v19 = vld [vmem:[%s3610_s1 + $0x48] sm:$0xff]   ;;  %v3058_v23 = vld [vmem:[%s2978_s29 + $0x4] sm:$0xf] }
  0x10   : > { %v2144_v9 = vcombine.low %v241_v7, %v241_v7  ;;  %v3039_v20 = vld [vmem:[%s3610_s1 + $0x68] sm:$0xff]   ;;  %v3046_v21 = vld [vmem:[%s3610_s1 + $0x40] sm:$0xff]   ;;  %v3063_v25 = vld [vmem:[%s3610_s1 + $0x98] sm:$0xff]   ;;  %v3079_v27 = vcombine.low %v3058_v23, %v3058_v23 }
  0x11   : > { %2408 = vmatpush3.bf16.msra.mxu0 %v2944_v3  ;;  %v3053_v22 = vld [vmem:[%s3610_s1 + $0x60] sm:$0xff]   ;;  %v3070_v26 = vld [vmem:[%s3610_s1 + $0xb8] sm:$0xff]   ;;  %v3084_v28 = vld [vmem:[%s3610_s1 + $0x90] sm:$0xff]  }
  0x12   : > { %2420 = vmatpush3.bf16.msra.mxu1 %v2953_v4  ;;  %2409 = vmatprep.subr.bf16.mxu0 %v2898_v1  ;;  %v256_v11 = vshrl.u32 %v2144_v9, 16  ;;  %v258_v12 = vshll.u32 %v2144_v9, 16  ;;  %v397_v24 = vrot.slane %v2144_v9, 1  ;;  %v3091_v29 = vld [vmem:[%s3610_s1 + $0xb0] sm:$0xff]   ;;  %v540_v30 = vshll.u32 %v3079_v27, 16  ;;  %v3105_v31 = vld [vmem:[%s3610_s1 + $0x88] sm:$0xff]   ;;  %vm2082_vm5 = vmand %vm2080_vm3, %vm2081_vm4 }
  0x13   : > { %2421 = vmatprep.subr.bf16.mxu1 %v2898_v1  ;;  %v3110_v32 = vld [vmem:[%s3610_s1 + $0xa8] sm:$0xff]   ;;  %v538_v33 = vshrl.u32 %v3079_v27, 16  ;;  %v3120_v35 = vld [vmem:[%s3610_s1 + $0x80] sm:$0xff]   ;;  %v612_v38 = vrot.slane %v3079_v27, 1  ;;  %v3137_v39 = vld [vmem:[%s3610_s1 + $0xd8] sm:$0xff]  }
  0x14   : > { %v260_v13 = vrot.slane %v258_v12, 1  ;;  %v542_v34 = vrot.slane %v540_v30, 1  ;;  %v3125_v36 = vld [vmem:[%s3610_s1 + $0xa0] sm:$0xff]   ;;  %v3142_v40 = vld [vmem:[%s3610_s1 + $0xf8] sm:$0xff]   ;;  %v3145_v41 = vld [vmem:[%s2978_s29 + $0x8] sm:$0xf] }
  0x15   : > { %2410 = vmatpush3.bf16.msra.mxu0 %v2964_v5  ;;  %v2181_v42 = vcombine.low %v3145_v41, %v3145_v41  ;;  %v3161_v43 = vld [vmem:[%s3610_s1 + $0xd0] sm:$0xff]   ;;  %v3179_v46 = vld [vmem:[%s3610_s1 + $0xc8] sm:$0xff]   ;;  %v3193_v50 = vld [vmem:[%s3610_s1 + $0xc0] sm:$0xff]  }
  0x16   : > { %2422 = vmatpush3.bf16.msra.mxu1 %v2972_v6  ;;  %2411 = vmatprep.subr.bf16.mxu0 %v2898_v1  ;;  %v261_v16 = vor.u32 %v260_v13, %v256_v11  ;;  %v3129_v37 = vor.u32 %v542_v34, %v538_v33  ;;  %v3166_v44 = vld [vmem:[%s3610_s1 + $0xf0] sm:$0xff]   ;;  %v3184_v47 = vld [vmem:[%s3610_s1 + $0xe8] sm:$0xff]   ;;  %v3198_v51 = vld [vmem:[%s3610_s1 + $0xe0] sm:$0xff]  }
  0x17   : > { %2423 = vmatprep.subr.bf16.mxu1 %v2898_v1  ;;  %v755_v45 = vshll.u32 %v2181_v42, 16  ;;  %v753_v48 = vshrl.u32 %v2181_v42, 16  ;;  %v3209_v53 = vld [vmem:[%s3610_s1 + $0x118] sm:$0xff]   ;;  %v3222_v54 = vld [vmem:[%s3610_s1 + $0x110] sm:$0xff]   ;;  %v3235_v55 = vld [vmem:[%s3610_s1 + $0x108] sm:$0xff]   ;;  %v3248_v57 = vrot.slane %v2181_v42, 1 }
  0x18   : > { %v3244_v56 = vld [vmem:[%s3610_s1 + $0x100] sm:$0xff]   ;;  %v3326_v58 = vld [vmem:[%s2978_s29 + $0xc] sm:$0xf]  ;;  %v3431_v9 = vld [vmem:[%s2978_s29 + $0x10] sm:$0xf] }
  0x19   : > { %2412 = vmatpush3.bf16.msra.mxu0 %v2985_v8  ;;  %v757_v49 = vrot.slane %v755_v45, 1  ;;  %v2200_v59 = vcombine.low %v3326_v58, %v3326_v58  ;;  %v3441_v11 = vcombine.low %v3431_v9, %v3431_v9 }
  0x1a   : > { %2424 = vmatpush3.bf16.msra.mxu1 %v2992_v10  ;;  %2429 = vmatprep.subr.bf16.mxu0 %v2898_v1 }
  0x1b   : > { %2441 = vmatprep.subr.bf16.mxu1 %v2898_v1  ;;  %v3202_v52 = vor.u32 %v757_v49, %v753_v48  ;;  %v1197_v60 = vshll.u32 %v2200_v59, 16  ;;  %v1195_v61 = vshrl.u32 %v2200_v59, 16  ;;  %v1586_v12 = vshll.u32 %v3441_v11, 16 }
  0x1c   : > { %2414 = vmatmul.mubr.msk.bf16.vlgmr.msra.gmra.mxu0 %vm286_vm1, %v261_v16  ;;  %v1584_v13 = vshrl.u32 %v3441_v11, 16  ;;  %v1634_v42 = vrot.slane %v3441_v11, 1 }
  0x1d   : > { %2426 = vmatmul.mubr.msk.bf16.vlgmr.msra.gmra.mxu1 %vm286_vm1, %v241_v7  ;;  %2430 = vmatpush3.bf16.msra.mxu0 %v2999_v14  ;;  %v1199_v62 = vrot.slane %v1197_v60, 1  ;;  %v3354_v7 = vrot.slane %v2200_v59, 1  ;;  %v1588_v16 = vrot.slane %v1586_v12, 1 }
  0x1e   : > { %2442 = vmatpush3.bf16.msra.mxu1 %v3006_v15  ;;  %2431 = vmatprep.subr.bf16.mxu0 %v2898_v1 }
  0x1f   : > { %2443 = vmatprep.subr.bf16.mxu1 %v2898_v1  ;;  %2437 = vmatprep.mubr.msk.bf16.mxu0 %vm2899_vm0, %v2898_v1  ;;  %v3352_v63 = vor.u32 %v1199_v62, %v1195_v61 }
  0x20   : > { %2449 = vmatprep.mubr.msk.bf16.mxu1 %vm2899_vm0, %v2898_v1 }
  0x21   : > { %2432 = vmatpush3.bf16.msra.mxu0 %v3016_v17 }
  0x22   : > { %2444 = vmatpush3.bf16.msra.mxu1 %v3021_v18  ;;  %2433 = vmatprep.subr.bf16.mxu0 %v2898_v1 }
  0x23   : > { %2445 = vmatprep.subr.bf16.mxu1 %v2898_v1 }
  0x25   : > { %2434 = vmatpush3.bf16.msra.mxu0 %v3032_v19 }
  0x26   : > { %2446 = vmatpush3.bf16.msra.mxu1 %v3039_v20  ;;  %2435 = vmatprep.subr.bf16.mxu0 %v2898_v1 }
  0x27   : > { %2447 = vmatprep.subr.bf16.mxu1 %v2898_v1 }
  0x29   : > { %2436 = vmatpush3.bf16.msra.mxu0 %v3046_v21 }
  0x2a   : > { %2448 = vmatpush3.bf16.msra.mxu1 %v3053_v22  ;;  %2453 = vmatprep.subr.bf16.mxu0 %v2898_v1 }
  0x2b   : > { %2465 = vmatprep.subr.bf16.mxu1 %v2898_v1 }
  0x2c   : > { %2438 = vmatmul.mubr.msk.bf16.vlgmr.msra.gmra.mxu0 %vm286_vm1, %v397_v24 }
  0x2d   : > { %2450 = vmatmul.mubr.msk.bf16.vlgmr.msra.gmra.mxu1 %vm286_vm1, %v3058_v23  ;;  %2454 = vmatpush3.bf16.msra.mxu0 %v3063_v25 }
  0x2e   : > { %2466 = vmatpush3.bf16.msra.mxu1 %v3070_v26  ;;  %2455 = vmatprep.subr.bf16.mxu0 %v2898_v1 }
  0x2f   : > { %2467 = vmatprep.subr.bf16.mxu1 %v2898_v1  ;;  %2461 = vmatprep.mubr.msk.bf16.mxu0 %vm2899_vm0, %v2898_v1 }
  0x30   : > { %2473 = vmatprep.mubr.msk.bf16.mxu1 %vm2899_vm0, %v2898_v1 }
  0x31   : > { %2456 = vmatpush3.bf16.msra.mxu0 %v3084_v28 }
  0x32   : > { %2468 = vmatpush3.bf16.msra.mxu1 %v3091_v29  ;;  %2457 = vmatprep.subr.bf16.mxu0 %v2898_v1 }
  0x33   : > { %2469 = vmatprep.subr.bf16.mxu1 %v2898_v1 }
  0x35   : > { %2458 = vmatpush3.bf16.msra.mxu0 %v3105_v31 }
  0x36   : > { %2470 = vmatpush3.bf16.msra.mxu1 %v3110_v32  ;;  %2459 = vmatprep.subr.bf16.mxu0 %v2898_v1 }
  0x37   : > { %2471 = vmatprep.subr.bf16.mxu1 %v2898_v1 }
  0x39   : > { %2460 = vmatpush3.bf16.msra.mxu0 %v3120_v35 }
  0x3a   : > { %2472 = vmatpush3.bf16.msra.mxu1 %v3125_v36  ;;  %2477 = vmatprep.subr.bf16.mxu0 %v2898_v1 }
  0x3b   : > { %2489 = vmatprep.subr.bf16.mxu1 %v2898_v1 }
  0x3c   : > { %2462 = vmatmul.mubr.msk.bf16.vlgmr.msra.gmra.mxu0 %vm286_vm1, %v3129_v37 }
  0x3d   : > { %2474 = vmatmul.mubr.msk.bf16.vlgmr.msra.gmra.mxu1 %vm286_vm1, %v612_v38  ;;  %2478 = vmatpush3.bf16.msra.mxu0 %v3137_v39 }
  0x3e   : > { %2490 = vmatpush3.bf16.msra.mxu1 %v3142_v40  ;;  %2479 = vmatprep.subr.bf16.mxu0 %v2898_v1 }
  0x3f   : > { %2491 = vmatprep.subr.bf16.mxu1 %v2898_v1  ;;  %2485 = vmatprep.mubr.msk.bf16.mxu0 %vm2899_vm0, %v2898_v1 }
  0x40   : > { %2497 = vmatprep.mubr.msk.bf16.mxu1 %vm2899_vm0, %v2898_v1 }
  0x41   : > { %2480 = vmatpush3.bf16.msra.mxu0 %v3161_v43 }
  0x42   : > { %2492 = vmatpush3.bf16.msra.mxu1 %v3166_v44  ;;  %2481 = vmatprep.subr.bf16.mxu0 %v2898_v1 }
  0x43   : > { %2493 = vmatprep.subr.bf16.mxu1 %v2898_v1 }
  0x45   : > { %2482 = vmatpush3.bf16.msra.mxu0 %v3179_v46 }
  0x46   : > { %2494 = vmatpush3.bf16.msra.mxu1 %v3184_v47  ;;  %2483 = vmatprep.subr.bf16.mxu0 %v2898_v1 }
  0x47   : > { %2495 = vmatprep.subr.bf16.mxu1 %v2898_v1 }
  0x49   : > { %2484 = vmatpush3.bf16.msra.mxu0 %v3193_v50 }
  0x4a   : > { %2496 = vmatpush3.bf16.msra.mxu1 %v3198_v51  ;;  %2501 = vmatprep.subr.bf16.mxu0 %v2898_v1 }
  0x4b   : > { %2513 = vmatprep.subr.bf16.mxu1 %v2898_v1 }
  0x4c   : > { %2486 = vmatmul.mubr.msk.bf16.vlgmr.msra.gmra.mxu0 %vm286_vm1, %v3145_v41 }
  0x4d   : > { %2498 = vmatmul.mubr.msk.bf16.vlgmr.msra.gmra.mxu1 %vm286_vm1, %v3202_v52  ;;  %2502 = vmatpush3.bf16.msra.mxu0 %v3209_v53 }
  0x4e   : > { %2514 = vmatpush3.bf16.msra.mxu1 %v2931_v0  ;;  %2503 = vmatprep.subr.bf16.mxu0 %v2898_v1 }
  0x4f   : > { %2515 = vmatprep.subr.bf16.mxu1 %v2898_v1  ;;  %2509 = vmatprep.mubr.msk.bf16.mxu0 %vm2899_vm0, %v2898_v1 }
  0x50   : > { %2521 = vmatprep.mubr.msk.bf16.mxu1 %vm2899_vm0, %v2898_v1 }
  0x51   : > { %2504 = vmatpush3.bf16.msra.mxu0 %v3222_v54 }
  0x52   : > { %2516 = vmatpush3.bf16.msra.mxu1 %v2944_v3  ;;  %2505 = vmatprep.subr.bf16.mxu0 %v2898_v1 }
  0x53   : > { %2517 = vmatprep.subr.bf16.mxu1 %v2898_v1 }
  0x55   : > { %2506 = vmatpush3.bf16.msra.mxu0 %v3235_v55 }
  0x56   : > { %2518 = vmatpush3.bf16.msra.mxu1 %v2964_v5  ;;  %2507 = vmatprep.subr.bf16.mxu0 %v2898_v1 }
  0x57   : > { %2519 = vmatprep.subr.bf16.mxu1 %v2898_v1 }
  0x59   : > { %2508 = vmatpush3.bf16.msra.mxu0 %v3244_v56 }
  0x5a   : > { %2520 = vmatpush3.bf16.msra.mxu1 %v2985_v8  ;;  %2525 = vmatprep.subr.bf16.mxu0 %v2898_v1 }
  0x5b   : > { %2537 = vmatprep.subr.bf16.mxu1 %v2898_v1 }
  0x5c   : > { %2510 = vmatmul.mubr.msk.bf16.vlgmr.msra.gmra.mxu0 %vm286_vm1, %v3248_v57 }
  0x5d   : > { %2522 = vmatmul.mubr.msk.bf16.vlgmr.msra.gmra.mxu1 %vm286_vm1, %v3129_v37  ;;  %2526 = vmatpush3.bf16.msra.mxu0 %v2938_v2 }
  0x5e   : > { %2538 = vmatpush3.bf16.msra.mxu1 %v2999_v14  ;;  %2527 = vmatprep.subr.bf16.mxu0 %v2898_v1 }
  0x5f   : > { %2539 = vmatprep.subr.bf16.mxu1 %v2898_v1  ;;  %2533 = vmatprep.mubr.msk.bf16.mxu0 %vm2899_vm0, %v2898_v1 }
  0x60   : > { %2545 = vmatprep.mubr.msk.bf16.mxu1 %vm2899_vm0, %v2898_v1 }
  0x61   : > { %2528 = vmatpush3.bf16.msra.mxu0 %v2953_v4 }
  0x62   : > { %2540 = vmatpush3.bf16.msra.mxu1 %v3016_v17  ;;  %2529 = vmatprep.subr.bf16.mxu0 %v2898_v1 }
  0x63   : > { %2541 = vmatprep.subr.bf16.mxu1 %v2898_v1 }
  0x65   : > { %2530 = vmatpush3.bf16.msra.mxu0 %v2972_v6 }
  0x66   : > { %2542 = vmatpush3.bf16.msra.mxu1 %v3032_v19  ;;  %2531 = vmatprep.subr.bf16.mxu0 %v2898_v1 }
  0x67   : > { %2543 = vmatprep.subr.bf16.mxu1 %v2898_v1 }
  0x69   : > { %2532 = vmatpush3.bf16.msra.mxu0 %v2992_v10 }
  0x6a   : > { %2544 = vmatpush3.bf16.msra.mxu1 %v3046_v21  ;;  %2549 = vmatprep.subr.bf16.mxu0 %v2898_v1 }
  0x6b   : > { %2561 = vmatprep.subr.bf16.mxu1 %v2898_v1 }
  0x6c   : > { %2534 = vmatmul.mubr.msk.bf16.vlgmr.msra.gmra.mxu0 %vm286_vm1, %v3058_v23  ;;  %v3461_v23 = vor.u32 %v1588_v16, %v1584_v13 }
  0x6d   : > { %2546 = vmatmul.mubr.msk.bf16.vlgmr.msra.gmra.mxu1 %vm286_vm1, %v612_v38  ;;  %2550 = vmatpush3.bf16.msra.mxu0 %v3006_v15 }
  0x6e   : > { %2562 = vmatpush3.bf16.msra.mxu1 %v3063_v25  ;;  %2551 = vmatprep.subr.bf16.mxu0 %v2898_v1 }
  0x6f   : > { %2563 = vmatprep.subr.bf16.mxu1 %v2898_v1  ;;  %2557 = vmatprep.mubr.msk.bf16.mxu0 %vm2899_vm0, %v2898_v1 }
  0x70   : > { %2569 = vmatprep.mubr.msk.bf16.mxu1 %vm2899_vm0, %v2898_v1 }
  0x71   : > { %2552 = vmatpush3.bf16.msra.mxu0 %v3021_v18 }
  0x72   : > { %2564 = vmatpush3.bf16.msra.mxu1 %v3084_v28  ;;  %2553 = vmatprep.subr.bf16.mxu0 %v2898_v1 }
  0x73   : > { %2565 = vmatprep.subr.bf16.mxu1 %v2898_v1 }
  0x75   : > { %2554 = vmatpush3.bf16.msra.mxu0 %v3039_v20 }
  0x76   : > { %2566 = vmatpush3.bf16.msra.mxu1 %v3105_v31  ;;  %2555 = vmatprep.subr.bf16.mxu0 %v2898_v1 }
  0x77   : > { %2567 = vmatprep.subr.bf16.mxu1 %v2898_v1 }
  0x79   : > { %2556 = vmatpush3.bf16.msra.mxu0 %v3053_v22 }
  0x7a   : > { %2568 = vmatpush3.bf16.msra.mxu1 %v3120_v35  ;;  %2573 = vmatprep.subr.bf16.mxu0 %v2898_v1 }
  0x7b   : > { %2585 = vmatprep.subr.bf16.mxu1 %v2898_v1 }
  0x7c   : > { %2558 = vmatmul.mubr.msk.bf16.vlgmr.msra.gmra.mxu0 %vm286_vm1, %v3145_v41 }
  0x7d   : > { %2570 = vmatmul.mubr.msk.bf16.vlgmr.msra.gmra.mxu1 %vm286_vm1, %v3202_v52  ;;  %2574 = vmatpush3.bf16.msra.mxu0 %v3070_v26 }
  0x7e   : > { %2586 = vmatpush3.bf16.msra.mxu1 %v3137_v39  ;;  %2575 = vmatprep.subr.bf16.mxu0 %v2898_v1 }
  0x7f   : > { %2587 = vmatprep.subr.bf16.mxu1 %v2898_v1  ;;  %2581 = vmatprep.mubr.msk.bf16.mxu0 %vm2899_vm0, %v2898_v1 }
  0x80   : > { %2593 = vmatprep.mubr.msk.bf16.mxu1 %vm2899_vm0, %v2898_v1 }
  0x81   : > { %2576 = vmatpush3.bf16.msra.mxu0 %v3091_v29 }
  0x82   : > { %2588 = vmatpush3.bf16.msra.mxu1 %v3161_v43  ;;  %2577 = vmatprep.subr.bf16.mxu0 %v2898_v1 }
  0x83   : > { %2589 = vmatprep.subr.bf16.mxu1 %v2898_v1 }
  0x85   : > { %2578 = vmatpush3.bf16.msra.mxu0 %v3110_v32 }
  0x86   : > { %2590 = vmatpush3.bf16.msra.mxu1 %v3179_v46  ;;  %2579 = vmatprep.subr.bf16.mxu0 %v2898_v1 }
  0x87   : > { %2591 = vmatprep.subr.bf16.mxu1 %v2898_v1 }
  0x89   : > { %2580 = vmatpush3.bf16.msra.mxu0 %v3125_v36 }
  0x8a   : > { %2592 = vmatpush3.bf16.msra.mxu1 %v3193_v50  ;;  %2597 = vmatprep.subr.bf16.mxu0 %v2898_v1 }
  0x8b   : > { %2609 = vmatprep.subr.bf16.mxu1 %v2898_v1 }
  0x8c   : > { %2582 = vmatmul.mubr.msk.bf16.vlgmr.msra.gmra.mxu0 %vm286_vm1, %v3248_v57 }
  0x8d   : > { %2594 = vmatmul.mubr.msk.bf16.vlgmr.msra.gmra.mxu1 %vm286_vm1, %v3326_v58  ;;  %2598 = vmatpush3.bf16.msra.mxu0 %v3142_v40 }
  0x8e   : > { %2610 = vmatpush3.bf16.msra.mxu1 %v3209_v53  ;;  %2599 = vmatprep.subr.bf16.mxu0 %v2898_v1 }
  0x8f   : > { %2611 = vmatprep.subr.bf16.mxu1 %v2898_v1  ;;  %2605 = vmatprep.mubr.msk.bf16.mxu0 %vm2899_vm0, %v2898_v1 }
  0x90   : > { %2617 = vmatprep.mubr.msk.bf16.mxu1 %vm2899_vm0, %v2898_v1 }
  0x91   : > { %2600 = vmatpush3.bf16.msra.mxu0 %v3166_v44 }
  0x92   : > { %2612 = vmatpush3.bf16.msra.mxu1 %v3222_v54  ;;  %2601 = vmatprep.subr.bf16.mxu0 %v2898_v1 }
  0x93   : > { %2613 = vmatprep.subr.bf16.mxu1 %v2898_v1 }
  0x95   : > { %2602 = vmatpush3.bf16.msra.mxu0 %v3184_v47 }
  0x96   : > { %2614 = vmatpush3.bf16.msra.mxu1 %v3235_v55  ;;  %2603 = vmatprep.subr.bf16.mxu0 %v2898_v1 }
  0x97   : > { %2615 = vmatprep.subr.bf16.mxu1 %v2898_v1 }
  0x99   : > { %2604 = vmatpush3.bf16.msra.mxu0 %v3198_v51 }
  0x9a   : > { %2616 = vmatpush3.bf16.msra.mxu1 %v3244_v56  ;;  %2621 = vmatprep.subr.bf16.mxu0 %v2898_v1 }
  0x9b   : > { %2633 = vmatprep.subr.bf16.mxu1 %v2898_v1 }
  0x9c   : > { %2606 = vmatmul.mubr.msk.bf16.vlgmr.msra.gmra.mxu0 %vm286_vm1, %v3352_v63 }
  0x9d   : > { %2618 = vmatmul.mubr.msk.bf16.vlgmr.msra.gmra.mxu1 %vm286_vm1, %v3354_v7  ;;  %2622 = vmatpush3.bf16.msra.mxu0 %v2931_v0 }
  0x9e   : > { %2634 = vmatpush3.bf16.msra.mxu1 %v2938_v2  ;;  %2623 = vmatprep.subr.bf16.mxu0 %v2898_v1 }
  0x9f   : > { %2635 = vmatprep.subr.bf16.mxu1 %v2898_v1  ;;  %2629 = vmatprep.mubr.msk.bf16.mxu0 %vm2899_vm0, %v2898_v1 }
  0xa0   : > { %2641 = vmatprep.mubr.msk.bf16.mxu1 %vm2899_vm0, %v2898_v1 }
  0xa1   : > { %2624 = vmatpush3.bf16.msra.mxu0 %v2944_v3 }
  0xa2   : > { %2636 = vmatpush3.bf16.msra.mxu1 %v2953_v4  ;;  %2625 = vmatprep.subr.bf16.mxu0 %v2898_v1 }
  0xa3   : > { %2637 = vmatprep.subr.bf16.mxu1 %v2898_v1 }
  0xa5   : > { %2626 = vmatpush3.bf16.msra.mxu0 %v2964_v5 }
  0xa6   : > { %2638 = vmatpush3.bf16.msra.mxu1 %v2972_v6  ;;  %2627 = vmatprep.subr.bf16.mxu0 %v2898_v1 }
  0xa7   : > { %2639 = vmatprep.subr.bf16.mxu1 %v2898_v1 }
  0xa9   : > { %2628 = vmatpush3.bf16.msra.mxu0 %v2985_v8 }
  0xaa   : > { %2640 = vmatpush3.bf16.msra.mxu1 %v2992_v10  ;;  %2645 = vmatprep.subr.bf16.mxu0 %v2898_v1 }
  0xab   : > { %2657 = vmatprep.subr.bf16.mxu1 %v2898_v1 }
  0xac   : > { %2630 = vmatmul.mubr.msk.bf16.vlgmr.msra.gmra.mxu0 %vm286_vm1, %v3202_v52 }
  0xad   : > { %2642 = vmatmul.mubr.msk.bf16.vlgmr.msra.gmra.mxu1 %vm286_vm1, %v3145_v41  ;;  %2646 = vmatpush3.bf16.msra.mxu0 %v2999_v14 }
  0xae   : > { %2658 = vmatpush3.bf16.msra.mxu1 %v3006_v15  ;;  %2647 = vmatprep.subr.bf16.mxu0 %v2898_v1 }
  0xaf   : > { %2659 = vmatprep.subr.bf16.mxu1 %v2898_v1  ;;  %2653 = vmatprep.mubr.msk.bf16.mxu0 %vm2899_vm0, %v2898_v1 }
  0xb0   : > { %2665 = vmatprep.mubr.msk.bf16.mxu1 %vm2899_vm0, %v2898_v1 }
  0xb1   : > { %2648 = vmatpush3.bf16.msra.mxu0 %v3016_v17 }
  0xb2   : > { %2660 = vmatpush3.bf16.msra.mxu1 %v3021_v18  ;;  %2649 = vmatprep.subr.bf16.mxu0 %v2898_v1 }
  0xb3   : > { %2661 = vmatprep.subr.bf16.mxu1 %v2898_v1 }
  0xb5   : > { %2650 = vmatpush3.bf16.msra.mxu0 %v3032_v19 }
  0xb6   : > { %2662 = vmatpush3.bf16.msra.mxu1 %v3039_v20  ;;  %2651 = vmatprep.subr.bf16.mxu0 %v2898_v1 }
  0xb7   : > { %2663 = vmatprep.subr.bf16.mxu1 %v2898_v1 }
  0xb9   : > { %2652 = vmatpush3.bf16.msra.mxu0 %v3046_v21 }
  0xba   : > { %2664 = vmatpush3.bf16.msra.mxu1 %v3053_v22  ;;  %2669 = vmatprep.subr.bf16.mxu0 %v2898_v1 }
  0xbb   : > { %2681 = vmatprep.subr.bf16.mxu1 %v2898_v1 }
  0xbc   : > { %2654 = vmatmul.mubr.msk.bf16.vlgmr.msra.gmra.mxu0 %vm286_vm1, %v3248_v57 }
  0xbd   : > { %2666 = vmatmul.mubr.msk.bf16.vlgmr.msra.gmra.mxu1 %vm286_vm1, %v3326_v58  ;;  %2670 = vmatpush3.bf16.msra.mxu0 %v3063_v25 }
  0xbe   : > { %2682 = vmatpush3.bf16.msra.mxu1 %v3070_v26  ;;  %2671 = vmatprep.subr.bf16.mxu0 %v2898_v1 }
  0xbf   : > { %2683 = vmatprep.subr.bf16.mxu1 %v2898_v1  ;;  %2677 = vmatprep.mubr.msk.bf16.mxu0 %vm2899_vm0, %v2898_v1 }
  0xc0   : > { %2689 = vmatprep.mubr.msk.bf16.mxu1 %vm2899_vm0, %v2898_v1 }
  0xc1   : > { %2672 = vmatpush3.bf16.msra.mxu0 %v3084_v28 }
  0xc2   : > { %2684 = vmatpush3.bf16.msra.mxu1 %v3091_v29  ;;  %2673 = vmatprep.subr.bf16.mxu0 %v2898_v1 }
  0xc3   : > { %2685 = vmatprep.subr.bf16.mxu1 %v2898_v1 }
  0xc5   : > { %2674 = vmatpush3.bf16.msra.mxu0 %v3105_v31 }
  0xc6   : > { %2686 = vmatpush3.bf16.msra.mxu1 %v3110_v32  ;;  %2675 = vmatprep.subr.bf16.mxu0 %v2898_v1 }
  0xc7   : > { %2687 = vmatprep.subr.bf16.mxu1 %v2898_v1 }
  0xc9   : > { %2676 = vmatpush3.bf16.msra.mxu0 %v3120_v35 }
  0xca   : > { %2688 = vmatpush3.bf16.msra.mxu1 %v3125_v36  ;;  %2693 = vmatprep.subr.bf16.mxu0 %v2898_v1 }
  0xcb   : > { %2705 = vmatprep.subr.bf16.mxu1 %v2898_v1 }
  0xcc   : > { %2678 = vmatmul.mubr.msk.bf16.vlgmr.msra.gmra.mxu0 %vm286_vm1, %v3352_v63 }
  0xcd   : > { %2690 = vmatmul.mubr.msk.bf16.vlgmr.msra.gmra.mxu1 %vm286_vm1, %v3354_v7  ;;  %2694 = vmatpush3.bf16.msra.mxu0 %v3137_v39 }
  0xce   : > { %2706 = vmatpush3.bf16.msra.mxu1 %v3142_v40  ;;  %2695 = vmatprep.subr.bf16.mxu0 %v2898_v1 }
  0xcf   : > { %2707 = vmatprep.subr.bf16.mxu1 %v2898_v1  ;;  %2701 = vmatprep.mubr.msk.bf16.mxu0 %vm2899_vm0, %v2898_v1 }
  0xd0   : > { %2713 = vmatprep.mubr.msk.bf16.mxu1 %vm2899_vm0, %v2898_v1 }
  0xd1   : > { %2696 = vmatpush3.bf16.msra.mxu0 %v3161_v43 }
  0xd2   : > { %2708 = vmatpush3.bf16.msra.mxu1 %v3166_v44  ;;  %2697 = vmatprep.subr.bf16.mxu0 %v2898_v1 }
  0xd3   : > { %2709 = vmatprep.subr.bf16.mxu1 %v2898_v1 }
  0xd5   : > { %2698 = vmatpush3.bf16.msra.mxu0 %v3179_v46 }
  0xd6   : > { %2710 = vmatpush3.bf16.msra.mxu1 %v3184_v47  ;;  %2699 = vmatprep.subr.bf16.mxu0 %v2898_v1 }
  0xd7   : > { %2711 = vmatprep.subr.bf16.mxu1 %v2898_v1 }
  0xd9   : > { %2700 = vmatpush3.bf16.msra.mxu0 %v3193_v50 }
  0xda   : > { %2712 = vmatpush3.bf16.msra.mxu1 %v3198_v51  ;;  %2717 = vmatprep.subr.bf16.mxu0 %v2898_v1 }
  0xdb   : > { %2729 = vmatprep.subr.bf16.mxu1 %v2898_v1 }
  0xdc   : > { %v324_v24 = vpop.f32.mrf.mxu0  ;;  %2702 = vmatmul.mubr.msk.bf16.vlgmr.msra.gmra.mxu0 %vm286_vm1, %v3431_v9 }
  0xdd   : > { %v391_v27 = vpop.f32.mrf.mxu1  ;;  %2714 = vmatmul.mubr.msk.bf16.vlgmr.msra.gmra.mxu1 %vm286_vm1, %v3461_v23  ;;  %2718 = vmatpush3.bf16.msra.mxu0 %v3209_v53 }
  0xde   : > { %v392_v30 = vadd.f32 %v391_v27, %v324_v24  ;;  %2730 = vmatpush3.bf16.msra.mxu1 %v2931_v0  ;;  %v2415_v33 = vpop.f32.mrf.mxu0  ;;  %2719 = vmatprep.subr.bf16.mxu0 %v2898_v1 }
  0xdf   : > { %v2427_v34 = vpop.f32.mrf.mxu1  ;;  %2731 = vmatprep.subr.bf16.mxu1 %v2898_v1  ;;  %2725 = vmatprep.mubr.msk.bf16.mxu0 %vm2899_vm0, %v2898_v1 }
  0xe0   : > { %2737 = vmatprep.mubr.msk.bf16.mxu1 %vm2899_vm0, %v2898_v1  ;;  %v327_v37 = vpop.f32.mrf.mxu0 }
  0xe1   : > { %v394_v38 = vpop.f32.mrf.mxu1  ;;  %2720 = vmatpush3.bf16.msra.mxu0 %v3222_v54 }
  0xe2   : > { %2732 = vmatpush3.bf16.msra.mxu1 %v2944_v3  ;;  %v2416_v41 = vpop.f32.mrf.mxu0  ;;  %2721 = vmatprep.subr.bf16.mxu0 %v2898_v1 }
  0xe3   : > { %v2428_v0 = vpop.f32.mrf.mxu1  ;;  %2733 = vmatprep.subr.bf16.mxu1 %v2898_v1 }
  0xe5   : > { %2722 = vmatpush3.bf16.msra.mxu0 %v3235_v55 }
  0xe6   : > { %2734 = vmatpush3.bf16.msra.mxu1 %v2964_v5  ;;  %2723 = vmatprep.subr.bf16.mxu0 %v2898_v1 }
  0xe7   : > { %2735 = vmatprep.subr.bf16.mxu1 %v2898_v1 }
  0xe9   : > { %2724 = vmatpush3.bf16.msra.mxu0 %v3244_v56 }
  0xea   : > { %2736 = vmatpush3.bf16.msra.mxu1 %v2985_v8  ;;  %2741 = vmatprep.subr.bf16.mxu0 %v2898_v1 }
  0xeb   : > { %2753 = vmatprep.subr.bf16.mxu1 %v2898_v1 }
  0xec   : > { %v459_v3 = vpop.f32.mrf.mxu0  ;;  %2726 = vmatmul.mubr.msk.bf16.vlgmr.msra.gmra.mxu0 %vm286_vm1, %v1634_v42 }
  0xed   : > { %v527_v45 = vpop.f32.mrf.mxu1  ;;  %2738 = vmatmul.mubr.msk.bf16.vlgmr.msra.gmra.mxu1 %vm286_vm1, %v3352_v63  ;;  %v465_v5 = vadd.f32 %v459_v3, %v392_v30  ;;  %2742 = vmatpush3.bf16.msra.mxu0 %v2938_v2 }
  0xee   : > { %2754 = vmatpush3.bf16.msra.mxu1 %v2999_v14  ;;  %v2439_v48 = vpop.f32.mrf.mxu0  ;;  %2743 = vmatprep.subr.bf16.mxu0 %v2898_v1 }
  0xef   : > { %v2451_v8 = vpop.f32.mrf.mxu1  ;;  %2755 = vmatprep.subr.bf16.mxu1 %v2898_v1  ;;  %v533_v49 = vadd.f32 %v527_v45, %v465_v5  ;;  %2749 = vmatprep.mubr.msk.bf16.mxu0 %vm2899_vm0, %v2898_v1 }
  0xf0   : > { %2761 = vmatprep.mubr.msk.bf16.mxu1 %vm2899_vm0, %v2898_v1  ;;  %v462_v52 = vpop.f32.mrf.mxu0 }
  0xf1   : > { %v530_v57 = vpop.f32.mrf.mxu1  ;;  %2744 = vmatpush3.bf16.msra.mxu0 %v2953_v4 }
  0xf2   : > { %2756 = vmatpush3.bf16.msra.mxu1 %v3016_v17  ;;  %v2440_v2 = vpop.f32.mrf.mxu0  ;;  %2745 = vmatprep.subr.bf16.mxu0 %v2898_v1 }
  0xf3   : > { %v2452_v14 = vpop.f32.mrf.mxu1  ;;  %2757 = vmatprep.subr.bf16.mxu1 %v2898_v1 }
  0xf5   : > { %2746 = vmatpush3.bf16.msra.mxu0 %v2972_v6 }
  0xf6   : > { %2758 = vmatpush3.bf16.msra.mxu1 %v3032_v19  ;;  %2747 = vmatprep.subr.bf16.mxu0 %v2898_v1 }
  0xf7   : > { %2759 = vmatprep.subr.bf16.mxu1 %v2898_v1 }
  0xf9   : > { %2748 = vmatpush3.bf16.msra.mxu0 %v2992_v10 }
  0xfa   : > { %2760 = vmatpush3.bf16.msra.mxu1 %v3046_v21  ;;  %2765 = vmatprep.subr.bf16.mxu0 %v2898_v1 }
  0xfb   : > { %2777 = vmatprep.subr.bf16.mxu1 %v2898_v1 }
  0xfc   : > { %v605_v4 = vpop.f32.mrf.mxu0  ;;  %2750 = vmatmul.mubr.msk.bf16.vlgmr.msra.gmra.mxu0 %vm286_vm1, %v3326_v58 }
  0xfd   : > { %v674_v17 = vpop.f32.mrf.mxu1  ;;  %2762 = vmatmul.mubr.msk.bf16.vlgmr.msra.gmra.mxu1 %vm286_vm1, %v3354_v7  ;;  %v611_v6 = vadd.f32 %v605_v4, %v533_v49  ;;  %2766 = vmatpush3.bf16.msra.mxu0 %v3006_v15 }
  0xfe   : > { %2778 = vmatpush3.bf16.msra.mxu1 %v3063_v25  ;;  %v2463_v10 = vpop.f32.mrf.mxu0  ;;  %2767 = vmatprep.subr.bf16.mxu0 %v2898_v1 }
  0xff   : > { %v2475_v19 = vpop.f32.mrf.mxu1  ;;  %2779 = vmatprep.subr.bf16.mxu1 %v2898_v1  ;;  %v680_v21 = vadd.f32 %v674_v17, %v611_v6  ;;  %2773 = vmatprep.mubr.msk.bf16.mxu0 %vm2899_vm0, %v2898_v1 }
 0x100   : > { %2785 = vmatprep.mubr.msk.bf16.mxu1 %vm2899_vm0, %v2898_v1  ;;  %v608_v58 = vpop.f32.mrf.mxu0 }
 0x101   : > { %v677_v59 = vpop.f32.mrf.mxu1  ;;  %2768 = vmatpush3.bf16.msra.mxu0 %v3021_v18 }
 0x102   : > { %2780 = vmatpush3.bf16.msra.mxu1 %v3084_v28  ;;  %v2464_v15 = vpop.f32.mrf.mxu0  ;;  %2769 = vmatprep.subr.bf16.mxu0 %v2898_v1 }
 0x103   : > { %v2476_v25 = vpop.f32.mrf.mxu1  ;;  %2781 = vmatprep.subr.bf16.mxu1 %v2898_v1 }
 0x105   : > { %2770 = vmatpush3.bf16.msra.mxu0 %v3039_v20 }
 0x106   : > { %2782 = vmatpush3.bf16.msra.mxu1 %v3105_v31  ;;  %2771 = vmatprep.subr.bf16.mxu0 %v2898_v1 }
 0x107   : > { %2783 = vmatprep.subr.bf16.mxu1 %v2898_v1 }
 0x109   : > { %2772 = vmatpush3.bf16.msra.mxu0 %v3053_v22 }
 0x10a   : > { %2784 = vmatpush3.bf16.msra.mxu1 %v3120_v35  ;;  %2789 = vmatprep.subr.bf16.mxu0 %v2898_v1 }
 0x10b   : > { %2801 = vmatprep.subr.bf16.mxu1 %v2898_v1 }
 0x10c   : > { %v742_v18 = vpop.f32.mrf.mxu0  ;;  %2774 = vmatmul.mubr.msk.bf16.vlgmr.msra.gmra.mxu0 %vm286_vm1, %v3431_v9 }
 0x10d   : > { %v820_v28 = vpop.f32.mrf.mxu1  ;;  %2786 = vmatmul.mubr.msk.bf16.vlgmr.msra.gmra.mxu1 %vm286_vm1, %v3461_v23  ;;  %v748_v20 = vadd.f32 %v742_v18, %v680_v21  ;;  %2790 = vmatpush3.bf16.msra.mxu0 %v3070_v26  ;;  %v3595_v21 = vld [vmem:[%s3611_s2] ss:$0 sm:$0xff] }
 0x10e   : > { %2802 = vmatpush3.bf16.msra.mxu1 %v3137_v39  ;;  %v2487_v22 = vpop.f32.mrf.mxu0  ;;  %2791 = vmatprep.subr.bf16.mxu0 %v2898_v1 }
 0x10f   : > { %v2499_v31 = vpop.f32.mrf.mxu1  ;;  %2803 = vmatprep.subr.bf16.mxu1 %v2898_v1  ;;  %v826_v35 = vadd.f32 %v820_v28, %v748_v20  ;;  %2797 = vmatprep.mubr.msk.bf16.mxu0 %vm2899_vm0, %v2898_v1 }
 0x110   : > { %2809 = vmatprep.mubr.msk.bf16.mxu1 %vm2899_vm0, %v2898_v1  ;;  %v745_v60 = vpop.f32.mrf.mxu0 }
 0x111   : > { %v823_v61 = vpop.f32.mrf.mxu1  ;;  %2792 = vmatpush3.bf16.msra.mxu0 %v3091_v29  ;;  %v2143_v29 = vld [vmem:[%s2978_s29 + $0x14] sm:$0xf] }
 0x112   : > { %2804 = vmatpush3.bf16.msra.mxu1 %v3161_v43  ;;  %v2488_v26 = vpop.f32.mrf.mxu0  ;;  %2793 = vmatprep.subr.bf16.mxu0 %v2898_v1 }
 0x113   : > { %v2500_v39 = vpop.f32.mrf.mxu1  ;;  %2805 = vmatprep.subr.bf16.mxu1 %v2898_v1 }
 0x115   : > { %2794 = vmatpush3.bf16.msra.mxu0 %v3110_v32  ;;  %v2220_v32 = vcombine.low %v2143_v29, %v2143_v29 }
 0x116   : > { %2806 = vmatpush3.bf16.msra.mxu1 %v3179_v46  ;;  %2795 = vmatprep.subr.bf16.mxu0 %v2898_v1 }
 0x117   : > { %2807 = vmatprep.subr.bf16.mxu1 %v2898_v1  ;;  %v1975_v63 = vshll.u32 %v2220_v32, 16  ;;  %v1973_v11 = vshrl.u32 %v2220_v32, 16  ;;  %v2023_v13 = vrot.slane %v2220_v32, 1 }
 0x119   : > { %2796 = vmatpush3.bf16.msra.mxu0 %v3125_v36  ;;  %v1977_v12 = vrot.slane %v1975_v63, 1 }
 0x11a   : > { %2808 = vmatpush3.bf16.msra.mxu1 %v3193_v50  ;;  %2813 = vmatprep.subr.bf16.mxu0 %v2898_v1 }
 0x11b   : > { %2825 = vmatprep.subr.bf16.mxu1 %v2898_v1 }
 0x11c   : > { %v889_v43 = vpop.f32.mrf.mxu0  ;;  %2798 = vmatmul.mubr.msk.bf16.vlgmr.msra.gmra.mxu0 %vm286_vm1, %v1634_v42 }
 0x11d   : > { %v937_v62 = vpop.f32.mrf.mxu1  ;;  %2810 = vmatmul.mubr.msk.bf16.vlgmr.msra.gmra.mxu1 %vm286_vm1, %v2143_v29  ;;  %v3570_v46 = vadd.f32 %v889_v43, %v826_v35  ;;  %2814 = vmatpush3.bf16.msra.mxu0 %v3142_v40 }
 0x11e   : > { %2826 = vmatpush3.bf16.msra.mxu1 %v3209_v53  ;;  %v2511_v36 = vpop.f32.mrf.mxu0  ;;  %2815 = vmatprep.subr.bf16.mxu0 %v2898_v1 }
 0x11f   : > { %v2523_v50 = vpop.f32.mrf.mxu1  ;;  %2827 = vmatprep.subr.bf16.mxu1 %v2898_v1  ;;  %2821 = vmatprep.mubr.msk.bf16.mxu0 %vm2899_vm0, %v2898_v1  ;;  %v902_v28 = vadd.f32 %v3595_v21, %v3570_v46 }
 0x120   : > { %2833 = vmatprep.mubr.msk.bf16.mxu1 %vm2899_vm0, %v2898_v1  ;;  %v892_v7 = vpop.f32.mrf.mxu0 }
 0x121   : > { %v940_v9 = vpop.f32.mrf.mxu1  ;;  %2816 = vmatpush3.bf16.msra.mxu0 %v3166_v44  ;;  %v1978_v44 = vor.u32 %v1977_v12, %v1973_v11 }
 0x122   : > { %2828 = vmatpush3.bf16.msra.mxu1 %v3222_v54  ;;  %v2512_v40 = vpop.f32.mrf.mxu0  ;;  %2817 = vmatprep.subr.bf16.mxu0 %v2898_v1 }
 0x123   : > { %v2524_v53 = vpop.f32.mrf.mxu1  ;;  %2829 = vmatprep.subr.bf16.mxu1 %v2898_v1 }
 0x125   : > { %2818 = vmatpush3.bf16.msra.mxu0 %v3184_v47 }
 0x126   : > { %2830 = vmatpush3.bf16.msra.mxu1 %v3235_v55  ;;  %2819 = vmatprep.subr.bf16.mxu0 %v2898_v1 }
 0x127   : > { %2831 = vmatprep.subr.bf16.mxu1 %v2898_v1 }
 0x129   : > { %2820 = vmatpush3.bf16.msra.mxu0 %v3198_v51 }
 0x12a   : > { %2832 = vmatpush3.bf16.msra.mxu1 %v3244_v56 }
 0x12c   : > { %v977_v54 = vpop.f32.mrf.mxu0  ;;  %2822 = vmatmul.mubr.msk.bf16.vlgmr.msra.gmra.mxu0 %vm286_vm1, %v1978_v44 }
 0x12d   : > { %v1017_v16 = vpop.f32.mrf.mxu1  ;;  %2834 = vmatmul.mubr.msk.bf16.vlgmr.msra.gmra.mxu1 %vm286_vm1, %v2023_v13  ;;  %v978_v23 = vadd.f32 %v977_v54, %v937_v62 }
 0x12e   : > { %v2535_v47 = vpop.f32.mrf.mxu0 }
 0x12f   : > { %v2547_v24 = vpop.f32.mrf.mxu1  ;;  %v1023_v55 = vadd.f32 %v1017_v16, %v978_v23 }
 0x130   : > { %v980_v27 = vpop.f32.mrf.mxu0 }
 0x131   : > { %v1020_v30 = vpop.f32.mrf.mxu1 }
 0x132   : > { %v2536_v33 = vpop.f32.mrf.mxu0 }
 0x133   : > { %v2548_v1 = vpop.f32.mrf.mxu1 }
 0x13c   : > { %v1058_v34 = vpop.f32.mrf.mxu0 }
 0x13d   : > { %v1099_v37 = vpop.f32.mrf.mxu1  ;;  %v1064_v38 = vadd.f32 %v1058_v34, %v1023_v55 }
 0x13e   : > { %v2559_v51 = vpop.f32.mrf.mxu0 }
 0x13f   : > { %v2571_v41 = vpop.f32.mrf.mxu1  ;;  %v1105_v56 = vadd.f32 %v1099_v37, %v1064_v38 }
 0x140   : > { %v1061_v0 = vpop.f32.mrf.mxu0 }
 0x141   : > { %v1102_v42 = vpop.f32.mrf.mxu1 }
 0x142   : > { %v2560_v3 = vpop.f32.mrf.mxu0 }
 0x143   : > { %v2572_v45 = vpop.f32.mrf.mxu1 }
 0x14c   : > { %v1140_v5 = vpop.f32.mrf.mxu0 }
 0x14d   : > { %v1184_v48 = vpop.f32.mrf.mxu1  ;;  %v1146_v8 = vadd.f32 %v1140_v5, %v1105_v56 }
 0x14e   : > { %v2583_v49 = vpop.f32.mrf.mxu0 }
 0x14f   : > { %v2595_v52 = vpop.f32.mrf.mxu1  ;;  %v1190_v57 = vadd.f32 %v1184_v48, %v1146_v8 }
 0x150   : > { %v1143_v2 = vpop.f32.mrf.mxu0 }
 0x151   : > { %v1187_v14 = vpop.f32.mrf.mxu1 }
 0x152   : > { %v2584_v4 = vpop.f32.mrf.mxu0 }
 0x153   : > { %v2596_v17 = vpop.f32.mrf.mxu1 }
 0x15c   : > { %v1238_v6 = vpop.f32.mrf.mxu0 }
 0x15d   : > { %v1283_v10 = vpop.f32.mrf.mxu1  ;;  %v1244_v19 = vadd.f32 %v1238_v6, %v1190_v57 }
 0x15e   : > { %v2607_v58 = vpop.f32.mrf.mxu0 }
 0x15f   : > { %v2619_v59 = vpop.f32.mrf.mxu1  ;;  %v1289_v15 = vadd.f32 %v1283_v10, %v1244_v19 }
 0x160   : > { %v1241_v25 = vpop.f32.mrf.mxu0 }
 0x161   : > { %v1286_v18 = vpop.f32.mrf.mxu1  ;;  %v1290_v20 = vadd.f32 %v3595_v21, %v1289_v15 }
 0x162   : > { %v2608_v22 = vpop.f32.mrf.mxu0 }
 0x163   : > { %v2620_v31 = vpop.f32.mrf.mxu1  ;;  %v1291_v35 = vmax.f32 %v902_v28, %v1290_v20 }
 0x16c   : > { %v1326_v60 = vpop.f32.mrf.mxu0 }
 0x16d   : > { %v1366_v61 = vpop.f32.mrf.mxu1 }
 0x16e   : > { %v1367_v26 = vadd.f32 %v1366_v61, %v1326_v60  ;;  %v2631_v39 = vpop.f32.mrf.mxu0 }
 0x16f   : > { %v2643_v29 = vpop.f32.mrf.mxu1 }
 0x170   : > { %v1329_v43 = vpop.f32.mrf.mxu0 }
 0x171   : > { %v1369_v62 = vpop.f32.mrf.mxu1 }
 0x172   : > { %v2632_v32 = vpop.f32.mrf.mxu0 }
 0x173   : > { %v2644_v36 = vpop.f32.mrf.mxu1 }
 0x17c   : > { %v1406_v50 = vpop.f32.mrf.mxu0 }
 0x17d   : > { %v1447_v63 = vpop.f32.mrf.mxu1  ;;  %v1412_v7 = vadd.f32 %v1406_v50, %v1367_v26 }
 0x17e   : > { %v2655_v9 = vpop.f32.mrf.mxu0 }
 0x17f   : > { %v2667_v40 = vpop.f32.mrf.mxu1  ;;  %v1453_v46 = vadd.f32 %v1447_v63, %v1412_v7 }
 0x180   : > { %v1409_v53 = vpop.f32.mrf.mxu0 }
 0x181   : > { %v1450_v11 = vpop.f32.mrf.mxu1 }
 0x182   : > { %v2656_v12 = vpop.f32.mrf.mxu0 }
 0x183   : > { %v2668_v13 = vpop.f32.mrf.mxu1 }
 0x18c   : > { %v1488_v44 = vpop.f32.mrf.mxu0 }
 0x18d   : > { %v1529_v54 = vpop.f32.mrf.mxu1  ;;  %v1494_v16 = vadd.f32 %v1488_v44, %v1453_v46 }
 0x18e   : > { %v2679_v23 = vpop.f32.mrf.mxu0 }
 0x18f   : > { %v2691_v47 = vpop.f32.mrf.mxu1  ;;  %v1535_v24 = vadd.f32 %v1529_v54, %v1494_v16 }
 0x190   : > { %v1491_v55 = vpop.f32.mrf.mxu0 }
 0x191   : > { %v1532_v27 = vpop.f32.mrf.mxu1 }
 0x192   : > { %v2680_v30 = vpop.f32.mrf.mxu0 }
 0x193   : > { %v2692_v33 = vpop.f32.mrf.mxu1 }
 0x19c   : > { %v1573_v1 = vpop.f32.mrf.mxu0 }
 0x19d   : > { %v1627_v34 = vpop.f32.mrf.mxu1  ;;  %v1579_v37 = vadd.f32 %v1573_v1, %v1535_v24 }
 0x19e   : > { %v2703_v38 = vpop.f32.mrf.mxu0 }
 0x19f   : > { %v2715_v51 = vpop.f32.mrf.mxu1  ;;  %v1633_v41 = vadd.f32 %v1627_v34, %v1579_v37 }
 0x1a0   : > { %v1576_v56 = vpop.f32.mrf.mxu0 }
 0x1a1   : > { %v1630_v0 = vpop.f32.mrf.mxu1 }
 0x1a2   : > { %v2704_v42 = vpop.f32.mrf.mxu0 }
 0x1a3   : > { %v2716_v3 = vpop.f32.mrf.mxu1 }
 0x1ac   : > { %v1672_v45 = vpop.f32.mrf.mxu0 }
 0x1ad   : > { %v1715_v5 = vpop.f32.mrf.mxu1  ;;  %v1678_v48 = vadd.f32 %v1672_v45, %v1633_v41 }
 0x1ae   : > { %v2727_v8 = vpop.f32.mrf.mxu0 }
 0x1af   : > { %v2739_v49 = vpop.f32.mrf.mxu1  ;;  %v1679_v52 = vadd.f32 %v3595_v21, %v1678_v48 }
 0x1b0   : > { %v1675_v57 = vpop.f32.mrf.mxu0 }
 0x1b1   : > { %v1718_v2 = vpop.f32.mrf.mxu1  ;;  %v1680_v14 = vmax.f32 %v1291_v35, %v1679_v52 }
 0x1b2   : > { %v2728_v4 = vpop.f32.mrf.mxu0 }
 0x1b3   : > { %v2740_v17 = vpop.f32.mrf.mxu1 }
 0x1bc   : > { %v1755_v6 = vpop.f32.mrf.mxu0 }
 0x1bd   : > { %v1795_v10 = vpop.f32.mrf.mxu1  ;;  %v1756_v29 = vadd.f32 %v1755_v6, %v1715_v5 }
 0x1be   : > { %v2751_v19 = vpop.f32.mrf.mxu0 }
 0x1bf   : > { %v2763_v58 = vpop.f32.mrf.mxu1  ;;  %v1801_v36 = vadd.f32 %v1795_v10, %v1756_v29 }
 0x1c0   : > { %v1758_v59 = vpop.f32.mrf.mxu0 }
 0x1c1   : > { %v1798_v15 = vpop.f32.mrf.mxu1 }
 0x1c2   : > { %v2752_v25 = vpop.f32.mrf.mxu0 }
 0x1c3   : > { %v2764_v18 = vpop.f32.mrf.mxu1 }
 0x1cc   : > { %v1836_v28 = vpop.f32.mrf.mxu0 }
 0x1cd   : > { %v1877_v20 = vpop.f32.mrf.mxu1  ;;  %v1842_v7 = vadd.f32 %v1836_v28, %v1801_v36 }
 0x1ce   : > { %v2775_v22 = vpop.f32.mrf.mxu0 }
 0x1cf   : > { %v2787_v31 = vpop.f32.mrf.mxu1  ;;  %v1883_v46 = vadd.f32 %v1877_v20, %v1842_v7 }
 0x1d0   : > { %v1839_v60 = vpop.f32.mrf.mxu0 }
 0x1d1   : > { %v1880_v61 = vpop.f32.mrf.mxu1 }
 0x1d2   : > { %v2776_v26 = vpop.f32.mrf.mxu0 }
 0x1d3   : > { %v2788_v39 = vpop.f32.mrf.mxu1 }
 0x1dc   : > { %v1918_v35 = vpop.f32.mrf.mxu0 }
 0x1dd   : > { %v1962_v43 = vpop.f32.mrf.mxu1  ;;  %v1924_v53 = vadd.f32 %v1918_v35, %v1883_v46 }
 0x1de   : > { %v2799_v62 = vpop.f32.mrf.mxu0 }
 0x1df   : > { %v2811_v32 = vpop.f32.mrf.mxu1  ;;  %v1968_v11 = vadd.f32 %v1962_v43, %v1924_v53 }
 0x1e0   : > { %v1921_v50 = vpop.f32.mrf.mxu0 }
 0x1e1   : > { %v1965_v63 = vpop.f32.mrf.mxu1 }
 0x1e2   : > { %v2800_v9 = vpop.f32.mrf.mxu0 }
 0x1e3   : > { %v2812_v40 = vpop.f32.mrf.mxu1 }
 0x1ec   : > { %v2016_v12 = vpop.f32.mrf.mxu0 }
 0x1ed   : > { %v2061_v13 = vpop.f32.mrf.mxu1  ;;  %v2022_v44 = vadd.f32 %v2016_v12, %v1968_v11 }
 0x1ee   : > { %v2823_v54 = vpop.f32.mrf.mxu0 }
 0x1ef   : > { %v2835_v16 = vpop.f32.mrf.mxu1  ;;  %v2067_v23 = vadd.f32 %v2061_v13, %v2022_v44 }
 0x1f0   : > { %v2019_v47 = vpop.f32.mrf.mxu0 }
 0x1f1   : > { %v2064_v24 = vpop.f32.mrf.mxu1  ;;  %v2068_v55 = vadd.f32 %v3595_v21, %v2067_v23  ;;  %v2083_v21 = vld [vmem:[%s166_s20] sm:$0x1] }
 0x1f2   : > { %v2824_v27 = vpop.f32.mrf.mxu0 }
 0x1f3   : > { %v2836_v30 = vpop.f32.mrf.mxu1  ;;  %v2069_v33 = vmax.f32 %v1680_v14, %v2068_v55 }
 0x1f5   : > { %v2070_v1 = vmax.f32 %v2069_v33, 0.0 }
 0x1f7   : > { %v2072_v34 = vsel %vm2071_vm2, %v2070_v1, -inf }
 0x1f8   : > { %v2073_v37 = vrot.slane %v2072_v34, 4 }
 0x1fa   : > { %v2074_v38 = vmax.f32 %v2072_v34, %v2073_v37 }
 0x1fc   : > { %v2075_v51 = vrot.slane %v2074_v38, 2 }
 0x1fe   : > { %v2076_v41 = vmax.f32 %v2074_v38, %v2075_v51 }
 0x200   : > { %v2077_v56 = vrot.slane %v2076_v41, 1 }
 0x202   : > { %v2078_v0 = vmax.f32 %v2076_v41, %v2077_v56 }
 0x204   : > { %v2079_v42 = vpack.c.bf16 %v2078_v0, %v2078_v0 }
 0x206   : > { %v2084_v3 = vsel %vm2082_vm5, %v2079_v42, %v2083_v21 }
 0x207   : > { %2085 = vst [vmem:[%s166_s20] sm:$0x1] %v2084_v3 }
 0x208 PF: > { %s13_s12 = sadd.s32 1, %s2896_s12  }
 0x209   : > { %p10_p4 = scmp.ge.s32.totalorder %s13_s12, 4  }
 0x20b   :  { %12 = sbr.rel (!%p10_p4) target bundleno = 1 (0x1), region = 67 }

// kernel: dqn_forward.3
= control target key start
LH: loop header
LB: loop body
LE: loop exit
PB: predicated region body
PF: predicated region fallthrough
CT: control target
= control target key end

     0   :  { %s3162_s12 = smov 0   ;;  %s3756_s0 = inlined_call_operand.vmem [shape: bf16[2,32,32,4], index: 0, kind: input, shape index: {}]   ;;  %s3757_s1 = inlined_call_operand.vmem [shape: bf16[9,4,64], index: 1, kind: input, shape index: {}]   ;;  %s3758_s2 = inlined_call_operand.vmem [shape: f32[1,64], index: 2, kind: input, shape index: {}]   ;;  %s3759_s3 = inlined_call_operand.vmem [shape: bf16[2,7,7,64], index: 3, kind: output, shape index: {}]  }
   0x1 LB: > { %s2600_s13 = sadd.s32 4294967295, %s3136_s12   ;;  %p2604_p0 = scmp.ge.s32.totalorder %s3136_s12, 1  ;;  %s3136_s12 = sphi %s3162_s12, %s13_s12  }
   0x2   : > { %p137_p1 = scmp.lt.s32.totalorder %s3136_s12, 3 }
   0x4   : > { %p138_p2 = pnand %p2604_p0, %p137_p1 }
   0x5   : > { %p161_p3 = scmp.lt.s32.totalorder (!%p138_p2), %s2600_s13, 1  ;;  %s3230_s17 = smov (!%p138_p2), 0  }
   0x6   : > { %141 = sbr.rel (%p138_p2) target bundleno = 399 (0x18f), region = 32 }
   0xb   : > { %v3173_v0 = vld [vmem:[%s3757_s1] sm:$0x3]  ;;  %v3178_v1 = vld [vmem:[%s3757_s1 + $0x2] sm:$0x3]  ;;  %v3183_v2 = vld [vmem:[%s3757_s1 + $0x4] sm:$0x3] }
   0xc   : > { %3777 = vst [vmem:[#allocation2_spill] sm:$0xff] %v3173_v0  ;;  %3778 = vst [vmem:[#allocation3_spill] sm:$0xff] %v3178_v1  ;;  %v3188_v3 = vld [vmem:[%s3757_s1 + $0x6] sm:$0x3]  ;;  %v3193_v4 = vld [vmem:[%s3757_s1 + $0x8] sm:$0x3] }
   0xd   : > { %3779 = vst [vmem:[#allocation4_spill] sm:$0xff] %v3183_v2  ;;  %3780 = vst [vmem:[#allocation5_spill] sm:$0xff] %v3188_v3  ;;  %s3818_s13 = smov (!%p161_p3, %s2600_s13), 1  ;;  %v3198_v5 = vld [vmem:[%s3757_s1 + $0xa] sm:$0x3] }
   0xe   : > { %3781 = vst [vmem:[#allocation6_spill] sm:$0xff] %v3193_v4  ;;  %3782 = vst [vmem:[#allocation7_spill] sm:$0xff] %v3198_v5  ;;  %v3203_v6 = vld [vmem:[%s3757_s1 + $0xc] sm:$0x3]  ;;  %v3208_v7 = vld [vmem:[%s3757_s1 + $0xe] sm:$0x3] }
   0xf   : > { %3783 = vst [vmem:[#allocation8_spill] sm:$0xff] %v3203_v6  ;;  %3784 = vst [vmem:[#allocation9_spill] sm:$0xff] %v3208_v7  ;;  %v3213_v8 = vld [vmem:[%s3757_s1 + $0x10] sm:$0x3]  ;;  %v3218_v9 = vld [vmem:[%s3758_s2] ss:$0 sm:$0xff] }
  0x10   : > { %3785 = vst [vmem:[#allocation10_spill] sm:$0xff] %v3213_v8  ;;  %s2729_s7 = sshll.u32 %s3818_s13, 9  ;;  %s3097_s8 = smul.u32 28, %s3818_s13 }
  0x11   : > { %s3223_s11 = scalar_lea.vmem %s3756_s0, %s2729_s7 }
  0x12   : > { %s3228_s16 = scalar_lea.vmem %s3759_s3, %s3097_s8 }
  0x13 LB: >> { %v3793_v1 = vld [vmem:[#allocation3_spill] sm:$0xff]  ;;  %v3794_v0 = vld [vmem:[#allocation2_spill] sm:$0xff]  ;;  %vm269_vm0 = vcmask 1041408   ;;  %s2731_s13 = sshll.u32 %s3140_s17, 6  ;;  %vm262_vm1 = vcmask 31744   ;;  %vm378_vm3 = vcmask 1046528   ;;  %s3140_s17 = sphi %s3230_s17, %s187_s17  }
  0x14   : >> { %v3791_v3 = vld [vmem:[#allocation5_spill] sm:$0xff]  ;;  %v3792_v2 = vld [vmem:[#allocation4_spill] sm:$0xff]  ;;  %3062 = vmatprep.subr.msk.bf16.mxu1 %vm269_vm0, %v3794_v0  ;;  %v3239_v10 = vsel %vm269_vm0, %v3794_v0, 0  ;;  %3061 = vmatprep.subr.msk.bf16.mxu0 %vm269_vm0, %v3793_v1  ;;  %v3245_v11 = vsel %vm269_vm0, %v3793_v1, 0  ;;  %s3251_s18 = scalar_lea.vmem %s3223_s11, %s2731_s13  ;;  %vm246_vm2 = vsmask.f32 7424 }
  0x15   : >> { %v3789_v5 = vld [vmem:[#allocation7_spill] sm:$0xff]  ;;  %v3790_v4 = vld [vmem:[#allocation6_spill] sm:$0xff]  ;;  %2852 = vmatpush3.bf16.msra.mxu1 %v3239_v10  ;;  %2846 = vmatpush3.bf16.msra.mxu0 %v3245_v11  ;;  %v3263_v14 = vsel %vm269_vm0, %v3791_v3, 0  ;;  %v3271_v19 = vld [vmem:[%s3251_s18 + $0x10] sm:$0xff]   ;;  %v3292_v31 = vsel %vm269_vm0, %v3792_v2, 0  ;;  %vm2445_vm4 = vcmask 519168  }
  0x16   : >> { %v3787_v7 = vld [vmem:[#allocation9_spill] sm:$0xff]  ;;  %v3788_v6 = vld [vmem:[#allocation8_spill] sm:$0xff]  ;;  %3063 = vmatprep.subr.msk.bf16.mxu0 %vm269_vm0, %v3792_v2  ;;  %3064 = vmatprep.subr.msk.bf16.mxu1 %vm269_vm0, %v3791_v3  ;;  %v3114_v12 = vld [vmem:[%s3251_s18] sm:$0xff]   ;;  %v591_v26 = vrot.slane %v3271_v19, 1  ;;  %v518_v29 = vshll.u32 %v3271_v19, 16  ;;  %v516_v32 = vshrl.u32 %v3271_v19, 16 }
  0x17   : >> { %v3786_v8 = vld [vmem:[#allocation10_spill] sm:$0xff]  ;;  %v3259_v13 = vld [vmem:[%s3251_s18 + $0x8] sm:$0xff]   ;;  %2853 = vmatprep.mubr.msk.bf16.mxu1 %vm262_vm1, %v3114_v12  ;;  %v248_v15 = vshrl.u32 %v3114_v12, 16  ;;  %v250_v16 = vshll.u32 %v3114_v12, 16  ;;  %v3275_v21 = vld [vmem:[%s3251_s18 + $0x18] sm:$0xff]   ;;  %v379_v24 = vrot.slane %v3114_v12, 1 }
  0x18   : >> { %2854 = vmatmul.mubr.msk.bf16.vlgmr.msra.gmra.mxu1 %vm262_vm1, %v3259_v13  ;;  %v255_v17 = vshll.u32 %v3259_v13, 16  ;;  %v259_v18 = vshrl.u32 %v3259_v13, 16  ;;  %v3278_v22 = vld [vmem:[%s3251_s18 + $0x20] sm:$0xff]   ;;  %v380_v25 = vrot.slane %v3259_v13, 1  ;;  %v3287_v28 = vrot.slane %v3275_v21, 1  ;;  %v3296_v33 = vld [vmem:[%s3251_s18 + $0x28] sm:$0xff]  }
  0x19   : >> { %v252_v20 = vrot.slane %v250_v16, 1  ;;  %2864 = vmatpush3.bf16.msra.mxu1 %v3263_v14  ;;  %2865 = vmatprep.mubr.msk.bf16.mxu1 %vm262_vm1, %v3271_v19  ;;  %v520_v35 = vrot.slane %v518_v29, 1  ;;  %v522_v36 = vshll.u32 %v3275_v21, 16  ;;  %v730_v37 = vshll.u32 %v3278_v22, 16  ;;  %v3318_v44 = vld [vmem:[%s3251_s18 + $0x40] sm:$0xff]   ;;  %v3335_v51 = vld [vmem:[%s3251_s18 + $0x48] sm:$0xff]  }
  0x1a   : >> { %v257_v23 = vrot.slane %v255_v17, 1  ;;  %3066 = vmatprep.subr.msk.bf16.mxu1 %vm269_vm0, %v3789_v5  ;;  %v381_v38 = vsel %vm378_vm3, %v379_v24, %v380_v25  ;;  %v728_v39 = vshrl.u32 %v3278_v22, 16  ;;  %v734_v40 = vshll.u32 %v3296_v33, 16  ;;  %v3343_v55 = vld [vmem:[%s3251_s18 + $0x50] sm:$0xff]   ;;  %v3351_v59 = vld [vmem:[%s3251_s18 + $0x58] sm:$0xff]   ;;  %s2726_s19 = sshll.u32 %s3140_s17, 2 }
  0x1b   : >> { %v253_v27 = vor.u32 %v252_v20, %v248_v15  ;;  %v3308_v41 = vsel %vm269_vm0, %v3789_v5, 0  ;;  %v3312_v42 = vsel %vm378_vm3, %v591_v26, %v3287_v28  ;;  %v732_v43 = vrot.slane %v730_v37, 1  ;;  %s2509_s20 = scalar_lea.vmem %s3228_s16, %s2726_s19  ;;  %s187_s17 = sadd.s32 1, %s3140_s17  }
  0x1c   : >> { %v261_v30 = vor.u32 %v259_v18, %v257_v23  ;;  %v521_v45 = vor.u32 %v520_v35, %v516_v32  ;;  %v524_v46 = vrot.slane %v522_v36, 1  ;;  %v3325_v47 = vsel %vm269_vm0, %v3790_v4, 0  ;;  %p184_p4 = scmp.ge.s32.totalorder %s187_s17, 7  }
  0x1d   : >> { %v258_v34 = vsel %vm246_vm2, %v253_v27, %v257_v23  ;;  %v3332_v48 = vsel %vm269_vm0, %v3787_v7, 0  ;;  %v733_v49 = vor.u32 %v732_v43, %v728_v39  ;;  %v736_v50 = vrot.slane %v734_v40, 1  ;;  %v3454_v40 = vld [vmem:[%s3251_s18 + $0x30] sm:$0xff]  }
  0x1e   : >> { %2847 = vmatprep.mubr.msk.bf16.mxu0 %vm262_vm1, %v258_v34  ;;  %v526_v52 = vshrl.u32 %v3275_v21, 16  ;;  %v1778_v53 = vshrl.u32 %v3318_v44, 16  ;;  %v1780_v54 = vshll.u32 %v3318_v44, 16  ;;  %v1784_v56 = vshll.u32 %v3335_v51, 16 }
  0x1f   : >> { %2848 = vmatmul.mubr.msk.bf16.vlgmr.msra.gmra.mxu0 %vm262_vm1, %v261_v30  ;;  %v1850_v57 = vrot.slane %v3318_v44, 1  ;;  %v3348_v58 = vrot.slane %v3335_v51, 1  ;;  %v525_v60 = vsel %vm246_vm2, %v521_v45, %v524_v46  ;;  %v2371_v62 = vrot.slane %v3343_v55, 1 }
  0x20   : >> { %2858 = vmatpush3.bf16.msra.mxu0 %v3292_v31  ;;  %2866 = vmatmul.mubr.msk.bf16.vlgmr.msra.gmra.mxu1 %vm262_vm1, %v3275_v21  ;;  %v1782_v61 = vrot.slane %v1780_v54, 1  ;;  %v3356_v63 = vsel %vm246_vm2, %v733_v49, %v736_v50  ;;  %v3358_v12 = vrot.slane %v1784_v56, 1  ;;  %v2372_v15 = vrot.slane %v3351_v59, 1 }
  0x21   : >> { %2859 = vmatprep.mubr.msk.bf16.mxu0 %vm262_vm1, %v381_v38  ;;  %3065 = vmatprep.subr.msk.bf16.mxu0 %vm269_vm0, %v3790_v4  ;;  %v3362_v13 = vsel %vm378_vm3, %v1850_v57, %v3348_v58  ;;  %v2299_v17 = vshrl.u32 %v3343_v55, 16  ;;  %v2301_v18 = vshll.u32 %v3343_v55, 16  ;;  %v2305_v20 = vshll.u32 %v3351_v59, 16 }
  0x22   : >> { %2876 = vmatpush3.bf16.msra.mxu1 %v3308_v41  ;;  %2877 = vmatprep.mubr.msk.bf16.mxu1 %vm262_vm1, %v3312_v42  ;;  %v1783_v16 = vor.u32 %v1782_v61, %v1778_v53  ;;  %v738_v23 = vshrl.u32 %v3296_v33, 16  ;;  %v3376_v24 = vsel %vm378_vm3, %v2371_v62, %v2372_v15  ;;  %v528_v29 = vor.u32 %v526_v52, %v524_v46 }
  0x23   : >> { %3068 = vmatprep.subr.msk.bf16.mxu1 %vm269_vm0, %v3787_v7  ;;  %v2303_v26 = vrot.slane %v2301_v18, 1  ;;  %v3385_v27 = vrot.slane %v2305_v20, 1  ;;  %v3396_v34 = vsel %vm269_vm0, %v3788_v6, 0  ;;  %v803_v36 = vrot.slane %v3278_v22, 1 }
  0x24   : >> { %v3392_v32 = vor.u32 %v738_v23, %v736_v50  ;;  %v3414_v37 = vrot.slane %v3296_v33, 1  ;;  %v3420_v38 = vsel %vm269_vm0, %v3786_v8, 0  ;;  %v1257_v43 = vshrl.u32 %v3454_v40, 16 }
  0x25   : >> { %v2304_v30 = vor.u32 %v2303_v26, %v2299_v17  ;;  %vm2453_vm5 = vcmask 523268   ;;  %vm2496_vm6 = vcmask 1040384   ;;  %vm2499_vm7 = vcmask 1042432  }
  0x26   : >> { %v3424_v39 = vsel %vm378_vm3, %v803_v36, %v3414_v37  ;;  %vm2501_vm8 = vcmask 1043456   ;;  %vm2503_vm9 = vcmask 1044480   ;;  %vm2511_vm10 = vsmask.f32 3328 }
  0x27   : >> { %2860 = vmatmul.mubr.msk.bf16.vlgmr.msra.gmra.mxu0 %vm262_vm1, %v380_v25  ;;  %v3383_v25 = vsel %vm246_vm2, %v1783_v16, %v3358_v12  ;;  %v3400_v35 = vsel %vm246_vm2, %v2304_v30, %v3385_v27  ;;  %vm2505_vm11 = vcmask 1045504   ;;  %vm2512_vm12 = vmand %vm2445_vm4, %vm2511_vm10 }
  0x28   : >> { %2870 = vmatpush3.bf16.msra.mxu0 %v3325_v47  ;;  %2878 = vmatmul.mubr.msk.bf16.vlgmr.msra.gmra.mxu1 %vm262_vm1, %v3287_v28 }
  0x29   : >> { %2871 = vmatprep.mubr.msk.bf16.mxu0 %vm262_vm1, %v525_v60  ;;  %3067 = vmatprep.subr.msk.bf16.mxu0 %vm269_vm0, %v3788_v6 }
  0x2a   : >> { %2888 = vmatpush3.bf16.msra.mxu1 %v3332_v48  ;;  %2889 = vmatprep.mubr.msk.bf16.mxu1 %vm262_vm1, %v3356_v63 }
  0x2b   : >> { %3070 = vmatprep.subr.msk.bf16.mxu1 %vm269_vm0, %v3793_v1 }
  0x2f   : >> { %2872 = vmatmul.mubr.msk.bf16.vlgmr.msra.gmra.mxu0 %vm262_vm1, %v528_v29 }
  0x30   : >> { %2882 = vmatpush3.bf16.msra.mxu0 %v3396_v34  ;;  %2890 = vmatmul.mubr.msk.bf16.vlgmr.msra.gmra.mxu1 %vm262_vm1, %v3392_v32 }
  0x31   : >> { %2883 = vmatprep.mubr.msk.bf16.mxu0 %vm262_vm1, %v3278_v22  ;;  %3069 = vmatprep.subr.msk.bf16.mxu0 %vm269_vm0, %v3786_v8 }
  0x32   : >> { %2900 = vmatpush3.bf16.msra.mxu1 %v3245_v11  ;;  %2901 = vmatprep.mubr.msk.bf16.mxu1 %vm262_vm1, %v525_v60 }
  0x33   : >> { %3072 = vmatprep.subr.msk.bf16.mxu1 %vm269_vm0, %v3792_v2 }
  0x37   : >> { %2884 = vmatmul.mubr.msk.bf16.vlgmr.msra.gmra.mxu0 %vm262_vm1, %v3296_v33 }
  0x38   : >> { %2894 = vmatpush3.bf16.msra.mxu0 %v3420_v38  ;;  %2902 = vmatmul.mubr.msk.bf16.vlgmr.msra.gmra.mxu1 %vm262_vm1, %v528_v29 }
  0x39   : >> { %2895 = vmatprep.mubr.msk.bf16.mxu0 %vm262_vm1, %v3424_v39  ;;  %3071 = vmatprep.subr.msk.bf16.mxu0 %vm269_vm0, %v3794_v0 }
  0x3a   : >> { %2912 = vmatpush3.bf16.msra.mxu1 %v3292_v31  ;;  %2913 = vmatprep.mubr.msk.bf16.mxu1 %vm262_vm1, %v3312_v42 }
  0x3b   : >> { %3074 = vmatprep.subr.msk.bf16.mxu1 %vm269_vm0, %v3790_v4 }
  0x3f   : >> { %2896 = vmatmul.mubr.msk.bf16.vlgmr.msra.gmra.mxu0 %vm262_vm1, %v3414_v37 }
  0x40   : >> { %2906 = vmatpush3.bf16.msra.mxu0 %v3239_v10  ;;  %2914 = vmatmul.mubr.msk.bf16.vlgmr.msra.gmra.mxu1 %vm262_vm1, %v3287_v28  ;;  %v1329_v28 = vrot.slane %v3454_v40, 1 }
  0x41   : >> { %2907 = vmatprep.mubr.msk.bf16.mxu0 %vm262_vm1, %v3271_v19  ;;  %3073 = vmatprep.subr.msk.bf16.mxu0 %vm269_vm0, %v3791_v3  ;;  %v3466_v19 = vld [vmem:[%s3251_s18 + $0x38] sm:$0xff]  }
  0x42   : >> { %2924 = vmatpush3.bf16.msra.mxu1 %v3325_v47  ;;  %2925 = vmatprep.mubr.msk.bf16.mxu1 %vm262_vm1, %v3356_v63  ;;  %v3476_v42 = vrot.slane %v3466_v19, 1  ;;  %v1263_v46 = vshll.u32 %v3466_v19, 16  ;;  %v1267_v54 = vshrl.u32 %v3466_v19, 16 }
  0x43   : >> { %3076 = vmatprep.subr.msk.bf16.mxu1 %vm269_vm0, %v3788_v6 }
  0x44   : >> { %v1331_v49 = vsel %vm378_vm3, %v1329_v28, %v3476_v42  ;;  %v1265_v52 = vrot.slane %v1263_v46, 1 }
  0x46   : >> { %v1269_v56 = vor.u32 %v1267_v54, %v1265_v52 }
  0x47   : >> { %2908 = vmatmul.mubr.msk.bf16.vlgmr.msra.gmra.mxu0 %vm262_vm1, %v3275_v21  ;;  %v1259_v21 = vshll.u32 %v3454_v40, 16 }
  0x48   : >> { %2918 = vmatpush3.bf16.msra.mxu0 %v3263_v14  ;;  %2926 = vmatmul.mubr.msk.bf16.vlgmr.msra.gmra.mxu1 %vm262_vm1, %v3392_v32 }
  0x49   : >> { %2919 = vmatprep.mubr.msk.bf16.mxu0 %vm262_vm1, %v3278_v22  ;;  %3075 = vmatprep.subr.msk.bf16.mxu0 %vm269_vm0, %v3789_v5  ;;  %v1261_v45 = vrot.slane %v1259_v21, 1 }
  0x4a   : >> { %2936 = vmatpush3.bf16.msra.mxu1 %v3396_v34  ;;  %2937 = vmatprep.mubr.msk.bf16.mxu1 %vm262_vm1, %v3454_v40 }
  0x4b   : >> { %3078 = vmatprep.subr.msk.bf16.mxu1 %vm269_vm0, %v3786_v8  ;;  %v1262_v50 = vor.u32 %v1261_v45, %v1257_v43 }
  0x4d   : >> { %v1266_v53 = vsel %vm246_vm2, %v1262_v50, %v1265_v52 }
  0x4f   : >> { %2920 = vmatmul.mubr.msk.bf16.vlgmr.msra.gmra.mxu0 %vm262_vm1, %v3296_v33 }
  0x50   : >> { %2930 = vmatpush3.bf16.msra.mxu0 %v3308_v41  ;;  %2938 = vmatmul.mubr.msk.bf16.vlgmr.msra.gmra.mxu1 %vm262_vm1, %v3466_v19 }
  0x51   : >> { %2931 = vmatprep.mubr.msk.bf16.mxu0 %vm262_vm1, %v3424_v39  ;;  %3077 = vmatprep.subr.msk.bf16.mxu0 %vm269_vm0, %v3787_v7 }
  0x52   : >> { %2948 = vmatpush3.bf16.msra.mxu1 %v3420_v38  ;;  %2949 = vmatprep.mubr.msk.bf16.mxu1 %vm262_vm1, %v1331_v49 }
  0x53   : >> { %3080 = vmatprep.subr.msk.bf16.mxu1 %vm269_vm0, %v3794_v0 }
  0x57   : >> { %2932 = vmatmul.mubr.msk.bf16.vlgmr.msra.gmra.mxu0 %vm262_vm1, %v3414_v37 }
  0x58   : >> { %2942 = vmatpush3.bf16.msra.mxu0 %v3332_v48  ;;  %2950 = vmatmul.mubr.msk.bf16.vlgmr.msra.gmra.mxu1 %vm262_vm1, %v3476_v42 }
  0x59   : >> { %2943 = vmatprep.mubr.msk.bf16.mxu0 %vm262_vm1, %v1266_v53  ;;  %3079 = vmatprep.subr.msk.bf16.mxu0 %vm269_vm0, %v3793_v1 }
  0x5a   : >> { %2960 = vmatpush3.bf16.msra.mxu1 %v3239_v10  ;;  %2961 = vmatprep.mubr.msk.bf16.mxu1 %vm262_vm1, %v3278_v22  ;;  %v1788_v22 = vshrl.u32 %v3335_v51, 16 }
  0x5b   : >> { %3082 = vmatprep.subr.msk.bf16.mxu1 %vm269_vm0, %v3791_v3 }
  0x5f   : >> { %2944 = vmatmul.mubr.msk.bf16.vlgmr.msra.gmra.mxu0 %vm262_vm1, %v1269_v56 }
  0x60   : >> { %2954 = vmatpush3.bf16.msra.mxu0 %v3245_v11  ;;  %2962 = vmatmul.mubr.msk.bf16.vlgmr.msra.gmra.mxu1 %vm262_vm1, %v3296_v33  ;;  %v1790_v33 = vor.u32 %v1788_v22, %v3358_v12 }
  0x61   : >> { %2955 = vmatprep.mubr.msk.bf16.mxu0 %vm262_vm1, %v3356_v63  ;;  %3081 = vmatprep.subr.msk.bf16.mxu0 %vm269_vm0, %v3792_v2 }
  0x62   : >> { %2972 = vmatpush3.bf16.msra.mxu1 %v3263_v14  ;;  %2973 = vmatprep.mubr.msk.bf16.mxu1 %vm262_vm1, %v3454_v40 }
  0x63   : >> { %3084 = vmatprep.subr.msk.bf16.mxu1 %vm269_vm0, %v3789_v5 }
  0x67   : >> { %2956 = vmatmul.mubr.msk.bf16.vlgmr.msra.gmra.mxu0 %vm262_vm1, %v3392_v32 }
  0x68   : >> { %2966 = vmatpush3.bf16.msra.mxu0 %v3292_v31  ;;  %2974 = vmatmul.mubr.msk.bf16.vlgmr.msra.gmra.mxu1 %vm262_vm1, %v3466_v19 }
  0x69   : >> { %2967 = vmatprep.mubr.msk.bf16.mxu0 %vm262_vm1, %v3424_v39  ;;  %3083 = vmatprep.subr.msk.bf16.mxu0 %vm269_vm0, %v3790_v4 }
  0x6a   : >> { %2984 = vmatpush3.bf16.msra.mxu1 %v3308_v41  ;;  %2985 = vmatprep.mubr.msk.bf16.mxu1 %vm262_vm1, %v1331_v49 }
  0x6b   : >> { %3086 = vmatprep.subr.msk.bf16.mxu1 %vm269_vm0, %v3787_v7 }
  0x6f   : >> { %2968 = vmatmul.mubr.msk.bf16.vlgmr.msra.gmra.mxu0 %vm262_vm1, %v3414_v37 }
  0x70   : >> { %2978 = vmatpush3.bf16.msra.mxu0 %v3325_v47  ;;  %2986 = vmatmul.mubr.msk.bf16.vlgmr.msra.gmra.mxu1 %vm262_vm1, %v3476_v42 }
  0x71   : >> { %2979 = vmatprep.mubr.msk.bf16.mxu0 %vm262_vm1, %v1266_v53  ;;  %3085 = vmatprep.subr.msk.bf16.mxu0 %vm269_vm0, %v3788_v6 }
  0x72   : >> { %2996 = vmatpush3.bf16.msra.mxu1 %v3332_v48  ;;  %2997 = vmatprep.mubr.msk.bf16.mxu1 %vm262_vm1, %v3383_v25 }
  0x73   : >> { %3088 = vmatprep.subr.msk.bf16.mxu1 %vm269_vm0, %v3793_v1 }
  0x77   : >> { %2980 = vmatmul.mubr.msk.bf16.vlgmr.msra.gmra.mxu0 %vm262_vm1, %v1269_v56 }
  0x78   : >> { %2990 = vmatpush3.bf16.msra.mxu0 %v3396_v34  ;;  %2998 = vmatmul.mubr.msk.bf16.vlgmr.msra.gmra.mxu1 %vm262_vm1, %v1790_v33 }
  0x79   : >> { %2991 = vmatprep.mubr.msk.bf16.mxu0 %vm262_vm1, %v3318_v44  ;;  %3087 = vmatprep.subr.msk.bf16.mxu0 %vm269_vm0, %v3786_v8 }
  0x7a   : >> { %3008 = vmatpush3.bf16.msra.mxu1 %v3245_v11  ;;  %3009 = vmatprep.mubr.msk.bf16.mxu1 %vm262_vm1, %v1266_v53 }
  0x7b   : >> { %3090 = vmatprep.subr.msk.bf16.mxu1 %vm269_vm0, %v3792_v2 }
  0x7f   : >> { %2992 = vmatmul.mubr.msk.bf16.vlgmr.msra.gmra.mxu0 %vm262_vm1, %v3335_v51 }
  0x80   : >> { %3002 = vmatpush3.bf16.msra.mxu0 %v3420_v38  ;;  %3010 = vmatmul.mubr.msk.bf16.vlgmr.msra.gmra.mxu1 %vm262_vm1, %v1269_v56 }
  0x81   : >> { %3003 = vmatprep.mubr.msk.bf16.mxu0 %vm262_vm1, %v3362_v13  ;;  %3089 = vmatprep.subr.msk.bf16.mxu0 %vm269_vm0, %v3794_v0 }
  0x82   : >> { %3020 = vmatpush3.bf16.msra.mxu1 %v3292_v31  ;;  %3021 = vmatprep.mubr.msk.bf16.mxu1 %vm262_vm1, %v1331_v49 }
  0x83   : >> { %3092 = vmatprep.subr.msk.bf16.mxu1 %vm269_vm0, %v3790_v4 }
  0x87   : >> { %3004 = vmatmul.mubr.msk.bf16.vlgmr.msra.gmra.mxu0 %vm262_vm1, %v3348_v58 }
  0x88   : >> { %3014 = vmatpush3.bf16.msra.mxu0 %v3239_v10  ;;  %3022 = vmatmul.mubr.msk.bf16.vlgmr.msra.gmra.mxu1 %vm262_vm1, %v3476_v42  ;;  %v2309_v10 = vshrl.u32 %v3351_v59, 16 }
  0x89   : >> { %3015 = vmatprep.mubr.msk.bf16.mxu0 %vm262_vm1, %v3454_v40  ;;  %3091 = vmatprep.subr.msk.bf16.mxu0 %vm269_vm0, %v3791_v3 }
  0x8a   : >> { %3032 = vmatpush3.bf16.msra.mxu1 %v3325_v47  ;;  %3033 = vmatprep.mubr.msk.bf16.mxu1 %vm262_vm1, %v3383_v25  ;;  %v2311_v11 = vor.u32 %v2309_v10, %v3385_v27 }
  0x8b   : >> { %3094 = vmatprep.subr.msk.bf16.mxu1 %vm269_vm0, %v3788_v6 }
  0x8f   : >> { %3016 = vmatmul.mubr.msk.bf16.vlgmr.msra.gmra.mxu0 %vm262_vm1, %v3466_v19 }
  0x90   : >> { %3026 = vmatpush3.bf16.msra.mxu0 %v3263_v14  ;;  %3034 = vmatmul.mubr.msk.bf16.vlgmr.msra.gmra.mxu1 %vm262_vm1, %v1790_v33 }
  0x91   : >> { %3027 = vmatprep.mubr.msk.bf16.mxu0 %vm262_vm1, %v3318_v44  ;;  %3093 = vmatprep.subr.msk.bf16.mxu0 %vm269_vm0, %v3789_v5 }
  0x92   : >> { %3044 = vmatpush3.bf16.msra.mxu1 %v3396_v34  ;;  %3045 = vmatprep.mubr.msk.bf16.mxu1 %vm262_vm1, %v3343_v55 }
  0x93   : >> { %3096 = vmatprep.subr.msk.bf16.mxu1 %vm269_vm0, %v3786_v8 }
  0x97   : >> { %3028 = vmatmul.mubr.msk.bf16.vlgmr.msra.gmra.mxu0 %vm262_vm1, %v3335_v51 }
  0x98   : >> { %3038 = vmatpush3.bf16.msra.mxu0 %v3308_v41  ;;  %3046 = vmatmul.mubr.msk.bf16.vlgmr.msra.gmra.mxu1 %vm262_vm1, %v3351_v59 }
  0x99   : >> { %3039 = vmatprep.mubr.msk.bf16.mxu0 %vm262_vm1, %v3362_v13  ;;  %3095 = vmatprep.subr.msk.bf16.mxu0 %vm269_vm0, %v3787_v7 }
  0x9a   : >> { %3056 = vmatpush3.bf16.msra.mxu1 %v3420_v38  ;;  %3057 = vmatprep.mubr.msk.bf16.mxu1 %vm262_vm1, %v3376_v24 }
  0x9f   : >> { %3040 = vmatmul.mubr.msk.bf16.vlgmr.msra.gmra.mxu0 %vm262_vm1, %v3348_v58 }
  0xa0   : >> { %3050 = vmatpush3.bf16.msra.mxu0 %v3332_v48  ;;  %3058 = vmatmul.mubr.msk.bf16.vlgmr.msra.gmra.mxu1 %vm262_vm1, %v2372_v15 }
  0xa1   : >> { %3051 = vmatprep.mubr.msk.bf16.mxu0 %vm262_vm1, %v3400_v35 }
  0xa7   : >> { %3052 = vmatmul.mubr.msk.bf16.vlgmr.msra.gmra.mxu0 %vm262_vm1, %v2311_v11 }
  0xd8   : >> { %v2855_v14 = vpop.f32.mrf.mxu1 }
  0xda   : >> { %v363_v31 = vpop.f32.mrf.mxu1 }
  0xdc   : >> { %v2856_v41 = vpop.f32.mrf.mxu1 }
  0xde   : >> { %v366_v44 = vpop.f32.mrf.mxu1 }
  0xdf   : >> { %v2849_v47 = vpop.f32.mrf.mxu0 }
  0xe0   : >> { %v372_v51 = vadd.f32 %v2855_v14, %v2849_v47  ;;  %v2867_v55 = vpop.f32.mrf.mxu1 }
  0xe1   : >> { %v307_v57 = vpop.f32.mrf.mxu0 }
  0xe2   : >> { %v364_v48 = vadd.f32 %v363_v31, %v307_v57  ;;  %v497_v58 = vpop.f32.mrf.mxu1 }
  0xe3   : >> { %v2850_v59 = vpop.f32.mrf.mxu0 }
  0xe4   : >> { %v375_v60 = vadd.f32 %v2856_v41, %v2850_v59  ;;  %v2868_v61 = vpop.f32.mrf.mxu1 }
  0xe5   : >> { %v310_v62 = vpop.f32.mrf.mxu0 }
  0xe6   : >> { %v367_v63 = vadd.f32 %v366_v44, %v310_v62  ;;  %v500_v12 = vpop.f32.mrf.mxu1 }
  0xe7   : >> { %v2861_v13 = vpop.f32.mrf.mxu0 }
  0xe8   : >> { %v442_v15 = vadd.f32 %v2861_v13, %v372_v51  ;;  %v2879_v16 = vpop.f32.mrf.mxu1 }
  0xe9   : >> { %v425_v17 = vpop.f32.mrf.mxu0 }
  0xea   : >> { %v440_v18 = vadd.f32 %v425_v17, %v364_v48  ;;  %v637_v20 = vpop.f32.mrf.mxu1  ;;  %v514_v23 = vadd.f32 %v2867_v55, %v442_v15 }
  0xeb   : >> { %v2862_v24 = vpop.f32.mrf.mxu0 }
  0xec   : >> { %v443_v25 = vadd.f32 %v2862_v24, %v375_v60  ;;  %v2880_v26 = vpop.f32.mrf.mxu1  ;;  %v512_v27 = vadd.f32 %v497_v58, %v440_v18 }
  0xed   : >> { %v428_v29 = vpop.f32.mrf.mxu0 }
  0xee   : >> { %v441_v30 = vadd.f32 %v428_v29, %v367_v63  ;;  %v640_v32 = vpop.f32.mrf.mxu1  ;;  %v515_v34 = vadd.f32 %v2868_v61, %v443_v25 }
  0xef   : >> { %v2873_v35 = vpop.f32.mrf.mxu0 }
  0xf0   : >> { %v589_v36 = vadd.f32 %v2873_v35, %v514_v23  ;;  %v2891_v37 = vpop.f32.mrf.mxu1  ;;  %v513_v38 = vadd.f32 %v500_v12, %v441_v30 }
  0xf1   : >> { %v572_v39 = vpop.f32.mrf.mxu0 }
  0xf2   : >> { %v587_v40 = vadd.f32 %v572_v39, %v512_v27  ;;  %v784_v19 = vpop.f32.mrf.mxu1  ;;  %v654_v21 = vadd.f32 %v2879_v16, %v589_v36 }
  0xf3   : >> { %v2874_v28 = vpop.f32.mrf.mxu0 }
  0xf4   : >> { %v590_v42 = vadd.f32 %v2874_v28, %v515_v34  ;;  %v2892_v43 = vpop.f32.mrf.mxu1  ;;  %v652_v45 = vadd.f32 %v637_v20, %v587_v40 }
  0xf5   : >> { %v575_v46 = vpop.f32.mrf.mxu0 }
  0xf6   : >> { %v588_v49 = vadd.f32 %v575_v46, %v513_v38  ;;  %v787_v50 = vpop.f32.mrf.mxu1  ;;  %v655_v52 = vadd.f32 %v2880_v26, %v590_v42 }
  0xf7   : >> { %v2885_v53 = vpop.f32.mrf.mxu0 }
  0xf8   : >> { %v726_v54 = vadd.f32 %v2885_v53, %v654_v21  ;;  %v2903_v56 = vpop.f32.mrf.mxu1  ;;  %v653_v22 = vadd.f32 %v640_v32, %v588_v49 }
  0xf9   : >> { %v709_v33 = vpop.f32.mrf.mxu0 }
  0xfa   : >> { %v724_v10 = vadd.f32 %v709_v33, %v652_v45  ;;  %v912_v11 = vpop.f32.mrf.mxu1  ;;  %v801_v14 = vadd.f32 %v2891_v37, %v726_v54 }
  0xfb   : >> { %v2886_v31 = vpop.f32.mrf.mxu0 }
  0xfc   : >> { %v727_v41 = vadd.f32 %v2886_v31, %v655_v52  ;;  %v2904_v44 = vpop.f32.mrf.mxu1  ;;  %v799_v47 = vadd.f32 %v784_v19, %v724_v10 }
  0xfd   : >> { %v712_v51 = vpop.f32.mrf.mxu0 }
  0xfe   : >> { %v725_v55 = vadd.f32 %v712_v51, %v653_v22  ;;  %v915_v57 = vpop.f32.mrf.mxu1  ;;  %v802_v48 = vadd.f32 %v2892_v43, %v727_v41 }
  0xff   : >> { %v2897_v58 = vpop.f32.mrf.mxu0 }
 0x100   : >> { %v3624_v59 = vadd.f32 %v2897_v58, %v801_v14  ;;  %v2915_v60 = vpop.f32.mrf.mxu1  ;;  %v800_v61 = vadd.f32 %v787_v50, %v725_v55 }
 0x101   : >> { %v849_v62 = vpop.f32.mrf.mxu0 }
 0x102   : >> { %v3626_v63 = vadd.f32 %v849_v62, %v799_v47  ;;  %v1010_v12 = vpop.f32.mrf.mxu1 }
 0x103   : >> { %v2898_v13 = vpop.f32.mrf.mxu0 }
 0x104   : >> { %v3628_v15 = vadd.f32 %v2898_v13, %v802_v48  ;;  %v2916_v16 = vpop.f32.mrf.mxu1 }
 0x105   : >> { %v852_v17 = vpop.f32.mrf.mxu0 }
 0x106   : >> { %v3630_v18 = vadd.f32 %v852_v17, %v800_v61  ;;  %v1013_v20 = vpop.f32.mrf.mxu1 }
 0x107   : >> { %v2909_v23 = vpop.f32.mrf.mxu0 }
 0x108   : >> { %v970_v24 = vadd.f32 %v2909_v23, %v2903_v56  ;;  %v2927_v25 = vpop.f32.mrf.mxu1 }
 0x109   : >> { %v961_v26 = vpop.f32.mrf.mxu0 }
 0x10a   : >> { %v962_v27 = vadd.f32 %v961_v26, %v912_v11  ;;  %v1116_v29 = vpop.f32.mrf.mxu1  ;;  %v1027_v30 = vadd.f32 %v2915_v60, %v970_v24 }
 0x10b   : >> { %v2910_v32 = vpop.f32.mrf.mxu0 }
 0x10c   : >> { %v973_v34 = vadd.f32 %v2910_v32, %v2904_v44  ;;  %v2928_v35 = vpop.f32.mrf.mxu1  ;;  %v1025_v36 = vadd.f32 %v1010_v12, %v962_v27 }
 0x10d   : >> { %v964_v37 = vpop.f32.mrf.mxu0 }
 0x10e   : >> { %v965_v38 = vadd.f32 %v964_v37, %v915_v57  ;;  %v1119_v39 = vpop.f32.mrf.mxu1  ;;  %v1028_v40 = vadd.f32 %v2916_v16, %v973_v34  ;;  %v3647_v37 = vadd.f32 %v3218_v9, %v3626_v63 }
 0x10f   : >> { %v2921_v19 = vpop.f32.mrf.mxu0 }
 0x110   : >> { %v1080_v21 = vadd.f32 %v2921_v19, %v1027_v30  ;;  %v2939_v28 = vpop.f32.mrf.mxu1  ;;  %v1026_v42 = vadd.f32 %v1013_v20, %v965_v38  ;;  %v3638_v30 = vadd.f32 %v3218_v9, %v3624_v59  ;;  %3797 = vst [vmem:[#allocation13_spill] sm:$0xff] %v3647_v37 }
 0x111   : >> { %v1063_v43 = vpop.f32.mrf.mxu0 }
 0x112   : >> { %v1078_v45 = vadd.f32 %v1063_v43, %v1025_v36  ;;  %v1238_v46 = vpop.f32.mrf.mxu1  ;;  %v1133_v49 = vadd.f32 %v2927_v25, %v1080_v21  ;;  %3795 = vst [vmem:[#allocation11_spill] sm:$0xff] %v3638_v30 }
 0x113   : >> { %v2922_v50 = vpop.f32.mrf.mxu0 }
 0x114   : >> { %v1081_v52 = vadd.f32 %v2922_v50, %v1028_v40  ;;  %v2940_v53 = vpop.f32.mrf.mxu1  ;;  %v1131_v54 = vadd.f32 %v1116_v29, %v1078_v45  ;;  %v3667_v50 = vadd.f32 %v3218_v9, %v3630_v18 }
 0x115   : >> { %v1066_v56 = vpop.f32.mrf.mxu0 }
 0x116   : >> { %v1079_v22 = vadd.f32 %v1066_v56, %v1026_v42  ;;  %v1241_v33 = vpop.f32.mrf.mxu1  ;;  %v1134_v10 = vadd.f32 %v2928_v35, %v1081_v52  ;;  %v3658_v42 = vadd.f32 %v3218_v9, %v3628_v15  ;;  %3801 = vst [vmem:[#allocation17_spill] sm:$0xff] %v3667_v50 }
 0x117   : >> { %v2933_v11 = vpop.f32.mrf.mxu0 }
 0x118   : >> { %v1186_v14 = vadd.f32 %v2933_v11, %v1133_v49  ;;  %v2951_v31 = vpop.f32.mrf.mxu1  ;;  %v1132_v41 = vadd.f32 %v1119_v39, %v1079_v22  ;;  %3799 = vst [vmem:[#allocation15_spill] sm:$0xff] %v3658_v42 }
 0x119   : >> { %v1169_v44 = vpop.f32.mrf.mxu0 }
 0x11a   : >> { %v1184_v47 = vadd.f32 %v1169_v44, %v1131_v54  ;;  %v1372_v51 = vpop.f32.mrf.mxu1  ;;  %v1255_v55 = vadd.f32 %v2939_v28, %v1186_v14 }
 0x11b   : >> { %v2934_v57 = vpop.f32.mrf.mxu0 }
 0x11c   : >> { %v1187_v48 = vadd.f32 %v2934_v57, %v1134_v10  ;;  %v2952_v58 = vpop.f32.mrf.mxu1  ;;  %v1253_v60 = vadd.f32 %v1238_v46, %v1184_v47 }
 0x11d   : >> { %v1172_v61 = vpop.f32.mrf.mxu0 }
 0x11e   : >> { %v1185_v62 = vadd.f32 %v1172_v61, %v1132_v41  ;;  %v1375_v12 = vpop.f32.mrf.mxu1  ;;  %v1256_v13 = vadd.f32 %v2940_v53, %v1187_v48 }
 0x11f   : >> { %v2945_v16 = vpop.f32.mrf.mxu0 }
 0x120   : >> { %v1327_v17 = vadd.f32 %v2945_v16, %v1255_v55  ;;  %v3632_v20 = vpop.f32.mrf.mxu1  ;;  %v1254_v23 = vadd.f32 %v1241_v33, %v1185_v62 }
 0x121   : >> { %v1310_v24 = vpop.f32.mrf.mxu0 }
 0x122   : >> { %v1389_v25 = vadd.f32 %v2951_v31, %v1327_v17  ;;  %v1325_v26 = vadd.f32 %v1310_v24, %v1253_v60  ;;  %v3634_v27 = vpop.f32.mrf.mxu1 }
 0x123   : >> { %v2946_v29 = vpop.f32.mrf.mxu0 }
 0x124   : >> { %v3641_v32 = vadd.f32 %v3218_v9, %v1389_v25  ;;  %v1387_v34 = vadd.f32 %v1372_v51, %v1325_v26  ;;  %v1328_v35 = vadd.f32 %v2946_v29, %v1256_v13  ;;  %v3643_v36 = vpop.f32.mrf.mxu1 }
 0x125   : >> { %v1313_v38 = vpop.f32.mrf.mxu0 }
 0x126   : >> { %3796 = vst [vmem:[#allocation12_spill] sm:$0xff] %v3641_v32  ;;  %v3650_v39 = vadd.f32 %v3218_v9, %v1387_v34  ;;  %v1390_v40 = vadd.f32 %v2952_v58, %v1328_v35  ;;  %v1326_v19 = vadd.f32 %v1313_v38, %v1254_v23  ;;  %v3652_v21 = vpop.f32.mrf.mxu1 }
 0x127   : >> { %v2957_v28 = vpop.f32.mrf.mxu0 }
 0x128   : >> { %3798 = vst [vmem:[#allocation14_spill] sm:$0xff] %v3650_v39  ;;  %v3661_v43 = vadd.f32 %v3218_v9, %v1390_v40  ;;  %v1388_v63 = vadd.f32 %v1375_v12, %v1326_v19  ;;  %v2975_v45 = vpop.f32.mrf.mxu1  ;;  %v1491_v46 = vadd.f32 %v3632_v20, %v2957_v28 }
 0x129   : >> { %v1433_v49 = vpop.f32.mrf.mxu0 }
 0x12a   : >> { %3800 = vst [vmem:[#allocation16_spill] sm:$0xff] %v3661_v43  ;;  %v3670_v52 = vadd.f32 %v3218_v9, %v1388_v63  ;;  %v1584_v53 = vpop.f32.mrf.mxu1  ;;  %v1483_v1 = vadd.f32 %v3634_v27, %v1433_v49 }
 0x12b   : >> { %v2958_v54 = vpop.f32.mrf.mxu0 }
 0x12c   : >> { %3802 = vst [vmem:[#allocation18_spill] sm:$0xff] %v3670_v52  ;;  %v2976_v56 = vpop.f32.mrf.mxu1  ;;  %v1494_v5 = vadd.f32 %v3643_v36, %v2958_v54 }
 0x12d   : >> { %v1436_v33 = vpop.f32.mrf.mxu0 }
 0x12e   : >> { %v3676_v10 = vpop.f32.mrf.mxu1  ;;  %v1486_v37 = vadd.f32 %v3652_v21, %v1436_v33 }
 0x12f   : >> { %v2969_v11 = vpop.f32.mrf.mxu0 }
 0x130   : >> { %v2987_v14 = vpop.f32.mrf.mxu1  ;;  %v1548_v2 = vadd.f32 %v2969_v11, %v1491_v46 }
 0x131   : >> { %v1531_v31 = vpop.f32.mrf.mxu0 }
 0x132   : >> { %v3678_v18 = vpop.f32.mrf.mxu1  ;;  %v1546_v6 = vadd.f32 %v1531_v31, %v1483_v1  ;;  %v1601_v50 = vadd.f32 %v2975_v45, %v1548_v2 }
 0x133   : >> { %v2970_v41 = vpop.f32.mrf.mxu0 }
 0x134   : >> { %v3680_v44 = vpop.f32.mrf.mxu1  ;;  %v1549_v52 = vadd.f32 %v2970_v41, %v1494_v5  ;;  %v1599_v28 = vadd.f32 %v1584_v53, %v1546_v6 }
 0x135   : >> { %v1534_v47 = vpop.f32.mrf.mxu0 }
 0x136   : >> { %v3682_v51 = vpop.f32.mrf.mxu1  ;;  %v1547_v46 = vadd.f32 %v1534_v47, %v1486_v37  ;;  %v1602_v11 = vadd.f32 %v2976_v56, %v1549_v52 }
 0x137   : >> { %v2981_v55 = vpop.f32.mrf.mxu0 }
 0x138   : >> { %v3684_v57 = vpop.f32.mrf.mxu1  ;;  %v1654_v20 = vadd.f32 %v2981_v55, %v1601_v50  ;;  %v1600_v21 = vadd.f32 %v3676_v10, %v1547_v46 }
 0x139   : >> { %v1637_v48 = vpop.f32.mrf.mxu0 }
 0x13a   : >> { %v3686_v58 = vpop.f32.mrf.mxu1  ;;  %v1652_v49 = vadd.f32 %v1637_v48, %v1599_v28  ;;  %v1707_v5 = vadd.f32 %v2987_v14, %v1654_v20 }
 0x13b   : >> { %v2982_v60 = vpop.f32.mrf.mxu0 }
 0x13c   : >> { %v3688_v61 = vpop.f32.mrf.mxu1  ;;  %v1655_v31 = vadd.f32 %v2982_v60, %v1602_v11 }
 0x13d   : >> { %v1640_v62 = vpop.f32.mrf.mxu0 }
 0x13e   : >> { %v3690_v12 = vpop.f32.mrf.mxu1  ;;  %v1653_v52 = vadd.f32 %v1640_v62, %v1600_v21 }
 0x13f   : >> { %v2993_v13 = vpop.f32.mrf.mxu0 }
 0x140   : >> { %v3011_v16 = vpop.f32.mrf.mxu1  ;;  %v1776_v6 = vadd.f32 %v2993_v13, %v1707_v5 }
 0x141   : >> { %v1759_v17 = vpop.f32.mrf.mxu0 }
 0x142   : >> { %v1954_v23 = vpop.f32.mrf.mxu1 }
 0x143   : >> { %v2994_v24 = vpop.f32.mrf.mxu0 }
 0x144   : >> { %v3012_v25 = vpop.f32.mrf.mxu1 }
 0x145   : >> { %v3692_v26 = vpop.f32.mrf.mxu0 }
 0x146   : >> { %v1957_v29 = vpop.f32.mrf.mxu1 }
 0x147   : >> { %v3694_v34 = vpop.f32.mrf.mxu0 }
 0x148   : >> { %v3023_v35 = vpop.f32.mrf.mxu1 }
 0x149   : >> { %v3696_v38 = vpop.f32.mrf.mxu0 }
 0x14a   : >> { %v2052_v40 = vpop.f32.mrf.mxu1 }
 0x14b   : >> { %v3698_v19 = vpop.f32.mrf.mxu0 }
 0x14c   : >> { %v3024_v63 = vpop.f32.mrf.mxu1 }
 0x14d   : >> { %v3700_v22 = vpop.f32.mrf.mxu0 }
 0x14e   : >> { %3803 = vst [vmem:[#allocation19_spill] sm:$0xff] %v3700_v22  ;;  %v2055_v15 = vpop.f32.mrf.mxu1 }
 0x14f   : >> { %v3017_v59 = vpop.f32.mrf.mxu0 }
 0x150   : >> { %v3035_v0 = vpop.f32.mrf.mxu1  ;;  %v2012_v42 = vadd.f32 %v3017_v59, %v3011_v16 }
 0x151   : >> { %v2003_v3 = vpop.f32.mrf.mxu0 }
 0x152   : >> { %v2158_v4 = vpop.f32.mrf.mxu1  ;;  %v2004_v32 = vadd.f32 %v2003_v3, %v1954_v23  ;;  %v2069_v1 = vadd.f32 %v3023_v35, %v2012_v42  ;;  %v1705_v3 = vadd.f32 %v3678_v18, %v1652_v49  ;;  %v1706_v18 = vadd.f32 %v3682_v51, %v1653_v52  ;;  %v3804_v49 = vld [vmem:[#allocation11_spill] sm:$0xff] }
 0x153   : >> { %v3018_v7 = vpop.f32.mrf.mxu0  ;;  %v3811_v52 = vld [vmem:[#allocation15_spill] sm:$0xff] }
 0x154   : >> { %v3036_v8 = vpop.f32.mrf.mxu1  ;;  %v2015_v36 = vadd.f32 %v3018_v7, %v3012_v25  ;;  %v2067_v41 = vadd.f32 %v2052_v40, %v2004_v32  ;;  %v1774_v56 = vadd.f32 %v1759_v17, %v1705_v3  ;;  %v1708_v7 = vadd.f32 %v3680_v44, %v1655_v31 }
 0x155   : >> { %v2006_v43 = vpop.f32.mrf.mxu0  ;;  %v1848_v32 = vadd.f32 %v3684_v57, %v1776_v6 }
 0x156   : >> { %v2161_v39 = vpop.f32.mrf.mxu1  ;;  %v2007_v45 = vadd.f32 %v2006_v43, %v1957_v29  ;;  %v2070_v53 = vadd.f32 %v3024_v63, %v2015_v36  ;;  %v1846_v62 = vadd.f32 %v3686_v58, %v1774_v56  ;;  %v3812_v56 = vld [vmem:[#allocation16_spill] sm:$0xff] }
 0x157   : >> { %v3029_v22 = vpop.f32.mrf.mxu0 }
 0x158   : >> { %v3047_v27 = vpop.f32.mrf.mxu1  ;;  %v2122_v59 = vadd.f32 %v3029_v22, %v2069_v1  ;;  %v2068_v47 = vadd.f32 %v2055_v15, %v2007_v45  ;;  %v1777_v22 = vadd.f32 %v2994_v24, %v1708_v7  ;;  %v1775_v15 = vadd.f32 %v3692_v26, %v1706_v18  ;;  %v3814_v18 = vld [vmem:[#allocation17_spill] sm:$0xff] }
 0x159   : >> { %v2105_v30 = vpop.f32.mrf.mxu0  ;;  %v3813_v7 = vmax.f32 %v3811_v52, %v3812_v56 }
 0x15a   : >> { %v2280_v54 = vpop.f32.mrf.mxu1  ;;  %v2120_v37 = vadd.f32 %v2105_v30, %v2067_v41  ;;  %v2175_v43 = vadd.f32 %v3035_v0, %v2122_v59  ;;  %v1910_v30 = vadd.f32 %v3694_v34, %v1848_v32  ;;  %v1908_v0 = vadd.f32 %v3696_v38, %v1846_v62  ;;  %v3809_v41 = vld [vmem:[#allocation14_spill] sm:$0xff] }
 0x15b   : >> { %v3030_v2 = vpop.f32.mrf.mxu0  ;;  %v1849_v57 = vadd.f32 %v3688_v61, %v1777_v22  ;;  %v1847_v26 = vadd.f32 %v3690_v12, %v1775_v15  ;;  %v3808_v12 = vld [vmem:[#allocation13_spill] sm:$0xff] }
 0x15c   : >> { %v3048_v16 = vpop.f32.mrf.mxu1  ;;  %v2123_v14 = vadd.f32 %v3030_v2, %v2070_v53  ;;  %v2173_v60 = vadd.f32 %v2158_v4, %v2120_v37  ;;  %v1914_v51 = vadd.f32 %v3218_v9, %v1910_v30  ;;  %v3810_v21 = vmax.f32 %v3808_v12, %v3809_v41  ;;  %v3815_v30 = vld [vmem:[#allocation18_spill] sm:$0xff] }
 0x15d   : >> { %v2108_v50 = vpop.f32.mrf.mxu0  ;;  %v1911_v34 = vadd.f32 %v3698_v19, %v1849_v57  ;;  %v3807_v19 = vld [vmem:[#allocation19_spill] sm:$0xff]  ;;  %v3816_v62 = vmax.f32 %v3814_v18, %v3815_v30 }
 0x15e   : >> { %v2283_v33 = vpop.f32.mrf.mxu1  ;;  %v2121_v10 = vadd.f32 %v2108_v50, %v2068_v47  ;;  %v2176_v23 = vadd.f32 %v3036_v8, %v2123_v14  ;;  %v1912_v8 = vadd.f32 %v3218_v9, %v1908_v0  ;;  %v1909_v1 = vadd.f32 %v3807_v19, %v1847_v26 }
 0x15f   : >> { %v3041_v42 = vpop.f32.mrf.mxu0  ;;  %v1915_v36 = vadd.f32 %v3218_v9, %v1911_v34 }
 0x160   : >> { %v2228_v48 = vadd.f32 %v3041_v42, %v2175_v43  ;;  %v3059_v44 = vpop.f32.mrf.mxu1  ;;  %v2174_v29 = vadd.f32 %v2161_v39, %v2121_v10  ;;  %v3805_v39 = vld [vmem:[#allocation12_spill] sm:$0xff]  ;;  %v1916_v6 = vmax.f32 %v3810_v21, %v1912_v8  ;;  %v1913_v14 = vadd.f32 %v3218_v9, %v1909_v1 }
 0x161   : >> { %v2211_v55 = vpop.f32.mrf.mxu0  ;;  %v1919_v42 = vmax.f32 %v3813_v7, %v1915_v36 }
 0x162   : >> { %v2226_v17 = vadd.f32 %v2211_v55, %v2173_v60  ;;  %v2297_v4 = vadd.f32 %v3047_v27, %v2228_v48  ;;  %v2414_v35 = vpop.f32.mrf.mxu1  ;;  %v3806_v27 = vmax.f32 %v3804_v49, %v3805_v39 }
 0x163   : >> { %v3042_v13 = vpop.f32.mrf.mxu0 }
 0x164   : >> { %v2229_v25 = vadd.f32 %v3042_v13, %v2176_v23  ;;  %v2295_v20 = vadd.f32 %v2280_v54, %v2226_v17  ;;  %v1918_v11 = vmax.f32 %v3806_v27, %v1914_v51  ;;  %v3060_v31 = vpop.f32.mrf.mxu1  ;;  %v1917_v13 = vmax.f32 %v3816_v62, %v1913_v14 }
 0x165   : >> { %v2214_v24 = vpop.f32.mrf.mxu0 }
 0x166   : >> { %v2227_v40 = vadd.f32 %v2214_v24, %v2174_v29  ;;  %v2298_v46 = vadd.f32 %v3048_v16, %v2229_v25  ;;  %v2417_v47 = vpop.f32.mrf.mxu1 }
 0x167   : >> { %v3053_v58 = vpop.f32.mrf.mxu0 }
 0x168   : >> { %v2369_v63 = vadd.f32 %v3053_v58, %v2297_v4  ;;  %v2296_v59 = vadd.f32 %v2283_v33, %v2227_v40 }
 0x169   : >> { %v2352_v38 = vpop.f32.mrf.mxu0 }
 0x16a   : >> { %v2431_v28 = vadd.f32 %v3059_v44, %v2369_v63  ;;  %v2367_v61 = vadd.f32 %v2352_v38, %v2295_v20 }
 0x16b   : >> { %v3054_v5 = vpop.f32.mrf.mxu0 }
 0x16c   : >> { %v2435_v54 = vadd.f32 %v3218_v9, %v2431_v28  ;;  %v2429_v2 = vadd.f32 %v2414_v35, %v2367_v61  ;;  %v2370_v45 = vadd.f32 %v3054_v5, %v2298_v46 }
 0x16d   : >> { %v2355_v16 = vpop.f32.mrf.mxu0 }
 0x16e   : >> { %v2439_v3 = vmax.f32 %v1918_v11, %v2435_v54  ;;  %v2433_v50 = vadd.f32 %v3218_v9, %v2429_v2  ;;  %v2432_v37 = vadd.f32 %v3060_v31, %v2370_v45  ;;  %v2368_v53 = vadd.f32 %v2355_v16, %v2296_v59 }
 0x170   : >> { %v2443_v33 = vmax.f32 %v2439_v3, 0.0  ;;  %v2437_v43 = vmax.f32 %v1916_v6, %v2433_v50  ;;  %v2436_v22 = vadd.f32 %v3218_v9, %v2432_v37  ;;  %v2430_v32 = vadd.f32 %v2417_v47, %v2368_v53 }
 0x172   : >> { %v2475_v55 = vsel %vm2445_vm4, %v2443_v33, -inf  ;;  %v2482_v10 = vsel %vm2453_vm5, %v2443_v33, -inf  ;;  %v2441_v48 = vmax.f32 %v2437_v43, 0.0  ;;  %v2440_v60 = vmax.f32 %v1919_v42, %v2436_v22 }
 0x173   : >> { %v2434_v44 = vadd.f32 %v3218_v9, %v2430_v32  ;;  %v2476_v17 = vrot.slane %v2475_v55, 4  ;;  %v2483_v57 = vrot.slane %v2482_v10, 4 }
 0x174   : >> { %v2446_v23 = vsel %vm2445_vm4, %v2441_v48, -inf  ;;  %v2454_v15 = vsel %vm2453_vm5, %v2441_v48, -inf  ;;  %v2444_v0 = vmax.f32 %v2440_v60, 0.0  ;;  %v2513_v48 = vld [vmem:[%s2509_s20] sm:$0xf] }
 0x175   : >> { %v2447_v24 = vrot.slane %v2446_v23, 4  ;;  %v2455_v25 = vrot.slane %v2454_v15, 4  ;;  %v2438_v4 = vmax.f32 %v1917_v13, %v2434_v44  ;;  %v2477_v35 = vmax.f32 %v2475_v55, %v2476_v17 }
 0x176   : >> { %v2489_v29 = vsel %vm2445_vm4, %v2444_v0, -inf  ;;  %v2484_v63 = vmax.f32 %v2482_v10, %v2483_v57 }
 0x177   : >> { %v2448_v51 = vmax.f32 %v2446_v23, %v2447_v24  ;;  %v2456_v34 = vmax.f32 %v2454_v15, %v2455_v25  ;;  %v2490_v58 = vrot.slane %v2489_v29, 4  ;;  %v2442_v40 = vmax.f32 %v2438_v4, 0.0 }
 0x178   : >> { %v2478_v49 = vrot.slane %v2477_v35, 2  ;;  %v2485_v11 = vrot.slane %v2484_v63, 2 }
 0x179   : >> { %v2449_v20 = vrot.slane %v2448_v51, 2  ;;  %v2457_v8 = vrot.slane %v2456_v34, 2  ;;  %v2491_v26 = vmax.f32 %v2489_v29, %v2490_v58  ;;  %v2461_v38 = vsel %vm2445_vm4, %v2442_v40, -inf }
 0x17a   : >> { %v2468_v28 = vsel %vm2453_vm5, %v2442_v40, -inf  ;;  %v2462_v39 = vrot.slane %v2461_v38, 4  ;;  %v2479_v54 = vmax.f32 %v2477_v35, %v2478_v49  ;;  %v2486_v59 = vmax.f32 %v2484_v63, %v2485_v11 }
 0x17b   : >> { %v2450_v61 = vmax.f32 %v2448_v51, %v2449_v20  ;;  %v2458_v46 = vmax.f32 %v2456_v34, %v2457_v8  ;;  %v2469_v27 = vrot.slane %v2468_v28, 4  ;;  %v2492_v36 = vrot.slane %v2491_v26, 2 }
 0x17c   : >> { %v2463_v19 = vmax.f32 %v2461_v38, %v2462_v39  ;;  %v2480_v3 = vrot.slane %v2479_v54, 1  ;;  %v2487_v53 = vrot.slane %v2486_v59, 1 }
 0x17d   : >> { %v2470_v1 = vmax.f32 %v2468_v28, %v2469_v27  ;;  %v2451_v31 = vrot.slane %v2450_v61, 1  ;;  %v2459_v5 = vrot.slane %v2458_v46, 1  ;;  %v2493_v12 = vmax.f32 %v2491_v26, %v2492_v36 }
 0x17e   : >> { %v2464_v2 = vrot.slane %v2463_v19, 2  ;;  %v2481_v14 = vmax.f32 %v2479_v54, %v2480_v3  ;;  %v2488_v33 = vmax.f32 %v2486_v59, %v2487_v53 }
 0x17f   : >> { %v2471_v45 = vrot.slane %v2470_v1, 2  ;;  %v2452_v6 = vmax.f32 %v2450_v61, %v2451_v31  ;;  %v2460_v16 = vmax.f32 %v2458_v46, %v2459_v5  ;;  %v2494_v52 = vrot.slane %v2493_v12, 1 }
 0x180   : >> { %v2465_v41 = vmax.f32 %v2463_v19, %v2464_v2 }
 0x181   : >> { %v2472_v21 = vmax.f32 %v2470_v1, %v2471_v45  ;;  %v2497_v42 = vsel %vm2496_vm6, %v2452_v6, %v2460_v16  ;;  %v2495_v22 = vmax.f32 %v2493_v12, %v2494_v52 }
 0x182   : >> { %v2466_v50 = vrot.slane %v2465_v41, 1 }
 0x183   : >> { %v2473_v37 = vrot.slane %v2472_v21, 1 }
 0x184   : >> { %v2467_v56 = vmax.f32 %v2465_v41, %v2466_v50 }
 0x185   : >> { %v2474_v7 = vmax.f32 %v2472_v21, %v2473_v37 }
 0x186   : >> { %v2498_v47 = vsel %vm269_vm0, %v2497_v42, %v2467_v56 }
 0x187   : >> { %v2500_v43 = vsel %vm2499_vm7, %v2498_v47, %v2474_v7 }
 0x188   : >> { %v2502_v32 = vsel %vm2501_vm8, %v2500_v43, %v2481_v14 }
 0x189   : >> { %v2504_v55 = vsel %vm2503_vm9, %v2502_v32, %v2488_v33 }
 0x18a   : >> { %v2506_v10 = vsel %vm2505_vm11, %v2504_v55, %v2495_v22  ;;  %186 = sbr.rel (!%p184_p4) target bundleno = 19 (0x13), region = 76 }
 0x18b   : >> { %v2507_v60 = vpack.c.bf16 %v2506_v10, %v2506_v10 }
 0x18d   : >> { %v2514_v18 = vsel %vm2512_vm12, %v2507_v60, %v2513_v48 }
 0x18e   : >> { %2515 = vst [vmem:[%s2509_s20] sm:$0xf] %v2514_v18 }
 0x18f PF: > { %s13_s12 = sadd.s32 1, %s3136_s12  }
 0x190   : > { %p10_p5 = scmp.ge.s32.totalorder %s13_s12, 4  }
 0x192   :  { %12 = sbr.rel (!%p10_p5) target bundleno = 1 (0x1), region = 87 }

// kernel: dqn_forward.5
= control target key start
LH: loop header
LB: loop body
LE: loop exit
PB: predicated region body
PF: predicated region fallthrough
CT: control target
= control target key end

     0   :  { %v490_v0 = vmov 0.0   ;;  %vm491_vm0 = vmmov 0   ;;  %vm61_vm1 = vcmask 523264   ;;  %v492_v15 = vmov 0   ;;  %s600_s1 = inlined_call_operand.vmem [shape: bf16[64,32], index: 1, kind: input, shape index: {}]   ;;  %s601_s3 = inlined_call_operand.vmem [shape: bf16[32,768], index: 3, kind: input, shape index: {}]   ;;  %s602_s0 = inlined_call_operand.vmem [shape: bf16[2,64], index: 0, kind: input, shape index: {}]   ;;  %s603_s2 = inlined_call_operand.vmem [shape: f32[1,32], index: 2, kind: input, shape index: {}]   ;;  %s604_s4 = inlined_call_operand.vmem [shape: f32[1,768], index: 4, kind: input, shape index: {}]   ;;  %s605_s5 = inlined_call_operand.vmem [shape: f32[2,512], index: 5, kind: output, shape index: {}]  }
   0x1   :  { %437 = vmatprep.subr.bf16.mxu0 %v490_v0  ;;  %v452_v1 = vld [vmem:[%s600_s1 + $0x18] sm:$0xff]   ;;  %445 = vmatprep.mubr.msk.bf16.mxu0 %vm491_vm0, %v490_v0  ;;  %v453_v2 = vld [vmem:[%s600_s1 + $0x10] sm:$0xff]   ;;  %v454_v5 = vld [vmem:[%s600_s1 + $0x8] sm:$0xff]   ;;  %vm211_vm2 = vcmask 261120   ;;  %v121_v27 = vlaneseq  ;;  %vm340_vm3 = vcmask 1041408  }
   0x2   :  { %438 = vmatpush3.bf16.msra.mxu0 %v452_v1  ;;  %v456_v3 = vld [vmem:[%s601_s3 + $0x34] ss:$24 sps:$4 sm:$0xff]   ;;  %v458_v4 = vld [vmem:[%s601_s3 + $0x30] ss:$24 sps:$4 sm:$0xff]   ;;  %v455_v6 = vld [vmem:[%s600_s1] sm:$0xff]   ;;  %247 = vmatprep.mubr.bf16.mxu1 %v492_v15 }
   0x3   :  { %439 = vmatprep.subr.bf16.mxu0 %v490_v0  ;;  %227 = vmatprep.subr.bf16.mxu1 %v456_v3  ;;  %v461_v7 = vld [vmem:[%s601_s3 + $0x44] ss:$24 sps:$4 sm:$0xff]   ;;  %v21_v8 = vld [vmem:[%s602_s0] sm:$0x1]  ;;  %v467_v11 = vld [vmem:[%s601_s3 + $0x14] ss:$24 sps:$4 sm:$0xff]  }
   0x4   :  { %228 = vmatpush1.bf16.msra.mxu1 %v458_v4  ;;  %v459_v9 = vld [vmem:[%s601_s3 + $0x40] ss:$24 sps:$4 sm:$0xff]   ;;  %v462_v10 = vld [vmem:[%s601_s3 + $0x4] ss:$24 sps:$4 sm:$0xff]   ;;  %v465_v13 = vld [vmem:[%s601_s3 + $0x10] ss:$24 sps:$4 sm:$0xff]  }
   0x5   :  { %v464_v12 = vld [vmem:[%s601_s3] ss:$24 sps:$4 sm:$0xff]   ;;  %229 = vmatprep.subr.bf16.mxu1 %v462_v10  ;;  %v470_v14 = vld [vmem:[%s601_s3 + $0x3c] ss:$24 sps:$4 sm:$0xff]   ;;  %v473_v24 = vld [vmem:[%s601_s3 + $0xc] ss:$24 sps:$4 sm:$0xff]  }
   0x6   :  { %440 = vmatpush3.bf16.msra.mxu0 %v453_v2  ;;  %v411_v16 = vld [vmem:[%s603_s2] ss:$0 sm:$0xff]  ;;  %v468_v22 = vld [vmem:[%s601_s3 + $0x38] ss:$24 sps:$4 sm:$0xff]   ;;  %v122_v28 = vshrl.u32 %v121_v27, 7 }
   0x7   :  { %441 = vmatprep.subr.bf16.mxu0 %v490_v0  ;;  %v471_v26 = vld [vmem:[%s601_s3 + $0x8] ss:$24 sps:$4 sm:$0xff]  }
   0x8   :  { %230 = vmatpush1.bf16.msra.mxu1 %v464_v12  ;;  %v123_v29 = vsub.s32 0, %v122_v28  ;;  %v139_v30 = vsub.s32 4, %v122_v28  ;;  %v119_v31 = vld [vmem:[%s604_s4] sm:$0x3f]  ;;  %v127_v32 = vsub.s32 1, %v122_v28  ;;  %v143_v33 = vsub.s32 5, %v122_v28 }
   0x9   :  { %268 = vmatprep.subr.bf16.mxu1 %v470_v14  ;;  %v131_v42 = vsub.s32 2, %v122_v28  ;;  %v135_v48 = vsub.s32 3, %v122_v28 }
   0xa   :  { %442 = vmatpush3.bf16.msra.mxu0 %v454_v5  ;;  %v124_v34 = vrot.slane %v119_v31, %v123_v29  ;;  %v140_v35 = vrot.slane %v119_v31, %v139_v30  ;;  %v128_v36 = vrot.slane %v119_v31, %v127_v32  ;;  %v144_v37 = vrot.slane %v119_v31, %v143_v33 }
   0xb   :  { %443 = vmatprep.subr.bf16.mxu0 %v490_v0  ;;  %v132_v52 = vrot.slane %v119_v31, %v131_v42  ;;  %v136_v57 = vrot.slane %v119_v31, %v135_v48 }
   0xe   :  { %444 = vmatpush3.bf16.msra.mxu0 %v455_v6 }
   0xf   :  { %309 = vmatprep.subr.bf16.mxu0 %v461_v7 }
  0x11   :  { %446 = vmatmul.mubr.msk.bf16.vlgmr.msra.gmra.mxu0 %vm61_vm1, %v21_v8 }
  0x12   :  { %310 = vmatpush1.bf16.msra.mxu0 %v459_v9  ;;  %329 = vmatprep.mubr.bf16.mxu0 %v492_v15 }
  0x13   :  { %311 = vmatprep.subr.bf16.mxu0 %v467_v11 }
  0x16   :  { %312 = vmatpush1.bf16.msra.mxu0 %v465_v13 }
  0xd1   :  { %v99_v17 = vpop.f32.mrf.mxu0 }
  0xd2   :  { %v100_v18 = vadd.f32 %v411_v16, %v99_v17 }
  0xd3   :  { %v447_v19 = vpop.f32.mrf.mxu0 }
  0xd4   :  { %v105_v20 = vmax.f32 %v100_v18, 0.0 }
  0xd5   :  { %v102_v21 = vpop.f32.mrf.mxu0 }
  0xd6   :  { %v106_v23 = vpack.c.bf16 %v105_v20, %v105_v20 }
  0xd7   :  { %v448_v25 = vpop.f32.mrf.mxu0 }
  0xd8   :  { %429 = vmatmul.mubr.msk.bf16.vlgmr.msra.gmra.mxu1 %vm211_vm2, %v106_v23  ;;  %431 = vmatmul.mubr.msk.bf16.vlgmr.msra.gmra.mxu0 %vm211_vm2, %v106_v23 }
  0xd9   :  { %269 = vmatpush1.bf16.msra.mxu1 %v468_v22  ;;  %288 = vmatprep.mubr.bf16.mxu1 %v492_v15 }
  0xda   :  { %270 = vmatprep.subr.bf16.mxu1 %v473_v24 }
  0xdd   :  { %271 = vmatpush1.bf16.msra.mxu1 %v471_v26 }
  0xe0   :  { %430 = vmatmul.mubr.msk.bf16.vlgmr.msra.gmra.mxu1 %vm211_vm2, %v106_v23 }
 0x198   :  { %v249_v38 = vpop.f32.mrf.mxu1  ;;  %v331_v39 = vpop.f32.mrf.mxu0 }
 0x199   :  { %v250_v40 = vadd.f32 %v249_v38, %v124_v34  ;;  %v332_v41 = vadd.f32 %v331_v39, %v140_v35 }
 0x19a   :  { %v251_v43 = vpop.f32.mrf.mxu1  ;;  %v333_v44 = vpop.f32.mrf.mxu0 }
 0x19b   :  { %v373_v45 = vadd.f32 %v332_v41, %v250_v40  ;;  %v252_v46 = vadd.f32 %v251_v43, %v128_v36  ;;  %v334_v47 = vadd.f32 %v333_v44, %v144_v37 }
 0x19c   :  { %v253_v49 = vpop.f32.mrf.mxu1  ;;  %v335_v50 = vpop.f32.mrf.mxu0 }
 0x19d   :  { %v390_v51 = vadd.f32 %v334_v47, %v250_v40  ;;  %v374_v53 = vsub.f32 %v373_v45, %v252_v46 }
 0x19e   :  { %v254_v54 = vpop.f32.mrf.mxu1  ;;  %v336_v55 = vpop.f32.mrf.mxu0 }
 0x19f   :  { %v375_v56 = vsel %vm340_vm3, %v374_v53, -inf  ;;  %v391_v58 = vsub.f32 %v390_v51, %v252_v46 }
 0x1a0   :  { %v290_v59 = vpop.f32.mrf.mxu1  ;;  %376 = vmax.xlane.f32.xlu1 %v375_v56 }
 0x1a1   :  { %v291_v60 = vadd.f32 %v290_v59, %v132_v52  ;;  %v392_v0 = vsel %vm340_vm3, %v391_v58, -inf }
 0x1a2   :  { %v292_v61 = vpop.f32.mrf.mxu1 }
 0x1a3   :  { %v338_v62 = vadd.f32 %v291_v60, %v250_v40  ;;  %v293_v63 = vadd.f32 %v292_v61, %v136_v57 }
 0x1a4   :  { %v294_v1 = vpop.f32.mrf.mxu1  ;;  %393 = vmax.xlane.f32.xlu1 %v392_v0 }
 0x1a5   :  { %v356_v2 = vadd.f32 %v293_v63, %v250_v40  ;;  %v339_v3 = vsub.f32 %v338_v62, %v252_v46 }
 0x1a6   :  { %v295_v4 = vpop.f32.mrf.mxu1 }
 0x1a7   :  { %v341_v5 = vsel %vm340_vm3, %v339_v3, -inf  ;;  %v357_v6 = vsub.f32 %v356_v2, %v252_v46 }
 0x1a8   :  { %342 = vmax.xlane.f32.xlu0 %v341_v5 }
 0x1a9   :  { %v358_v7 = vsel %vm340_vm3, %v357_v6, -inf }
 0x1ac   :  { %359 = vmax.xlane.f32.xlu0 %v358_v7 }
 0x229   :  { %v377_v8 = vpop.xlane.xlu1 %376 }
 0x22a   :  { %v378_v9 = vsub.f32 %v374_v53, %v377_v8 }
 0x22c   :  { %v379_v13 = vmul.f32 1.442695, %v378_v9 }
 0x22d   :  { %v394_v10 = vpop.xlane.xlu1 %393 }
 0x22e   :  { %v395_v14 = vsub.f32 %v391_v58, %v394_v10 }
 0x230   :  { %v396_v18 = vmul.f32 1.442695, %v395_v14 }
 0x231   :  { %v343_v11 = vpop.xlane.xlu0 %342 }
 0x232   :  { %v344_v12 = vsub.f32 %v339_v3, %v343_v11 }
 0x234   :  { %v345_v15 = vmul.f32 1.442695, %v344_v12 }
 0x235   :  { %v360_v16 = vpop.xlane.xlu0 %359 }
 0x236   :  { %474 = vpow2.f32 %v345_v15  ;;  %v361_v17 = vsub.f32 %v357_v6, %v360_v16 }
 0x237   :  { %476 = vpow2.f32 %v379_v13 }
 0x238   :  { %v362_v19 = vmul.f32 1.442695, %v361_v17 }
 0x23a   :  { %478 = vpow2.f32 %v362_v19 }
 0x23b   :  { %480 = vpow2.f32 %v396_v18 }
 0x243   :  { %v475_v20 = vpop.eup %474 }
 0x244   :  { %v347_v21 = vsel %vm340_vm3, %v475_v20, 0.0  ;;  %v477_v22 = vpop.eup %476 }
 0x245   :  { %348 = vadd.xlane.f32.xlu0 %v347_v21  ;;  %v381_v25 = vsel %vm340_vm3, %v477_v22, 0.0 }
 0x247   :  { %v479_v23 = vpop.eup %478 }
 0x248   :  { %v364_v24 = vsel %vm340_vm3, %v479_v23, 0.0  ;;  %v481_v26 = vpop.eup %480 }
 0x249   :  { %365 = vadd.xlane.f32.xlu1 %v364_v24  ;;  %382 = vadd.xlane.f32.xlu0 %v381_v25  ;;  %v398_v27 = vsel %vm340_vm3, %v481_v26, 0.0 }
 0x24d   :  { %399 = vadd.xlane.f32.xlu1 %v398_v27 }
 0x2ce   :  { %v349_v28 = vpop.xlane.xlu0 %348 }
 0x2cf   :  { %482 = vrcp.f32 %v349_v28 }
 0x2d2   :  { %v383_v29 = vpop.xlane.xlu0 %382  ;;  %v366_v30 = vpop.xlane.xlu1 %365 }
 0x2d3   :  { %484 = vrcp.f32 %v383_v29 }
 0x2d4   :  { %486 = vrcp.f32 %v366_v30 }
 0x2d6   :  { %v400_v31 = vpop.xlane.xlu1 %399 }
 0x2d7   :  { %488 = vrcp.f32 %v400_v31 }
 0x2dc   :  { %v483_v32 = vpop.eup %482 }
 0x2dd   :  { %v351_v33 = vmul.f32 %v483_v32, %v349_v28 }
 0x2df   :  { %v352_v34 = vsub.f32 2.0, %v351_v33 }
 0x2e0   :  { %v485_v35 = vpop.eup %484 }
 0x2e1   :  { %v487_v36 = vpop.eup %486  ;;  %v353_v37 = vmul.f32 %v483_v32, %v352_v34  ;;  %v385_v38 = vmul.f32 %v485_v35, %v383_v29 }
 0x2e2   :  { %v368_v39 = vmul.f32 %v487_v36, %v366_v30 }
 0x2e3   :  { %v354_v40 = vmul.f32 %v475_v20, %v353_v37  ;;  %v386_v41 = vsub.f32 2.0, %v385_v38 }
 0x2e4   :  { %v489_v42 = vpop.eup %488  ;;  %v369_v43 = vsub.f32 2.0, %v368_v39 }
 0x2e5   :  { %355 = vst [vmem:[%s605_s5] sm:$0x3] %v354_v40  ;;  %v387_v44 = vmul.f32 %v485_v35, %v386_v41  ;;  %v402_v45 = vmul.f32 %v489_v42, %v400_v31 }
 0x2e6   :  { %v370_v46 = vmul.f32 %v487_v36, %v369_v43 }
 0x2e7   :  { %v388_v47 = vmul.f32 %v477_v22, %v387_v44  ;;  %v403_v48 = vsub.f32 2.0, %v402_v45 }
 0x2e8   :  { %v371_v49 = vmul.f32 %v479_v23, %v370_v46 }
 0x2e9   :  { %389 = vst [vmem:[%s605_s5 + $0x4] sm:$0x3] %v388_v47  ;;  %v404_v50 = vmul.f32 %v489_v42, %v403_v48 }
 0x2ea   :  { %372 = vst [vmem:[%s605_s5 + $0x2] sm:$0x3] %v371_v49 }
 0x2eb   :  { %v405_v51 = vmul.f32 %v481_v26, %v404_v50 }
 0x2ed   :  { %406 = vst [vmem:[%s605_s5 + $0x6] sm:$0x3] %v405_v51 }

</bundles_post_ra>
